<compile_context>
chip_gen: v6e
topology: v6e:2x2x1
jax: 0.10.0
libtpu: 0.0.40
codegen_flags: <defaults>
</compile_context>

<pallas_src>
import functools

import jax
import jax.numpy as jnp
from jax import lax
from jax.experimental import pallas as pl
from jax.experimental.pallas import tpu as pltpu

BN_EPS = 1e-3   # matches nn.BatchNorm2d(eps=0.001)
LANE = 128
_PARALLEL1 = pltpu.CompilerParams(dimension_semantics=("parallel",))


def _round_up(x, m):
    return (x + m - 1) // m * m


# ----------------------------- Pallas kernels ------------------------------ #

def _gemm_bn_relu_kernel(x_ref, w_ref, scale_ref, bias_ref, o_ref):
    # (TM, Cin) bf16 @ (Cin, Coutp) bf16 -> f32, fused BN + ReLU.
    acc = jnp.dot(x_ref[...], w_ref[...], preferred_element_type=jnp.float32)
    y = acc * scale_ref[...] + bias_ref[...]
    o_ref[...] = jnp.maximum(y, 0.0).astype(o_ref.dtype)


def _accumulate_taps(x_ref, w_ref, taps, mrows):
    # x_ref: (1, P, L, Cin) bf16 flattened phase planes; w_ref: (9, Cin, Coutp) bf16.
    acc = None
    for t, (plane, off) in enumerate(taps):
        tap = x_ref[0, plane, off:off + mrows, :]          # contiguous (mrows, Cin)
        part = jnp.dot(tap, w_ref[t], preferred_element_type=jnp.float32)
        acc = part if acc is None else acc + part
    return acc


def _conv3x3_bn_relu_kernel(x_ref, w_ref, scale_ref, bias_ref, o_ref, *,
                            taps, mrows):
    acc = _accumulate_taps(x_ref, w_ref, taps, mrows)
    y = acc * scale_ref[...] + bias_ref[...]
    o_ref[0] = jnp.maximum(y, 0.0).astype(o_ref.dtype)


def _conv3x3_pool_bn_relu_kernel(x_ref, w_ref, scale_ref, bias_ref,
                                 oc_ref, op_ref, *, taps, mrows):
    # Fused: stride-2 3x3 conv+BN+ReLU AND stride-2 3x3 max-pool on the same input.
    acc = None
    pmax = None
    for t, (plane, off) in enumerate(taps):
        tap = x_ref[0, plane, off:off + mrows, :]
        part = jnp.dot(tap, w_ref[t], preferred_element_type=jnp.float32)
        acc = part if acc is None else acc + part
        pmax = tap if pmax is None else jnp.maximum(pmax, tap)
    y = acc * scale_ref[...] + bias_ref[...]
    oc_ref[0] = jnp.maximum(y, 0.0).astype(oc_ref.dtype)
    op_ref[0] = pmax.astype(op_ref.dtype)


# --------------------------- wrapper-side plumbing -------------------------- #

def _bn_fold(gamma, beta, mean, var, cout_pad):
    inv = 1.0 / jnp.sqrt(var + BN_EPS)
    scale = (gamma * inv).astype(jnp.float32)
    bias = (beta - mean * gamma * inv).astype(jnp.float32)
    pad = cout_pad - scale.shape[0]
    scale = jnp.pad(scale, (0, pad)).reshape(1, cout_pad)
    bias = jnp.pad(bias, (0, pad)).reshape(1, cout_pad)
    return scale, bias


def _flatten_taps_s1(x_nhwc, pad):
    """3x3 stride-1 conv: pad spatially and flatten to one plane.  Tap (i,j) is the
    contiguous flat window starting at i*Wp + j (extra Wp-Wout columns are computed
    and later dropped)."""
    n, h, w, c = x_nhwc.shape
    hout, wout = h + 2 * pad - 2, w + 2 * pad - 2
    hp, wp = h + 2 * pad, w + 2 * pad
    xp = jnp.pad(x_nhwc, ((0, 0), (pad, pad), (pad, pad), (0, 0)))
    flat = xp.reshape(n, 1, hp * wp, c)
    mrows = hout * wp
    taps = [(0, i * wp + j) for i in range(3) for j in range(3)]
    l_req = max(off for _, off in taps) + mrows
    if l_req > hp * wp:
        flat = jnp.pad(flat, ((0, 0), (0, 0), (0, l_req - hp * wp), (0, 0)))
    return flat, taps, mrows, wp, hout, wout


def _flatten_taps_s2(x_nhwc):
    """3x3 stride-2 pad-0 (conv and max-pool): split into the 4 stride-phase planes
    so every tap becomes a contiguous window, then flatten each plane."""
    n, h, w, c = x_nhwc.shape
    hout, wout = (h - 3) // 2 + 1, (w - 3) // 2 + 1
    hh, wh = (h + 1) // 2, (w + 1) // 2
    xe = jnp.pad(x_nhwc, ((0, 0), (0, 2 * hh - h), (0, 2 * wh - w), (0, 0)))
    ph = xe.reshape(n, hh, 2, wh, 2, c).transpose(0, 2, 4, 1, 3, 5)  # (N,2,2,hh,wh,C)
    flat = ph.reshape(n, 4, hh * wh, c)
    mrows = hout * wh
    taps = [((i % 2) * 2 + (j % 2), (i // 2) * wh + (j // 2))
            for i in range(3) for j in range(3)]
    l_req = max(off for _, off in taps) + mrows
    if l_req > hh * wh:
        flat = jnp.pad(flat, ((0, 0), (0, 0), (0, l_req - hh * wh), (0, 0)))
    return flat, taps, mrows, wh, hout, wout


def _conv1x1_bn_relu(x_nhwc, lp, *, out_dtype=jnp.float32, tile_m=256):
    """1x1 conv + BN + ReLU as an M-tiled GEMM (no im2col)."""
    w = lp["w"]
    cout, cin = w.shape[0], w.shape[1]
    n, h, ww, _ = x_nhwc.shape
    coutp = _round_up(cout, LANE)
    m = n * h * ww
    mp = _round_up(m, tile_m)
    xf = x_nhwc.reshape(m, cin)
    if mp != m:
        xf = jnp.pad(xf, ((0, mp - m), (0, 0)))
    xf = xf.astype(jnp.bfloat16)
    wmat = jnp.pad(w.reshape(cout, cin).T, ((0, 0), (0, coutp - cout)))
    wmat = wmat.astype(jnp.bfloat16)
    scale, bias = _bn_fold(lp["gamma"], lp["beta"], lp["mean"], lp["var"], coutp)
    out = pl.pallas_call(
        _gemm_bn_relu_kernel,
        out_shape=jax.ShapeDtypeStruct((mp, coutp), out_dtype),
        grid=(mp // tile_m,),
        in_specs=[pl.BlockSpec((tile_m, cin), lambda i: (i, 0)),
                  pl.BlockSpec((cin, coutp), lambda i: (0, 0)),
                  pl.BlockSpec((1, coutp), lambda i: (0, 0)),
                  pl.BlockSpec((1, coutp), lambda i: (0, 0))],
        out_specs=pl.BlockSpec((tile_m, coutp), lambda i: (i, 0)),
        compiler_params=_PARALLEL1,
    )(xf, wmat, scale, bias)
    return out[:m, :cout].reshape(n, h, ww, cout)


def _conv3x3_bn_relu(x_nhwc, lp, *, stride, pad, out_dtype=jnp.float32,
                     fuse_pool=False):
    """3x3 conv + BN + ReLU (optionally fused with the 3x3/s2 max-pool branch)."""
    w = lp["w"]
    cout, cin = w.shape[0], w.shape[1]
    n = x_nhwc.shape[0]
    coutp = _round_up(cout, LANE)
    if stride == 1:
        flat, taps, mrows, wq, hout, wout = _flatten_taps_s1(x_nhwc, pad)
    else:
        assert stride == 2 and pad == 0
        flat, taps, mrows, wq, hout, wout = _flatten_taps_s2(x_nhwc)
    flat = flat.astype(jnp.bfloat16)
    nplanes, lflat = flat.shape[1], flat.shape[2]
    wmat = jnp.transpose(w, (2, 3, 1, 0)).reshape(9, cin, cout)  # (kh,kw,cin,cout)
    wmat = jnp.pad(wmat, ((0, 0), (0, 0), (0, coutp - cout))).astype(jnp.bfloat16)
    scale, bias = _bn_fold(lp["gamma"], lp["beta"], lp["mean"], lp["var"], coutp)

    in_specs = [
        pl.BlockSpec((1, nplanes, lflat, cin), lambda b: (b, 0, 0, 0)),
        pl.BlockSpec((9, cin, coutp), lambda b: (0, 0, 0)),
        pl.BlockSpec((1, coutp), lambda b: (0, 0)),
        pl.BlockSpec((1, coutp), lambda b: (0, 0)),
    ]
    if fuse_pool:
        kern = functools.partial(_conv3x3_pool_bn_relu_kernel,
                                 taps=tuple(taps), mrows=mrows)
        out_shape = (jax.ShapeDtypeStruct((n, mrows, coutp), out_dtype),
                     jax.ShapeDtypeStruct((n, mrows, cin), jnp.float32))
        out_specs = (pl.BlockSpec((1, mrows, coutp), lambda b: (b, 0, 0)),
                     pl.BlockSpec((1, mrows, cin), lambda b: (b, 0, 0)))
    else:
        kern = functools.partial(_conv3x3_bn_relu_kernel,
                                 taps=tuple(taps), mrows=mrows)
        out_shape = jax.ShapeDtypeStruct((n, mrows, coutp), out_dtype)
        out_specs = pl.BlockSpec((1, mrows, coutp), lambda b: (b, 0, 0))

    res = pl.pallas_call(
        kern,
        out_shape=out_shape,
        grid=(n,),
        in_specs=in_specs,
        out_specs=out_specs,
        compiler_params=_PARALLEL1,
    )(flat, wmat, scale, bias)

    def _crop(o, cc):
        return o.reshape(n, hout, wq, o.shape[-1])[:, :, :wout, :cc]

    if fuse_pool:
        return _crop(res[0], cout), _crop(res[1], cin)
    return _crop(res, cout)


# ---------------------------- InceptionB module ---------------------------- #

def make_conv2d_layer_params(key, cin, cout, k):
    k1, k2, k3, k4, k5 = jax.random.split(key, 5)
    return dict(
        w=0.1 * jax.random.normal(k1, (cout, cin, k, k), jnp.float32),
        gamma=1.0 + 0.1 * jax.random.normal(k2, (cout,), jnp.float32),
        beta=0.1 * jax.random.normal(k3, (cout,), jnp.float32),
        mean=0.1 * jax.random.normal(k4, (cout,), jnp.float32),
        var=0.5 + jax.random.uniform(k5, (cout,), jnp.float32),
    )


def make_inception_b_params(key, num_channels):
    k0, k1, k2, k3 = jax.random.split(key, 4)
    return dict(
        conv=make_conv2d_layer_params(k0, num_channels, 384, 3),
        tower_conv=make_conv2d_layer_params(k1, num_channels, 64, 1),
        tower_conv_1=make_conv2d_layer_params(k2, 64, 96, 3),
        tower_conv_2=make_conv2d_layer_params(k3, 96, 96, 3),
    )


def inception_b_forward(x_nchw, params):
    x = jnp.transpose(x_nchw, (0, 2, 3, 1))                       # NCHW -> NHWC
    # branch 0 (384ch 3x3/s2 conv) + pool branch share one fused kernel / one DMA.
    b0, pool = _conv3x3_bn_relu(x, params["conv"], stride=2, pad=0,
                                out_dtype=jnp.float32, fuse_pool=True)
    # tower: 1x1 -> 3x3(pad1) -> 3x3(s2); intermediates kept bf16 in HBM.
    t = _conv1x1_bn_relu(x, params["tower_conv"], out_dtype=jnp.bfloat16)
    t = _conv3x3_bn_relu(t, params["tower_conv_1"], stride=1, pad=1,
                         out_dtype=jnp.bfloat16)
    t = _conv3x3_bn_relu(t, params["tower_conv_2"], stride=2, pad=0,
                         out_dtype=jnp.float32)
    out = jnp.concatenate([b0, t.astype(jnp.float32), pool], axis=-1)
    return jnp.transpose(out, (0, 3, 1, 2))                       # NHWC -> NCHW


# ----------------------------- pure-JAX reference --------------------------- #
# Mirrors the kernel's bf16 MXU inputs (f32 accumulation) so the check isolates
# kernel indexing / BN correctness from the standard bf16 dtype tradeoff.

def _ref_layer(x_nchw, lp, *, stride, pad):
    y = lax.conv_general_dilated(
        x_nchw.astype(jnp.bfloat16), lp["w"].astype(jnp.bfloat16),
        (stride, stride), [(pad, pad), (pad, pad)],
        dimension_numbers=("NCHW", "OIHW", "NCHW"),
        preferred_element_type=jnp.float32)
    inv_std = 1.0 / jnp.sqrt(lp["var"] + BN_EPS)
    scale = (lp["gamma"] * inv_std)[None, :, None, None]
    bias = (lp["beta"] - lp["mean"] * lp["gamma"] * inv_std)[None, :, None, None]
    return jnp.maximum(y * scale + bias, 0.0)


def inception_b_reference(x_nchw, params):
    b0 = _ref_layer(x_nchw, params["conv"], stride=2, pad=0)
    t = _ref_layer(x_nchw, params["tower_conv"], stride=1, pad=0)
    t = _ref_layer(t, params["tower_conv_1"], stride=1, pad=1)
    t = _ref_layer(t, params["tower_conv_2"], stride=2, pad=0)
    xq = x_nchw.astype(jnp.bfloat16).astype(jnp.float32)
    p = lax.reduce_window(xq, -jnp.inf, lax.max,
                          (1, 1, 3, 3), (1, 1, 2, 2), "VALID")
    return jnp.concatenate([b0, t, p], axis=1)


# ----------------------------------- main ----------------------------------- #

if __name__ == "__main__":
    key = jax.random.PRNGKey(0)
    k_x, k_p = jax.random.split(key)
    N, C, H, W = 2, 4, 16, 16
    x = jax.random.normal(k_x, (N, C, H, W), jnp.float32)
    params = make_inception_b_params(k_p, C)

    fwd = jax.jit(inception_b_forward)
    out = jax.block_until_ready(fwd(x, params))

    expected_channels = 384 + 96 + C
    assert out.shape == (N, expected_channels, 7, 7), out.shape

    ref = jax.block_until_ready(inception_b_reference(x, params))
    max_err = float(jnp.max(jnp.abs(out - ref)))
    assert jnp.allclose(out, ref, atol=1e-2, rtol=1e-2), max_err

    print("KERNEL_OK")
</pallas_src>

<mosaic_0001>
module attributes {stable_mosaic.version = 11 : i64} {
  func.func @_gemm_bn_relu_kernel(%arg0: i32, %arg1: memref<256x4xbf16, #tpu.memory_space<vmem>>, %arg2: memref<4x128xbf16, #tpu.memory_space<vmem>>, %arg3: memref<1x128xf32, #tpu.memory_space<vmem>>, %arg4: memref<1x128xf32, #tpu.memory_space<vmem>>, %arg5: memref<256x128xbf16, #tpu.memory_space<vmem>>) attributes {dimension_semantics = [#tpu.dimension_semantics<parallel>], iteration_bounds = array<i64: 2>, scalar_prefetch = 0 : i64, scratch_operands = 0 : i64, tpu.core_type = #tpu.core_type<tc>, window_params = [{transform_indices = @transform_0, window_bounds = array<i64: 256, 4>}, {pipeline_mode = #tpu.pipeline_mode<synchronous>, transform_indices = @transform_1, window_bounds = array<i64: 4, 128>}, {pipeline_mode = #tpu.pipeline_mode<synchronous>, transform_indices = @transform_2, window_bounds = array<i64: 1, 128>}, {pipeline_mode = #tpu.pipeline_mode<synchronous>, transform_indices = @transform_3, window_bounds = array<i64: 1, 128>}, {transform_indices = @transform_4, window_bounds = array<i64: 256, 128>}]} {
    %c0 = arith.constant 0 : index
    %c0_0 = arith.constant 0 : index
    %0 = vector.load %arg1[%c0, %c0_0] : memref<256x4xbf16, #tpu.memory_space<vmem>>, vector<256x4xbf16>
    %c0_1 = arith.constant 0 : index
    %c0_2 = arith.constant 0 : index
    %1 = vector.load %arg2[%c0_1, %c0_2] : memref<4x128xbf16, #tpu.memory_space<vmem>>, vector<4x128xbf16>
    %cst = arith.constant dense<0.000000e+00> : vector<256x128xf32>
    %2 = tpu.matmul %0, %1, %cst {dimension_numbers = #tpu.dot_dimension_numbers<[1], [0], [0], [1], [0, 0, 1, 1], [], []>} : vector<256x4xbf16>, vector<4x128xbf16>, vector<256x128xf32> -> vector<256x128xf32>
    %c0_3 = arith.constant 0 : index
    %c0_4 = arith.constant 0 : index
    %3 = vector.load %arg3[%c0_3, %c0_4] : memref<1x128xf32, #tpu.memory_space<vmem>>, vector<1x128xf32>
    %4 = vector.broadcast %3 : vector<1x128xf32> to vector<256x128xf32>
    %5 = arith.mulf %2, %4 : vector<256x128xf32>
    %c0_5 = arith.constant 0 : index
    %c0_6 = arith.constant 0 : index
    %6 = vector.load %arg4[%c0_5, %c0_6] : memref<1x128xf32, #tpu.memory_space<vmem>>, vector<1x128xf32>
    %7 = vector.broadcast %6 : vector<1x128xf32> to vector<256x128xf32>
    %8 = arith.addf %5, %7 : vector<256x128xf32>
    %cst_7 = arith.constant 0.000000e+00 : f32
    %9 = vector.broadcast %cst_7 : f32 to vector<256x128xf32>
    %10 = arith.maximumf %8, %9 : vector<256x128xf32>
    %11 = arith.truncf %10 : vector<256x128xf32> to vector<256x128xbf16>
    %c0_8 = arith.constant 0 : index
    %c0_9 = arith.constant 0 : index
    %12 = vector.load %arg5[%c0_8, %c0_9] : memref<256x128xbf16, #tpu.memory_space<vmem>>, vector<256x128xbf16>
    tpu.vector_store %arg5[%c0_8, %c0_9], %11 {strides = array<i32>} : memref<256x128xbf16, #tpu.memory_space<vmem>>, vector<256x128xbf16>,
    return
  }
  func.func @transform_0(%arg0: i32) -> (i32, i32) {
    %c0_i32 = arith.constant 0 : i32
    %c0_i32_0 = arith.constant 0 : i32
    return %arg0, %c0_i32 : i32, i32
  }
  func.func @transform_1(%arg0: i32) -> (i32, i32) {
    %c0_i32 = arith.constant 0 : i32
    %c0_i32_0 = arith.constant 0 : i32
    %c0_i32_1 = arith.constant 0 : i32
    return %c0_i32, %c0_i32_0 : i32, i32
  }
  func.func @transform_2(%arg0: i32) -> (i32, i32) {
    %c0_i32 = arith.constant 0 : i32
    %c0_i32_0 = arith.constant 0 : i32
    %c0_i32_1 = arith.constant 0 : i32
    return %c0_i32, %c0_i32_0 : i32, i32
  }
  func.func @transform_3(%arg0: i32) -> (i32, i32) {
    %c0_i32 = arith.constant 0 : i32
    %c0_i32_0 = arith.constant 0 : i32
    %c0_i32_1 = arith.constant 0 : i32
    return %c0_i32, %c0_i32_0 : i32, i32
  }
  func.func @transform_4(%arg0: i32) -> (i32, i32) {
    %c0_i32 = arith.constant 0 : i32
    %c0_i32_0 = arith.constant 0 : i32
    return %arg0, %c0_i32 : i32, i32
  }
}

module attributes {stable_mosaic.version = 11 : i64} {
  func.func @_conv3x3_bn_relu_kernel(%arg0: i32, %arg1: memref<1x1x326x64xbf16, #tpu.memory_space<vmem>>, %arg2: memref<9x64x128xbf16, #tpu.memory_space<vmem>>, %arg3: memref<1x128xf32, #tpu.memory_space<vmem>>, %arg4: memref<1x128xf32, #tpu.memory_space<vmem>>, %arg5: memref<1x288x128xbf16, #tpu.memory_space<vmem>>) attributes {dimension_semantics = [#tpu.dimension_semantics<parallel>], iteration_bounds = array<i64: 2>, scalar_prefetch = 0 : i64, scratch_operands = 0 : i64, tpu.core_type = #tpu.core_type<tc>, window_params = [{transform_indices = @transform_0, window_bounds = array<i64: 1, 1, 326, 64>}, {pipeline_mode = #tpu.pipeline_mode<synchronous>, transform_indices = @transform_1, window_bounds = array<i64: 9, 64, 128>}, {pipeline_mode = #tpu.pipeline_mode<synchronous>, transform_indices = @transform_2, window_bounds = array<i64: 1, 128>}, {pipeline_mode = #tpu.pipeline_mode<synchronous>, transform_indices = @transform_3, window_bounds = array<i64: 1, 128>}, {transform_indices = @transform_4, window_bounds = array<i64: 1, 288, 128>}]} {
    %c0 = arith.constant 0 : index
    %c0_0 = arith.constant 0 : index
    %c0_1 = arith.constant 0 : index
    %c0_2 = arith.constant 0 : index
    %0 = vector.load %arg1[%c0, %c0_0, %c0_1, %c0_2] : memref<1x1x326x64xbf16, #tpu.memory_space<vmem>>, vector<1x1x288x64xbf16>
    %1 = vector.shape_cast %0 : vector<1x1x288x64xbf16> to vector<288x64xbf16>
    %c0_3 = arith.constant 0 : index
    %c0_4 = arith.constant 0 : index
    %c0_5 = arith.constant 0 : index
    %2 = vector.load %arg2[%c0_3, %c0_4, %c0_5] : memref<9x64x128xbf16, #tpu.memory_space<vmem>>, vector<1x64x128xbf16>
    %3 = vector.shape_cast %2 : vector<1x64x128xbf16> to vector<64x128xbf16>
    %cst = arith.constant dense<0.000000e+00> : vector<288x128xf32>
    %4 = tpu.matmul %1, %3, %cst {dimension_numbers = #tpu.dot_dimension_numbers<[1], [0], [0], [1], [0, 0, 1, 1], [], []>} : vector<288x64xbf16>, vector<64x128xbf16>, vector<288x128xf32> -> vector<288x128xf32>
    %c0_6 = arith.constant 0 : index
    %c0_7 = arith.constant 0 : index
    %c1 = arith.constant 1 : index
    %c0_8 = arith.constant 0 : index
    %5 = vector.load %arg1[%c0_6, %c0_7, %c1, %c0_8] : memref<1x1x326x64xbf16, #tpu.memory_space<vmem>>, vector<1x1x288x64xbf16>
    %6 = vector.shape_cast %5 : vector<1x1x288x64xbf16> to vector<288x64xbf16>
    %c1_9 = arith.constant 1 : index
    %c0_10 = arith.constant 0 : index
    %c0_11 = arith.constant 0 : index
    %7 = vector.load %arg2[%c1_9, %c0_10, %c0_11] : memref<9x64x128xbf16, #tpu.memory_space<vmem>>, vector<1x64x128xbf16>
    %8 = vector.shape_cast %7 : vector<1x64x128xbf16> to vector<64x128xbf16>
    %cst_12 = arith.constant dense<0.000000e+00> : vector<288x128xf32>
    %9 = tpu.matmul %6, %8, %cst_12 {dimension_numbers = #tpu.dot_dimension_numbers<[1], [0], [0], [1], [0, 0, 1, 1], [], []>} : vector<288x64xbf16>, vector<64x128xbf16>, vector<288x128xf32> -> vector<288x128xf32>
    %10 = arith.addf %4, %9 : vector<288x128xf32>
    %c0_13 = arith.constant 0 : index
    %c0_14 = arith.constant 0 : index
    %c2 = arith.constant 2 : index
    %c0_15 = arith.constant 0 : index
    %11 = vector.load %arg1[%c0_13, %c0_14, %c2, %c0_15] : memref<1x1x326x64xbf16, #tpu.memory_space<vmem>>, vector<1x1x288x64xbf16>
    %12 = vector.shape_cast %11 : vector<1x1x288x64xbf16> to vector<288x64xbf16>
    %c2_16 = arith.constant 2 : index
    %c0_17 = arith.constant 0 : index
    %c0_18 = arith.constant 0 : index
    %13 = vector.load %arg2[%c2_16, %c0_17, %c0_18] : memref<9x64x128xbf16, #tpu.memory_space<vmem>>, vector<1x64x128xbf16>
    %14 = vector.shape_cast %13 : vector<1x64x128xbf16> to vector<64x128xbf16>
    %cst_19 = arith.constant dense<0.000000e+00> : vector<288x128xf32>
    %15 = tpu.matmul %12, %14, %cst_19 {dimension_numbers = #tpu.dot_dimension_numbers<[1], [0], [0], [1], [0, 0, 1, 1], [], []>} : vector<288x64xbf16>, vector<64x128xbf16>, vector<288x128xf32> -> vector<288x128xf32>
    %16 = arith.addf %10, %15 : vector<288x128xf32>
    %c0_20 = arith.constant 0 : index
    %c0_21 = arith.constant 0 : index
    %c18 = arith.constant 18 : index
    %c0_22 = arith.constant 0 : index
    %17 = vector.load %arg1[%c0_20, %c0_21, %c18, %c0_22] : memref<1x1x326x64xbf16, #tpu.memory_space<vmem>>, vector<1x1x288x64xbf16>
    %18 = vector.shape_cast %17 : vector<1x1x288x64xbf16> to vector<288x64xbf16>
    %c3 = arith.constant 3 : index
    %c0_23 = arith.constant 0 : index
    %c0_24 = arith.constant 0 : index
    %19 = vector.load %arg2[%c3, %c0_23, %c0_24] : memref<9x64x128xbf16, #tpu.memory_space<vmem>>, vector<1x64x128xbf16>
    %20 = vector.shape_cast %19 : vector<1x64x128xbf16> to vector<64x128xbf16>
    %cst_25 = arith.constant dense<0.000000e+00> : vector<288x128xf32>
    %21 = tpu.matmul %18, %20, %cst_25 {dimension_numbers = #tpu.dot_dimension_numbers<[1], [0], [0], [1], [0, 0, 1, 1], [], []>} : vector<288x64xbf16>, vector<64x128xbf16>, vector<288x128xf32> -> vector<288x128xf32>
    %22 = arith.addf %16, %21 : vector<288x128xf32>
    %c0_26 = arith.constant 0 : index
    %c0_27 = arith.constant 0 : index
    %c19 = arith.constant 19 : index
    %c0_28 = arith.constant 0 : index
    %23 = vector.load %arg1[%c0_26, %c0_27, %c19, %c0_28] : memref<1x1x326x64xbf16, #tpu.memory_space<vmem>>, vector<1x1x288x64xbf16>
    %24 = vector.shape_cast %23 : vector<1x1x288x64xbf16> to vector<288x64xbf16>
    %c4 = arith.constant 4 : index
    %c0_29 = arith.constant 0 : index
    %c0_30 = arith.constant 0 : index
    %25 = vector.load %arg2[%c4, %c0_29, %c0_30] : memref<9x64x128xbf16, #tpu.memory_space<vmem>>, vector<1x64x128xbf16>
    %26 = vector.shape_cast %25 : vector<1x64x128xbf16> to vector<64x128xbf16>
    %cst_31 = arith.constant dense<0.000000e+00> : vector<288x128xf32>
    %27 = tpu.matmul %24, %26, %cst_31 {dimension_numbers = #tpu.dot_dimension_numbers<[1], [0], [0], [1], [0, 0, 1, 1], [], []>} : vector<288x64xbf16>, vector<64x128xbf16>, vector<288x128xf32> -> vector<288x128xf32>
    %28 = arith.addf %22, %27 : vector<288x128xf32>
    %c0_32 = arith.constant 0 : index
    %c0_33 = arith.constant 0 : index
    %c20 = arith.constant 20 : index
    %c0_34 = arith.constant 0 : index
    %29 = vector.load %arg1[%c0_32, %c0_33, %c20, %c0_34] : memref<1x1x326x64xbf16, #tpu.memory_space<vmem>>, vector<1x1x288x64xbf16>
    %30 = vector.shape_cast %29 : vector<1x1x288x64xbf16> to vector<288x64xbf16>
    %c5 = arith.constant 5 : index
    %c0_35 = arith.constant 0 : index
    %c0_36 = arith.constant 0 : index
    %31 = vector.load %arg2[%c5, %c0_35, %c0_36] : memref<9x64x128xbf16, #tpu.memory_space<vmem>>, vector<1x64x128xbf16>
    %32 = vector.shape_cast %31 : vector<1x64x128xbf16> to vector<64x128xbf16>
    %cst_37 = arith.constant dense<0.000000e+00> : vector<288x128xf32>
    %33 = tpu.matmul %30, %32, %cst_37 {dimension_numbers = #tpu.dot_dimension_numbers<[1], [0], [0], [1], [0, 0, 1, 1], [], []>} : vector<288x64xbf16>, vector<64x128xbf16>, vector<288x128xf32> -> vector<288x128xf32>
    %34 = arith.addf %28, %33 : vector<288x128xf32>
    %c0_38 = arith.constant 0 : index
    %c0_39 = arith.constant 0 : index
    %c36 = arith.constant 36 : index
    %c0_40 = arith.constant 0 : index
    %35 = vector.load %arg1[%c0_38, %c0_39, %c36, %c0_40] : memref<1x1x326x64xbf16, #tpu.memory_space<vmem>>, vector<1x1x288x64xbf16>
    %36 = vector.shape_cast %35 : vector<1x1x288x64xbf16> to vector<288x64xbf16>
    %c6 = arith.constant 6 : index
    %c0_41 = arith.constant 0 : index
    %c0_42 = arith.constant 0 : index
    %37 = vector.load %arg2[%c6, %c0_41, %c0_42] : memref<9x64x128xbf16, #tpu.memory_space<vmem>>, vector<1x64x128xbf16>
    %38 = vector.shape_cast %37 : vector<1x64x128xbf16> to vector<64x128xbf16>
    %cst_43 = arith.constant dense<0.000000e+00> : vector<288x128xf32>
    %39 = tpu.matmul %36, %38, %cst_43 {dimension_numbers = #tpu.dot_dimension_numbers<[1], [0], [0], [1], [0, 0, 1, 1], [], []>} : vector<288x64xbf16>, vector<64x128xbf16>, vector<288x128xf32> -> vector<288x128xf32>
    %40 = arith.addf %34, %39 : vector<288x128xf32>
    %c0_44 = arith.constant 0 : index
    %c0_45 = arith.constant 0 : index
    %c37 = arith.constant 37 : index
    %c0_46 = arith.constant 0 : index
    %41 = vector.load %arg1[%c0_44, %c0_45, %c37, %c0_46] : memref<1x1x326x64xbf16, #tpu.memory_space<vmem>>, vector<1x1x288x64xbf16>
    %42 = vector.shape_cast %41 : vector<1x1x288x64xbf16> to vector<288x64xbf16>
    %c7 = arith.constant 7 : index
    %c0_47 = arith.constant 0 : index
    %c0_48 = arith.constant 0 : index
    %43 = vector.load %arg2[%c7, %c0_47, %c0_48] : memref<9x64x128xbf16, #tpu.memory_space<vmem>>, vector<1x64x128xbf16>
    %44 = vector.shape_cast %43 : vector<1x64x128xbf16> to vector<64x128xbf16>
    %cst_49 = arith.constant dense<0.000000e+00> : vector<288x128xf32>
    %45 = tpu.matmul %42, %44, %cst_49 {dimension_numbers = #tpu.dot_dimension_numbers<[1], [0], [0], [1], [0, 0, 1, 1], [], []>} : vector<288x64xbf16>, vector<64x128xbf16>, vector<288x128xf32> -> vector<288x128xf32>
    %46 = arith.addf %40, %45 : vector<288x128xf32>
    %c0_50 = arith.constant 0 : index
    %c0_51 = arith.constant 0 : index
    %c38 = arith.constant 38 : index
    %c0_52 = arith.constant 0 : index
    %47 = vector.load %arg1[%c0_50, %c0_51, %c38, %c0_52] : memref<1x1x326x64xbf16, #tpu.memory_space<vmem>>, vector<1x1x288x64xbf16>
    %48 = vector.shape_cast %47 : vector<1x1x288x64xbf16> to vector<288x64xbf16>
    %c8 = arith.constant 8 : index
    %c0_53 = arith.constant 0 : index
    %c0_54 = arith.constant 0 : index
    %49 = vector.load %arg2[%c8, %c0_53, %c0_54] : memref<9x64x128xbf16, #tpu.memory_space<vmem>>, vector<1x64x128xbf16>
    %50 = vector.shape_cast %49 : vector<1x64x128xbf16> to vector<64x128xbf16>
    %cst_55 = arith.constant dense<0.000000e+00> : vector<288x128xf32>
    %51 = tpu.matmul %48, %50, %cst_55 {dimension_numbers = #tpu.dot_dimension_numbers<[1], [0], [0], [1], [0, 0, 1, 1], [], []>} : vector<288x64xbf16>, vector<64x128xbf16>, vector<288x128xf32> -> vector<288x128xf32>
    %52 = arith.addf %46, %51 : vector<288x128xf32>
    %c0_56 = arith.constant 0 : index
    %c0_57 = arith.constant 0 : index
    %53 = vector.load %arg3[%c0_56, %c0_57] : memref<1x128xf32, #tpu.memory_space<vmem>>, vector<1x128xf32>
    %54 = vector.broadcast %53 : vector<1x128xf32> to vector<288x128xf32>
    %55 = arith.mulf %52, %54 : vector<288x128xf32>
    %c0_58 = arith.constant 0 : index
    %c0_59 = arith.constant 0 : index
    %56 = vector.load %arg4[%c0_58, %c0_59] : memref<1x128xf32, #tpu.memory_space<vmem>>, vector<1x128xf32>
    %57 = vector.broadcast %56 : vector<1x128xf32> to vector<288x128xf32>
    %58 = arith.addf %55, %57 : vector<288x128xf32>
    %cst_60 = arith.constant 0.000000e+00 : f32
    %59 = vector.broadcast %cst_60 : f32 to vector<288x128xf32>
    %60 = arith.maximumf %58, %59 : vector<288x128xf32>
    %61 = arith.truncf %60 : vector<288x128xf32> to vector<288x128xbf16>
    %c0_61 = arith.constant 0 : index
    %c0_62 = arith.constant 0 : index
    %c0_63 = arith.constant 0 : index
    %62 = vector.load %arg5[%c0_61, %c0_62, %c0_63] : memref<1x288x128xbf16, #tpu.memory_space<vmem>>, vector<1x288x128xbf16>
    %63 = vector.shape_cast %62 : vector<1x288x128xbf16> to vector<288x128xbf16>
    %64 = vector.shape_cast %61 : vector<288x128xbf16> to vector<1x288x128xbf16>
    tpu.vector_store %arg5[%c0_61, %c0_62, %c0_63], %64 {strides = array<i32>} : memref<1x288x128xbf16, #tpu.memory_space<vmem>>, vector<1x288x128xbf16>,
    return
  }
  func.func @transform_0(%arg0: i32) -> (i32, i32, i32, i32) {
    %c0_i32 = arith.constant 0 : i32
    %c0_i32_0 = arith.constant 0 : i32
    %c0_i32_1 = arith.constant 0 : i32
    %c0_i32_2 = arith.constant 0 : i32
    return %arg0, %c0_i32, %c0_i32_0, %c0_i32_1 : i32, i32, i32, i32
  }
  func.func @transform_1(%arg0: i32) -> (i32, i32, i32) {
    %c0_i32 = arith.constant 0 : i32
    %c0_i32_0 = arith.constant 0 : i32
    %c0_i32_1 = arith.constant 0 : i32
    %c0_i32_2 = arith.constant 0 : i32
    return %c0_i32, %c0_i32_0, %c0_i32_1 : i32, i32, i32
  }
  func.func @transform_2(%arg0: i32) -> (i32, i32) {
    %c0_i32 = arith.constant 0 : i32
    %c0_i32_0 = arith.constant 0 : i32
    %c0_i32_1 = arith.constant 0 : i32
    return %c0_i32, %c0_i32_0 : i32, i32
  }
  func.func @transform_3(%arg0: i32) -> (i32, i32) {
    %c0_i32 = arith.constant 0 : i32
    %c0_i32_0 = arith.constant 0 : i32
    %c0_i32_1 = arith.constant 0 : i32
    return %c0_i32, %c0_i32_0 : i32, i32
  }
  func.func @transform_4(%arg0: i32) -> (i32, i32, i32) {
    %c0_i32 = arith.constant 0 : i32
    %c0_i32_0 = arith.constant 0 : i32
    %c0_i32_1 = arith.constant 0 : i32
    return %arg0, %c0_i32, %c0_i32_0 : i32, i32, i32
  }
}

module attributes {stable_mosaic.version = 11 : i64} {
  func.func @_conv3x3_bn_relu_kernel(%arg0: i32, %arg1: memref<1x4x65x96xbf16, #tpu.memory_space<vmem>>, %arg2: memref<9x96x128xbf16, #tpu.memory_space<vmem>>, %arg3: memref<1x128xf32, #tpu.memory_space<vmem>>, %arg4: memref<1x128xf32, #tpu.memory_space<vmem>>, %arg5: memref<1x56x128xf32, #tpu.memory_space<vmem>>) attributes {dimension_semantics = [#tpu.dimension_semantics<parallel>], iteration_bounds = array<i64: 2>, scalar_prefetch = 0 : i64, scratch_operands = 0 : i64, tpu.core_type = #tpu.core_type<tc>, window_params = [{transform_indices = @transform_0, window_bounds = array<i64: 1, 4, 65, 96>}, {pipeline_mode = #tpu.pipeline_mode<synchronous>, transform_indices = @transform_1, window_bounds = array<i64: 9, 96, 128>}, {pipeline_mode = #tpu.pipeline_mode<synchronous>, transform_indices = @transform_2, window_bounds = array<i64: 1, 128>}, {pipeline_mode = #tpu.pipeline_mode<synchronous>, transform_indices = @transform_3, window_bounds = array<i64: 1, 128>}, {transform_indices = @transform_4, window_bounds = array<i64: 1, 56, 128>}]} {
    %c0 = arith.constant 0 : index
    %c0_0 = arith.constant 0 : index
    %c0_1 = arith.constant 0 : index
    %c0_2 = arith.constant 0 : index
    %0 = vector.load %arg1[%c0, %c0_0, %c0_1, %c0_2] : memref<1x4x65x96xbf16, #tpu.memory_space<vmem>>, vector<1x1x56x96xbf16>
    %1 = vector.shape_cast %0 : vector<1x1x56x96xbf16> to vector<56x96xbf16>
    %c0_3 = arith.constant 0 : index
    %c0_4 = arith.constant 0 : index
    %c0_5 = arith.constant 0 : index
    %2 = vector.load %arg2[%c0_3, %c0_4, %c0_5] : memref<9x96x128xbf16, #tpu.memory_space<vmem>>, vector<1x96x128xbf16>
    %3 = vector.shape_cast %2 : vector<1x96x128xbf16> to vector<96x128xbf16>
    %cst = arith.constant dense<0.000000e+00> : vector<56x128xf32>
    %4 = tpu.matmul %1, %3, %cst {dimension_numbers = #tpu.dot_dimension_numbers<[1], [0], [0], [1], [0, 0, 1, 1], [], []>} : vector<56x96xbf16>, vector<96x128xbf16>, vector<56x128xf32> -> vector<56x128xf32>
    %c0_6 = arith.constant 0 : index
    %c1 = arith.constant 1 : index
    %c0_7 = arith.constant 0 : index
    %c0_8 = arith.constant 0 : index
    %5 = vector.load %arg1[%c0_6, %c1, %c0_7, %c0_8] : memref<1x4x65x96xbf16, #tpu.memory_space<vmem>>, vector<1x1x56x96xbf16>
    %6 = vector.shape_cast %5 : vector<1x1x56x96xbf16> to vector<56x96xbf16>
    %c1_9 = arith.constant 1 : index
    %c0_10 = arith.constant 0 : index
    %c0_11 = arith.constant 0 : index
    %7 = vector.load %arg2[%c1_9, %c0_10, %c0_11] : memref<9x96x128xbf16, #tpu.memory_space<vmem>>, vector<1x96x128xbf16>
    %8 = vector.shape_cast %7 : vector<1x96x128xbf16> to vector<96x128xbf16>
    %cst_12 = arith.constant dense<0.000000e+00> : vector<56x128xf32>
    %9 = tpu.matmul %6, %8, %cst_12 {dimension_numbers = #tpu.dot_dimension_numbers<[1], [0], [0], [1], [0, 0, 1, 1], [], []>} : vector<56x96xbf16>, vector<96x128xbf16>, vector<56x128xf32> -> vector<56x128xf32>
    %10 = arith.addf %4, %9 : vector<56x128xf32>
    %c0_13 = arith.constant 0 : index
    %c0_14 = arith.constant 0 : index
    %c1_15 = arith.constant 1 : index
    %c0_16 = arith.constant 0 : index
    %11 = vector.load %arg1[%c0_13, %c0_14, %c1_15, %c0_16] : memref<1x4x65x96xbf16, #tpu.memory_space<vmem>>, vector<1x1x56x96xbf16>
    %12 = vector.shape_cast %11 : vector<1x1x56x96xbf16> to vector<56x96xbf16>
    %c2 = arith.constant 2 : index
    %c0_17 = arith.constant 0 : index
    %c0_18 = arith.constant 0 : index
    %13 = vector.load %arg2[%c2, %c0_17, %c0_18] : memref<9x96x128xbf16, #tpu.memory_space<vmem>>, vector<1x96x128xbf16>
    %14 = vector.shape_cast %13 : vector<1x96x128xbf16> to vector<96x128xbf16>
    %cst_19 = arith.constant dense<0.000000e+00> : vector<56x128xf32>
    %15 = tpu.matmul %12, %14, %cst_19 {dimension_numbers = #tpu.dot_dimension_numbers<[1], [0], [0], [1], [0, 0, 1, 1], [], []>} : vector<56x96xbf16>, vector<96x128xbf16>, vector<56x128xf32> -> vector<56x128xf32>
    %16 = arith.addf %10, %15 : vector<56x128xf32>
    %c0_20 = arith.constant 0 : index
    %c2_21 = arith.constant 2 : index
    %c0_22 = arith.constant 0 : index
    %c0_23 = arith.constant 0 : index
    %17 = vector.load %arg1[%c0_20, %c2_21, %c0_22, %c0_23] : memref<1x4x65x96xbf16, #tpu.memory_space<vmem>>, vector<1x1x56x96xbf16>
    %18 = vector.shape_cast %17 : vector<1x1x56x96xbf16> to vector<56x96xbf16>
    %c3 = arith.constant 3 : index
    %c0_24 = arith.constant 0 : index
    %c0_25 = arith.constant 0 : index
    %19 = vector.load %arg2[%c3, %c0_24, %c0_25] : memref<9x96x128xbf16, #tpu.memory_space<vmem>>, vector<1x96x128xbf16>
    %20 = vector.shape_cast %19 : vector<1x96x128xbf16> to vector<96x128xbf16>
    %cst_26 = arith.constant dense<0.000000e+00> : vector<56x128xf32>
    %21 = tpu.matmul %18, %20, %cst_26 {dimension_numbers = #tpu.dot_dimension_numbers<[1], [0], [0], [1], [0, 0, 1, 1], [], []>} : vector<56x96xbf16>, vector<96x128xbf16>, vector<56x128xf32> -> vector<56x128xf32>
    %22 = arith.addf %16, %21 : vector<56x128xf32>
    %c0_27 = arith.constant 0 : index
    %c3_28 = arith.constant 3 : index
    %c0_29 = arith.constant 0 : index
    %c0_30 = arith.constant 0 : index
    %23 = vector.load %arg1[%c0_27, %c3_28, %c0_29, %c0_30] : memref<1x4x65x96xbf16, #tpu.memory_space<vmem>>, vector<1x1x56x96xbf16>
    %24 = vector.shape_cast %23 : vector<1x1x56x96xbf16> to vector<56x96xbf16>
    %c4 = arith.constant 4 : index
    %c0_31 = arith.constant 0 : index
    %c0_32 = arith.constant 0 : index
    %25 = vector.load %arg2[%c4, %c0_31, %c0_32] : memref<9x96x128xbf16, #tpu.memory_space<vmem>>, vector<1x96x128xbf16>
    %26 = vector.shape_cast %25 : vector<1x96x128xbf16> to vector<96x128xbf16>
    %cst_33 = arith.constant dense<0.000000e+00> : vector<56x128xf32>
    %27 = tpu.matmul %24, %26, %cst_33 {dimension_numbers = #tpu.dot_dimension_numbers<[1], [0], [0], [1], [0, 0, 1, 1], [], []>} : vector<56x96xbf16>, vector<96x128xbf16>, vector<56x128xf32> -> vector<56x128xf32>
    %28 = arith.addf %22, %27 : vector<56x128xf32>
    %c0_34 = arith.constant 0 : index
    %c2_35 = arith.constant 2 : index
    %c1_36 = arith.constant 1 : index
    %c0_37 = arith.constant 0 : index
    %29 = vector.load %arg1[%c0_34, %c2_35, %c1_36, %c0_37] : memref<1x4x65x96xbf16, #tpu.memory_space<vmem>>, vector<1x1x56x96xbf16>
    %30 = vector.shape_cast %29 : vector<1x1x56x96xbf16> to vector<56x96xbf16>
    %c5 = arith.constant 5 : index
    %c0_38 = arith.constant 0 : index
    %c0_39 = arith.constant 0 : index
    %31 = vector.load %arg2[%c5, %c0_38, %c0_39] : memref<9x96x128xbf16, #tpu.memory_space<vmem>>, vector<1x96x128xbf16>
    %32 = vector.shape_cast %31 : vector<1x96x128xbf16> to vector<96x128xbf16>
    %cst_40 = arith.constant dense<0.000000e+00> : vector<56x128xf32>
    %33 = tpu.matmul %30, %32, %cst_40 {dimension_numbers = #tpu.dot_dimension_numbers<[1], [0], [0], [1], [0, 0, 1, 1], [], []>} : vector<56x96xbf16>, vector<96x128xbf16>, vector<56x128xf32> -> vector<56x128xf32>
    %34 = arith.addf %28, %33 : vector<56x128xf32>
    %c0_41 = arith.constant 0 : index
    %c0_42 = arith.constant 0 : index
    %c8 = arith.constant 8 : index
    %c0_43 = arith.constant 0 : index
    %35 = vector.load %arg1[%c0_41, %c0_42, %c8, %c0_43] : memref<1x4x65x96xbf16, #tpu.memory_space<vmem>>, vector<1x1x56x96xbf16>
    %36 = vector.shape_cast %35 : vector<1x1x56x96xbf16> to vector<56x96xbf16>
    %c6 = arith.constant 6 : index
    %c0_44 = arith.constant 0 : index
    %c0_45 = arith.constant 0 : index
    %37 = vector.load %arg2[%c6, %c0_44, %c0_45] : memref<9x96x128xbf16, #tpu.memory_space<vmem>>, vector<1x96x128xbf16>
    %38 = vector.shape_cast %37 : vector<1x96x128xbf16> to vector<96x128xbf16>
    %cst_46 = arith.constant dense<0.000000e+00> : vector<56x128xf32>
    %39 = tpu.matmul %36, %38, %cst_46 {dimension_numbers = #tpu.dot_dimension_numbers<[1], [0], [0], [1], [0, 0, 1, 1], [], []>} : vector<56x96xbf16>, vector<96x128xbf16>, vector<56x128xf32> -> vector<56x128xf32>
    %40 = arith.addf %34, %39 : vector<56x128xf32>
    %c0_47 = arith.constant 0 : index
    %c1_48 = arith.constant 1 : index
    %c8_49 = arith.constant 8 : index
    %c0_50 = arith.constant 0 : index
    %41 = vector.load %arg1[%c0_47, %c1_48, %c8_49, %c0_50] : memref<1x4x65x96xbf16, #tpu.memory_space<vmem>>, vector<1x1x56x96xbf16>
    %42 = vector.shape_cast %41 : vector<1x1x56x96xbf16> to vector<56x96xbf16>
    %c7 = arith.constant 7 : index
    %c0_51 = arith.constant 0 : index
    %c0_52 = arith.constant 0 : index
    %43 = vector.load %arg2[%c7, %c0_51, %c0_52] : memref<9x96x128xbf16, #tpu.memory_space<vmem>>, vector<1x96x128xbf16>
    %44 = vector.shape_cast %43 : vector<1x96x128xbf16> to vector<96x128xbf16>
    %cst_53 = arith.constant dense<0.000000e+00> : vector<56x128xf32>
    %45 = tpu.matmul %42, %44, %cst_53 {dimension_numbers = #tpu.dot_dimension_numbers<[1], [0], [0], [1], [0, 0, 1, 1], [], []>} : vector<56x96xbf16>, vector<96x128xbf16>, vector<56x128xf32> -> vector<56x128xf32>
    %46 = arith.addf %40, %45 : vector<56x128xf32>
    %c0_54 = arith.constant 0 : index
    %c0_55 = arith.constant 0 : index
    %c9 = arith.constant 9 : index
    %c0_56 = arith.constant 0 : index
    %47 = vector.load %arg1[%c0_54, %c0_55, %c9, %c0_56] : memref<1x4x65x96xbf16, #tpu.memory_space<vmem>>, vector<1x1x56x96xbf16>
    %48 = vector.shape_cast %47 : vector<1x1x56x96xbf16> to vector<56x96xbf16>
    %c8_57 = arith.constant 8 : index
    %c0_58 = arith.constant 0 : index
    %c0_59 = arith.constant 0 : index
    %49 = vector.load %arg2[%c8_57, %c0_58, %c0_59] : memref<9x96x128xbf16, #tpu.memory_space<vmem>>, vector<1x96x128xbf16>
    %50 = vector.shape_cast %49 : vector<1x96x128xbf16> to vector<96x128xbf16>
    %cst_60 = arith.constant dense<0.000000e+00> : vector<56x128xf32>
    %51 = tpu.matmul %48, %50, %cst_60 {dimension_numbers = #tpu.dot_dimension_numbers<[1], [0], [0], [1], [0, 0, 1, 1], [], []>} : vector<56x96xbf16>, vector<96x128xbf16>, vector<56x128xf32> -> vector<56x128xf32>
    %52 = arith.addf %46, %51 : vector<56x128xf32>
    %c0_61 = arith.constant 0 : index
    %c0_62 = arith.constant 0 : index
    %53 = vector.load %arg3[%c0_61, %c0_62] : memref<1x128xf32, #tpu.memory_space<vmem>>, vector<1x128xf32>
    %54 = vector.broadcast %53 : vector<1x128xf32> to vector<56x128xf32>
    %55 = arith.mulf %52, %54 : vector<56x128xf32>
    %c0_63 = arith.constant 0 : index
    %c0_64 = arith.constant 0 : index
    %56 = vector.load %arg4[%c0_63, %c0_64] : memref<1x128xf32, #tpu.memory_space<vmem>>, vector<1x128xf32>
    %57 = vector.broadcast %56 : vector<1x128xf32> to vector<56x128xf32>
    %58 = arith.addf %55, %57 : vector<56x128xf32>
    %cst_65 = arith.constant 0.000000e+00 : f32
    %59 = vector.broadcast %cst_65 : f32 to vector<56x128xf32>
    %60 = arith.maximumf %58, %59 : vector<56x128xf32>
    %c0_66 = arith.constant 0 : index
    %c0_67 = arith.constant 0 : index
    %c0_68 = arith.constant 0 : index
    %61 = vector.load %arg5[%c0_66, %c0_67, %c0_68] : memref<1x56x128xf32, #tpu.memory_space<vmem>>, vector<1x56x128xf32>
    %62 = vector.shape_cast %61 : vector<1x56x128xf32> to vector<56x128xf32>
    %63 = vector.shape_cast %60 : vector<56x128xf32> to vector<1x56x128xf32>
    tpu.vector_store %arg5[%c0_66, %c0_67, %c0_68], %63 {strides = array<i32>} : memref<1x56x128xf32, #tpu.memory_space<vmem>>, vector<1x56x128xf32>,
    return
  }
  func.func @transform_0(%arg0: i32) -> (i32, i32, i32, i32) {
    %c0_i32 = arith.constant 0 : i32
    %c0_i32_0 = arith.constant 0 : i32
    %c0_i32_1 = arith.constant 0 : i32
    %c0_i32_2 = arith.constant 0 : i32
    return %arg0, %c0_i32, %c0_i32_0, %c0_i32_1 : i32, i32, i32, i32
  }
  func.func @transform_1(%arg0: i32) -> (i32, i32, i32) {
    %c0_i32 = arith.constant 0 : i32
    %c0_i32_0 = arith.constant 0 : i32
    %c0_i32_1 = arith.constant 0 : i32
    %c0_i32_2 = arith.constant 0 : i32
    return %c0_i32, %c0_i32_0, %c0_i32_1 : i32, i32, i32
  }
  func.func @transform_2(%arg0: i32) -> (i32, i32) {
    %c0_i32 = arith.constant 0 : i32
    %c0_i32_0 = arith.constant 0 : i32
    %c0_i32_1 = arith.constant 0 : i32
    return %c0_i32, %c0_i32_0 : i32, i32
  }
  func.func @transform_3(%arg0: i32) -> (i32, i32) {
    %c0_i32 = arith.constant 0 : i32
    %c0_i32_0 = arith.constant 0 : i32
    %c0_i32_1 = arith.constant 0 : i32
    return %c0_i32, %c0_i32_0 : i32, i32
  }
  func.func @transform_4(%arg0: i32) -> (i32, i32, i32) {
    %c0_i32 = arith.constant 0 : i32
    %c0_i32_0 = arith.constant 0 : i32
    %c0_i32_1 = arith.constant 0 : i32
    return %arg0, %c0_i32, %c0_i32_0 : i32, i32, i32
  }
}

module attributes {stable_mosaic.version = 11 : i64} {
  func.func @_conv3x3_pool_bn_relu_kernel(%arg0: i32, %arg1: memref<1x4x65x4xbf16, #tpu.memory_space<vmem>>, %arg2: memref<9x4x384xbf16, #tpu.memory_space<vmem>>, %arg3: memref<1x384xf32, #tpu.memory_space<vmem>>, %arg4: memref<1x384xf32, #tpu.memory_space<vmem>>, %arg5: memref<1x56x384xf32, #tpu.memory_space<vmem>>, %arg6: memref<1x56x4xf32, #tpu.memory_space<vmem>>) attributes {dimension_semantics = [#tpu.dimension_semantics<parallel>], iteration_bounds = array<i64: 2>, scalar_prefetch = 0 : i64, scratch_operands = 0 : i64, tpu.core_type = #tpu.core_type<tc>, window_params = [{transform_indices = @transform_0, window_bounds = array<i64: 1, 4, 65, 4>}, {pipeline_mode = #tpu.pipeline_mode<synchronous>, transform_indices = @transform_1, window_bounds = array<i64: 9, 4, 384>}, {pipeline_mode = #tpu.pipeline_mode<synchronous>, transform_indices = @transform_2, window_bounds = array<i64: 1, 384>}, {pipeline_mode = #tpu.pipeline_mode<synchronous>, transform_indices = @transform_3, window_bounds = array<i64: 1, 384>}, {transform_indices = @transform_4, window_bounds = array<i64: 1, 56, 384>}, {transform_indices = @transform_5, window_bounds = array<i64: 1, 56, 4>}]} {
    %c0 = arith.constant 0 : index
    %c0_0 = arith.constant 0 : index
    %c0_1 = arith.constant 0 : index
    %c0_2 = arith.constant 0 : index
    %0 = vector.load %arg1[%c0, %c0_0, %c0_1, %c0_2] : memref<1x4x65x4xbf16, #tpu.memory_space<vmem>>, vector<1x1x56x4xbf16>
    %1 = vector.shape_cast %0 : vector<1x1x56x4xbf16> to vector<56x4xbf16>
    %c0_3 = arith.constant 0 : index
    %c0_4 = arith.constant 0 : index
    %c0_5 = arith.constant 0 : index
    %2 = vector.load %arg2[%c0_3, %c0_4, %c0_5] : memref<9x4x384xbf16, #tpu.memory_space<vmem>>, vector<1x4x384xbf16>
    %3 = vector.shape_cast %2 : vector<1x4x384xbf16> to vector<4x384xbf16>
    %cst = arith.constant dense<0.000000e+00> : vector<56x384xf32>
    %4 = tpu.matmul %1, %3, %cst {dimension_numbers = #tpu.dot_dimension_numbers<[1], [0], [0], [1], [0, 0, 1, 1], [], []>} : vector<56x4xbf16>, vector<4x384xbf16>, vector<56x384xf32> -> vector<56x384xf32>
    %c0_6 = arith.constant 0 : index
    %c1 = arith.constant 1 : index
    %c0_7 = arith.constant 0 : index
    %c0_8 = arith.constant 0 : index
    %5 = vector.load %arg1[%c0_6, %c1, %c0_7, %c0_8] : memref<1x4x65x4xbf16, #tpu.memory_space<vmem>>, vector<1x1x56x4xbf16>
    %6 = vector.shape_cast %5 : vector<1x1x56x4xbf16> to vector<56x4xbf16>
    %c1_9 = arith.constant 1 : index
    %c0_10 = arith.constant 0 : index
    %c0_11 = arith.constant 0 : index
    %7 = vector.load %arg2[%c1_9, %c0_10, %c0_11] : memref<9x4x384xbf16, #tpu.memory_space<vmem>>, vector<1x4x384xbf16>
    %8 = vector.shape_cast %7 : vector<1x4x384xbf16> to vector<4x384xbf16>
    %cst_12 = arith.constant dense<0.000000e+00> : vector<56x384xf32>
    %9 = tpu.matmul %6, %8, %cst_12 {dimension_numbers = #tpu.dot_dimension_numbers<[1], [0], [0], [1], [0, 0, 1, 1], [], []>} : vector<56x4xbf16>, vector<4x384xbf16>, vector<56x384xf32> -> vector<56x384xf32>
    %10 = arith.addf %4, %9 : vector<56x384xf32>
    %11 = arith.maximumf %1, %6 : vector<56x4xbf16>
    %c0_13 = arith.constant 0 : index
    %c0_14 = arith.constant 0 : index
    %c1_15 = arith.constant 1 : index
    %c0_16 = arith.constant 0 : index
    %12 = vector.load %arg1[%c0_13, %c0_14, %c1_15, %c0_16] : memref<1x4x65x4xbf16, #tpu.memory_space<vmem>>, vector<1x1x56x4xbf16>
    %13 = vector.shape_cast %12 : vector<1x1x56x4xbf16> to vector<56x4xbf16>
    %c2 = arith.constant 2 : index
    %c0_17 = arith.constant 0 : index
    %c0_18 = arith.constant 0 : index
    %14 = vector.load %arg2[%c2, %c0_17, %c0_18] : memref<9x4x384xbf16, #tpu.memory_space<vmem>>, vector<1x4x384xbf16>
    %15 = vector.shape_cast %14 : vector<1x4x384xbf16> to vector<4x384xbf16>
    %cst_19 = arith.constant dense<0.000000e+00> : vector<56x384xf32>
    %16 = tpu.matmul %13, %15, %cst_19 {dimension_numbers = #tpu.dot_dimension_numbers<[1], [0], [0], [1], [0, 0, 1, 1], [], []>} : vector<56x4xbf16>, vector<4x384xbf16>, vector<56x384xf32> -> vector<56x384xf32>
    %17 = arith.addf %10, %16 : vector<56x384xf32>
    %18 = arith.maximumf %11, %13 : vector<56x4xbf16>
    %c0_20 = arith.constant 0 : index
    %c2_21 = arith.constant 2 : index
    %c0_22 = arith.constant 0 : index
    %c0_23 = arith.constant 0 : index
    %19 = vector.load %arg1[%c0_20, %c2_21, %c0_22, %c0_23] : memref<1x4x65x4xbf16, #tpu.memory_space<vmem>>, vector<1x1x56x4xbf16>
    %20 = vector.shape_cast %19 : vector<1x1x56x4xbf16> to vector<56x4xbf16>
    %c3 = arith.constant 3 : index
    %c0_24 = arith.constant 0 : index
    %c0_25 = arith.constant 0 : index
    %21 = vector.load %arg2[%c3, %c0_24, %c0_25] : memref<9x4x384xbf16, #tpu.memory_space<vmem>>, vector<1x4x384xbf16>
    %22 = vector.shape_cast %21 : vector<1x4x384xbf16> to vector<4x384xbf16>
    %cst_26 = arith.constant dense<0.000000e+00> : vector<56x384xf32>
    %23 = tpu.matmul %20, %22, %cst_26 {dimension_numbers = #tpu.dot_dimension_numbers<[1], [0], [0], [1], [0, 0, 1, 1], [], []>} : vector<56x4xbf16>, vector<4x384xbf16>, vector<56x384xf32> -> vector<56x384xf32>
    %24 = arith.addf %17, %23 : vector<56x384xf32>
    %25 = arith.maximumf %18, %20 : vector<56x4xbf16>
    %c0_27 = arith.constant 0 : index
    %c3_28 = arith.constant 3 : index
    %c0_29 = arith.constant 0 : index
    %c0_30 = arith.constant 0 : index
    %26 = vector.load %arg1[%c0_27, %c3_28, %c0_29, %c0_30] : memref<1x4x65x4xbf16, #tpu.memory_space<vmem>>, vector<1x1x56x4xbf16>
    %27 = vector.shape_cast %26 : vector<1x1x56x4xbf16> to vector<56x4xbf16>
    %c4 = arith.constant 4 : index
    %c0_31 = arith.constant 0 : index
    %c0_32 = arith.constant 0 : index
    %28 = vector.load %arg2[%c4, %c0_31, %c0_32] : memref<9x4x384xbf16, #tpu.memory_space<vmem>>, vector<1x4x384xbf16>
    %29 = vector.shape_cast %28 : vector<1x4x384xbf16> to vector<4x384xbf16>
    %cst_33 = arith.constant dense<0.000000e+00> : vector<56x384xf32>
    %30 = tpu.matmul %27, %29, %cst_33 {dimension_numbers = #tpu.dot_dimension_numbers<[1], [0], [0], [1], [0, 0, 1, 1], [], []>} : vector<56x4xbf16>, vector<4x384xbf16>, vector<56x384xf32> -> vector<56x384xf32>
    %31 = arith.addf %24, %30 : vector<56x384xf32>
    %32 = arith.maximumf %25, %27 : vector<56x4xbf16>
    %c0_34 = arith.constant 0 : index
    %c2_35 = arith.constant 2 : index
    %c1_36 = arith.constant 1 : index
    %c0_37 = arith.constant 0 : index
    %33 = vector.load %arg1[%c0_34, %c2_35, %c1_36, %c0_37] : memref<1x4x65x4xbf16, #tpu.memory_space<vmem>>, vector<1x1x56x4xbf16>
    %34 = vector.shape_cast %33 : vector<1x1x56x4xbf16> to vector<56x4xbf16>
    %c5 = arith.constant 5 : index
    %c0_38 = arith.constant 0 : index
    %c0_39 = arith.constant 0 : index
    %35 = vector.load %arg2[%c5, %c0_38, %c0_39] : memref<9x4x384xbf16, #tpu.memory_space<vmem>>, vector<1x4x384xbf16>
    %36 = vector.shape_cast %35 : vector<1x4x384xbf16> to vector<4x384xbf16>
    %cst_40 = arith.constant dense<0.000000e+00> : vector<56x384xf32>
    %37 = tpu.matmul %34, %36, %cst_40 {dimension_numbers = #tpu.dot_dimension_numbers<[1], [0], [0], [1], [0, 0, 1, 1], [], []>} : vector<56x4xbf16>, vector<4x384xbf16>, vector<56x384xf32> -> vector<56x384xf32>
    %38 = arith.addf %31, %37 : vector<56x384xf32>
    %39 = arith.maximumf %32, %34 : vector<56x4xbf16>
    %c0_41 = arith.constant 0 : index
    %c0_42 = arith.constant 0 : index
    %c8 = arith.constant 8 : index
    %c0_43 = arith.constant 0 : index
    %40 = vector.load %arg1[%c0_41, %c0_42, %c8, %c0_43] : memref<1x4x65x4xbf16, #tpu.memory_space<vmem>>, vector<1x1x56x4xbf16>
    %41 = vector.shape_cast %40 : vector<1x1x56x4xbf16> to vector<56x4xbf16>
    %c6 = arith.constant 6 : index
    %c0_44 = arith.constant 0 : index
    %c0_45 = arith.constant 0 : index
    %42 = vector.load %arg2[%c6, %c0_44, %c0_45] : memref<9x4x384xbf16, #tpu.memory_space<vmem>>, vector<1x4x384xbf16>
    %43 = vector.shape_cast %42 : vector<1x4x384xbf16> to vector<4x384xbf16>
    %cst_46 = arith.constant dense<0.000000e+00> : vector<56x384xf32>
    %44 = tpu.matmul %41, %43, %cst_46 {dimension_numbers = #tpu.dot_dimension_numbers<[1], [0], [0], [1], [0, 0, 1, 1], [], []>} : vector<56x4xbf16>, vector<4x384xbf16>, vector<56x384xf32> -> vector<56x384xf32>
    %45 = arith.addf %38, %44 : vector<56x384xf32>
    %46 = arith.maximumf %39, %41 : vector<56x4xbf16>
    %c0_47 = arith.constant 0 : index
    %c1_48 = arith.constant 1 : index
    %c8_49 = arith.constant 8 : index
    %c0_50 = arith.constant 0 : index
    %47 = vector.load %arg1[%c0_47, %c1_48, %c8_49, %c0_50] : memref<1x4x65x4xbf16, #tpu.memory_space<vmem>>, vector<1x1x56x4xbf16>
    %48 = vector.shape_cast %47 : vector<1x1x56x4xbf16> to vector<56x4xbf16>
    %c7 = arith.constant 7 : index
    %c0_51 = arith.constant 0 : index
    %c0_52 = arith.constant 0 : index
    %49 = vector.load %arg2[%c7, %c0_51, %c0_52] : memref<9x4x384xbf16, #tpu.memory_space<vmem>>, vector<1x4x384xbf16>
    %50 = vector.shape_cast %49 : vector<1x4x384xbf16> to vector<4x384xbf16>
    %cst_53 = arith.constant dense<0.000000e+00> : vector<56x384xf32>
    %51 = tpu.matmul %48, %50, %cst_53 {dimension_numbers = #tpu.dot_dimension_numbers<[1], [0], [0], [1], [0, 0, 1, 1], [], []>} : vector<56x4xbf16>, vector<4x384xbf16>, vector<56x384xf32> -> vector<56x384xf32>
    %52 = arith.addf %45, %51 : vector<56x384xf32>
    %53 = arith.maximumf %46, %48 : vector<56x4xbf16>
    %c0_54 = arith.constant 0 : index
    %c0_55 = arith.constant 0 : index
    %c9 = arith.constant 9 : index
    %c0_56 = arith.constant 0 : index
    %54 = vector.load %arg1[%c0_54, %c0_55, %c9, %c0_56] : memref<1x4x65x4xbf16, #tpu.memory_space<vmem>>, vector<1x1x56x4xbf16>
    %55 = vector.shape_cast %54 : vector<1x1x56x4xbf16> to vector<56x4xbf16>
    %c8_57 = arith.constant 8 : index
    %c0_58 = arith.constant 0 : index
    %c0_59 = arith.constant 0 : index
    %56 = vector.load %arg2[%c8_57, %c0_58, %c0_59] : memref<9x4x384xbf16, #tpu.memory_space<vmem>>, vector<1x4x384xbf16>
    %57 = vector.shape_cast %56 : vector<1x4x384xbf16> to vector<4x384xbf16>
    %cst_60 = arith.constant dense<0.000000e+00> : vector<56x384xf32>
    %58 = tpu.matmul %55, %57, %cst_60 {dimension_numbers = #tpu.dot_dimension_numbers<[1], [0], [0], [1], [0, 0, 1, 1], [], []>} : vector<56x4xbf16>, vector<4x384xbf16>, vector<56x384xf32> -> vector<56x384xf32>
    %59 = arith.addf %52, %58 : vector<56x384xf32>
    %60 = arith.maximumf %53, %55 : vector<56x4xbf16>
    %c0_61 = arith.constant 0 : index
    %c0_62 = arith.constant 0 : index
    %61 = vector.load %arg3[%c0_61, %c0_62] : memref<1x384xf32, #tpu.memory_space<vmem>>, vector<1x384xf32>
    %62 = vector.broadcast %61 : vector<1x384xf32> to vector<56x384xf32>
    %63 = arith.mulf %59, %62 : vector<56x384xf32>
    %c0_63 = arith.constant 0 : index
    %c0_64 = arith.constant 0 : index
    %64 = vector.load %arg4[%c0_63, %c0_64] : memref<1x384xf32, #tpu.memory_space<vmem>>, vector<1x384xf32>
    %65 = vector.broadcast %64 : vector<1x384xf32> to vector<56x384xf32>
    %66 = arith.addf %63, %65 : vector<56x384xf32>
    %cst_65 = arith.constant 0.000000e+00 : f32
    %67 = vector.broadcast %cst_65 : f32 to vector<56x384xf32>
    %68 = arith.maximumf %66, %67 : vector<56x384xf32>
    %c0_66 = arith.constant 0 : index
    %c0_67 = arith.constant 0 : index
    %c0_68 = arith.constant 0 : index
    %69 = vector.load %arg5[%c0_66, %c0_67, %c0_68] : memref<1x56x384xf32, #tpu.memory_space<vmem>>, vector<1x56x384xf32>
    %70 = vector.shape_cast %69 : vector<1x56x384xf32> to vector<56x384xf32>
    %71 = vector.shape_cast %68 : vector<56x384xf32> to vector<1x56x384xf32>
    tpu.vector_store %arg5[%c0_66, %c0_67, %c0_68], %71 {strides = array<i32>} : memref<1x56x384xf32, #tpu.memory_space<vmem>>, vector<1x56x384xf32>,
    %72 = arith.extf %60 : vector<56x4xbf16> to vector<56x4xf32>
    %c0_69 = arith.constant 0 : index
    %c0_70 = arith.constant 0 : index
    %c0_71 = arith.constant 0 : index
    %73 = vector.load %arg6[%c0_69, %c0_70, %c0_71] : memref<1x56x4xf32, #tpu.memory_space<vmem>>, vector<1x56x4xf32>
    %74 = vector.shape_cast %73 : vector<1x56x4xf32> to vector<56x4xf32>
    %75 = vector.shape_cast %72 : vector<56x4xf32> to vector<1x56x4xf32>
    tpu.vector_store %arg6[%c0_69, %c0_70, %c0_71], %75 {strides = array<i32>} : memref<1x56x4xf32, #tpu.memory_space<vmem>>, vector<1x56x4xf32>,
    return
  }
  func.func @transform_0(%arg0: i32) -> (i32, i32, i32, i32) {
    %c0_i32 = arith.constant 0 : i32
    %c0_i32_0 = arith.constant 0 : i32
    %c0_i32_1 = arith.constant 0 : i32
    %c0_i32_2 = arith.constant 0 : i32
    return %arg0, %c0_i32, %c0_i32_0, %c0_i32_1 : i32, i32, i32, i32
  }
  func.func @transform_1(%arg0: i32) -> (i32, i32, i32) {
    %c0_i32 = arith.constant 0 : i32
    %c0_i32_0 = arith.constant 0 : i32
    %c0_i32_1 = arith.constant 0 : i32
    %c0_i32_2 = arith.constant 0 : i32
    return %c0_i32, %c0_i32_0, %c0_i32_1 : i32, i32, i32
  }
  func.func @transform_2(%arg0: i32) -> (i32, i32) {
    %c0_i32 = arith.constant 0 : i32
    %c0_i32_0 = arith.constant 0 : i32
    %c0_i32_1 = arith.constant 0 : i32
    return %c0_i32, %c0_i32_0 : i32, i32
  }
  func.func @transform_3(%arg0: i32) -> (i32, i32) {
    %c0_i32 = arith.constant 0 : i32
    %c0_i32_0 = arith.constant 0 : i32
    %c0_i32_1 = arith.constant 0 : i32
    return %c0_i32, %c0_i32_0 : i32, i32
  }
  func.func @transform_4(%arg0: i32) -> (i32, i32, i32) {
    %c0_i32 = arith.constant 0 : i32
    %c0_i32_0 = arith.constant 0 : i32
    %c0_i32_1 = arith.constant 0 : i32
    return %arg0, %c0_i32, %c0_i32_0 : i32, i32, i32
  }
  func.func @transform_5(%arg0: i32) -> (i32, i32, i32) {
    %c0_i32 = arith.constant 0 : i32
    %c0_i32_0 = arith.constant 0 : i32
    %c0_i32_1 = arith.constant 0 : i32
    return %arg0, %c0_i32, %c0_i32_0 : i32, i32, i32
  }
}

</mosaic_0001>

<bundles_post_ra>
// kernel: inception_b_forward.5
= control target key start
LH: loop header
LB: loop body
LE: loop exit
PB: predicated region body
PF: predicated region fallthrough
CT: control target
= control target key end

     0   :  { %s1171_s15 = smov 0   ;;  %s1324_s0 = inlined_call_operand.vmem [shape: bf16[512,4], index: 0, kind: input, shape index: {}]   ;;  %s1325_s1 = inlined_call_operand.vmem [shape: bf16[4,128], index: 1, kind: input, shape index: {}]   ;;  %s1326_s2 = inlined_call_operand.vmem [shape: f32[1,128], index: 2, kind: input, shape index: {}]   ;;  %s1327_s3 = inlined_call_operand.vmem [shape: f32[1,128], index: 3, kind: input, shape index: {}]   ;;  %s1328_s4 = inlined_call_operand.vmem [shape: bf16[512,128], index: 4, kind: output, shape index: {}]  }
   0x1 LB: > { %s855_s16 = sadd.s32 4294967295, %s1144_s15   ;;  %p859_p0 = scmp.ge.s32.totalorder %s1144_s15, 1  ;;  %s1144_s15 = sphi %s1171_s15, %s14_s15  }
   0x2   : > { %p163_p1 = scmp.lt.s32.totalorder %s1144_s15, 3 }
   0x4   : > { %p164_p2 = pnand %p859_p0, %p163_p1 }
   0x5   : > { %s860_s19 = sshll.u32 (!%p164_p2), %s855_s16, 5 }
   0x6   : > { %167 = sbr.rel (%p164_p2) target bundleno = 249 (0xf9), region = 36  ;;  %p190_p3 = scmp.lt.s32.totalorder (!%p164_p2), %s860_s19, 63 }
   0xb   : > { %v234_v0 = vld [vmem:[%s1325_s1] sm:$0x3]  ;;  %vm364_vm0 = vcmask 1041408   ;;  %s1330_s19 = smov (!%p190_p3, %s860_s19), 63  ;;  %vm315_vm1 = vcmask 31744  }
   0xc   : > { %1112 = vmatprep.subr.msk.bf16.mxu0 %vm364_vm0, %v234_v0  ;;  %1113 = vmatprep.subr.msk.bf16.mxu1 %vm364_vm0, %v234_v0  ;;  %v366_v1 = vsel %vm364_vm0, %v234_v0, 0  ;;  %s861_s20 = sshll.u32 %s1330_s19, 2  ;;  %v1227_v18 = vld [vmem:[%s1326_s2] ss:$0 sm:$0xff] }
   0xd   : > { %1077 = vmatpush3.bf16.msra.mxu0 %v366_v1  ;;  %1111 = vmatpush3.bf16.msra.mxu1 %v366_v1  ;;  %s1190_s23 = scalar_lea.vmem %s1324_s0, %s861_s20  ;;  %v1233_v22 = vld [vmem:[%s1327_s3] ss:$0 sm:$0xff]  ;;  %s1255_s30 = scalar_lea.vmem %s1328_s4, %s861_s20 }
   0xe   : > { %v1122_v2 = vld [vmem:[%s1190_s23] sm:$0xff]   ;;  %v1124_v4 = vld [vmem:[%s1190_s23 + $0x8] sm:$0xff]   ;;  %v1126_v6 = vld [vmem:[%s1190_s23 + $0x10] sm:$0xff]  }
   0xf   : > { %v1123_v3 = vld [vmem:[%s1190_s23 + $0x40] sm:$0xff]   ;;  %1078 = vmatprep.mubr.msk.bf16.mxu0 %vm315_vm1, %v1122_v2  ;;  %v1125_v5 = vld [vmem:[%s1190_s23 + $0x48] sm:$0xff]   ;;  %v1127_v7 = vld [vmem:[%s1190_s23 + $0x50] sm:$0xff]  }
  0x10   : > { %1094 = vmatprep.mubr.msk.bf16.mxu1 %vm315_vm1, %v1123_v3  ;;  %1079 = vmatmul.mubr.msk.bf16.vlgmr.msra.gmra.mxu0 %vm315_vm1, %v1124_v4  ;;  %v1128_v8 = vld [vmem:[%s1190_s23 + $0x18] sm:$0xff]   ;;  %v1130_v10 = vld [vmem:[%s1190_s23 + $0x20] sm:$0xff]   ;;  %v1132_v12 = vld [vmem:[%s1190_s23 + $0x28] sm:$0xff]  }
  0x11   : > { %1095 = vmatmul.mubr.msk.bf16.vlgmr.msra.gmra.mxu1 %vm315_vm1, %v1125_v5  ;;  %1082 = vmatprep.mubr.msk.bf16.mxu0 %vm315_vm1, %v1126_v6  ;;  %v1129_v9 = vld [vmem:[%s1190_s23 + $0x58] sm:$0xff]   ;;  %v1131_v11 = vld [vmem:[%s1190_s23 + $0x60] sm:$0xff]   ;;  %v1133_v13 = vld [vmem:[%s1190_s23 + $0x68] sm:$0xff]  }
  0x12   : > { %1098 = vmatprep.mubr.msk.bf16.mxu1 %vm315_vm1, %v1127_v7  ;;  %v1134_v14 = vld [vmem:[%s1190_s23 + $0x30] sm:$0xff]   ;;  %v1136_v16 = vld [vmem:[%s1190_s23 + $0x38] sm:$0xff]  }
  0x13   : > { %v1135_v15 = vld [vmem:[%s1190_s23 + $0x70] sm:$0xff]   ;;  %v1137_v17 = vld [vmem:[%s1190_s23 + $0x78] sm:$0xff]  }
  0x18   : > { %1083 = vmatmul.mubr.msk.bf16.gmra.mxu0 %vm315_vm1, %v1128_v8 }
  0x19   : > { %1099 = vmatmul.mubr.msk.bf16.gmra.mxu1 %vm315_vm1, %v1129_v9  ;;  %1086 = vmatprep.mubr.msk.bf16.mxu0 %vm315_vm1, %v1130_v10 }
  0x1a   : > { %1102 = vmatprep.mubr.msk.bf16.mxu1 %vm315_vm1, %v1131_v11 }
  0x20   : > { %1087 = vmatmul.mubr.msk.bf16.gmra.mxu0 %vm315_vm1, %v1132_v12 }
  0x21   : > { %1103 = vmatmul.mubr.msk.bf16.gmra.mxu1 %vm315_vm1, %v1133_v13  ;;  %1090 = vmatprep.mubr.msk.bf16.mxu0 %vm315_vm1, %v1134_v14 }
  0x22   : > { %1106 = vmatprep.mubr.msk.bf16.mxu1 %vm315_vm1, %v1135_v15 }
  0x28   : > { %1091 = vmatmul.mubr.msk.bf16.gmra.mxu0 %vm315_vm1, %v1136_v16 }
  0x29   : > { %1107 = vmatmul.mubr.msk.bf16.gmra.mxu1 %vm315_vm1, %v1137_v17 }
  0xd0   : > { %v1080_v19 = vpop.f32.mrf.mxu0 }
  0xd1   : > { %v538_v20 = vmul.f32 %v1080_v19, %v1227_v18  ;;  %v1096_v21 = vpop.f32.mrf.mxu1 }
  0xd2   : > { %v554_v23 = vmul.f32 %v1096_v21, %v1227_v18  ;;  %v402_v24 = vpop.f32.mrf.mxu0 }
  0xd3   : > { %v536_v25 = vmul.f32 %v1227_v18, %v402_v24  ;;  %v466_v26 = vpop.f32.mrf.mxu1  ;;  %v577_v29 = vadd.f32 %v1233_v22, %v538_v20 }
  0xd4   : > { %v552_v27 = vmul.f32 %v1227_v18, %v466_v26  ;;  %v1081_v28 = vpop.f32.mrf.mxu0  ;;  %v593_v32 = vadd.f32 %v1233_v22, %v554_v23 }
  0xd5   : > { %v539_v30 = vmul.f32 %v1081_v28, %v1227_v18  ;;  %v1097_v31 = vpop.f32.mrf.mxu1  ;;  %v575_v35 = vadd.f32 %v1233_v22, %v536_v25  ;;  %v609_v43 = vmax.f32 %v577_v29, 0.0 }
  0xd6   : > { %v555_v33 = vmul.f32 %v1097_v31, %v1227_v18  ;;  %v405_v34 = vpop.f32.mrf.mxu0  ;;  %v591_v39 = vadd.f32 %v1233_v22, %v552_v27  ;;  %v625_v48 = vmax.f32 %v593_v32, 0.0 }
  0xd7   : > { %v578_v36 = vadd.f32 %v1233_v22, %v539_v30  ;;  %v537_v37 = vmul.f32 %v1227_v18, %v405_v34  ;;  %v469_v38 = vpop.f32.mrf.mxu1  ;;  %v607_v53 = vmax.f32 %v575_v35, 0.0 }
  0xd8   : > { %v594_v40 = vadd.f32 %v1233_v22, %v555_v33  ;;  %v553_v41 = vmul.f32 %v1227_v18, %v469_v38  ;;  %v1084_v42 = vpop.f32.mrf.mxu0  ;;  %v623_v58 = vmax.f32 %v591_v39, 0.0 }
  0xd9   : > { %v610_v44 = vmax.f32 %v578_v36, 0.0  ;;  %v576_v45 = vadd.f32 %v1233_v22, %v537_v37  ;;  %v542_v46 = vmul.f32 %v1084_v42, %v1227_v18  ;;  %v1100_v47 = vpop.f32.mrf.mxu1 }
  0xda   : > { %v626_v49 = vmax.f32 %v594_v40, 0.0  ;;  %v592_v50 = vadd.f32 %v1233_v22, %v553_v41  ;;  %v558_v51 = vmul.f32 %v1100_v47, %v1227_v18  ;;  %v418_v52 = vpop.f32.mrf.mxu0 }
  0xdb   : > { %v972_v54 = vpack.c.bf16 %v610_v44, %v609_v43  ;;  %v608_v55 = vmax.f32 %v576_v45, 0.0  ;;  %v540_v56 = vmul.f32 %v1227_v18, %v418_v52  ;;  %v482_v57 = vpop.f32.mrf.mxu1  ;;  %v581_v0 = vadd.f32 %v1233_v22, %v542_v46 }
  0xdc   : > { %v1012_v59 = vpack.c.bf16 %v626_v49, %v625_v48  ;;  %v624_v60 = vmax.f32 %v592_v50, 0.0  ;;  %v556_v61 = vmul.f32 %v1227_v18, %v482_v57  ;;  %v1085_v62 = vpop.f32.mrf.mxu0  ;;  %v597_v4 = vadd.f32 %v1233_v22, %v558_v51 }
  0xdd   : > { %1044 = vst [vmem:[%s1255_s30 + $0x8] sm:$0xff] %v972_v54   ;;  %v967_v63 = vpack.c.bf16 %v608_v55, %v607_v53  ;;  %v543_v1 = vmul.f32 %v1085_v62, %v1227_v18  ;;  %v1101_v2 = vpop.f32.mrf.mxu1  ;;  %v579_v7 = vadd.f32 %v1233_v22, %v540_v56  ;;  %v613_v15 = vmax.f32 %v581_v0, 0.0 }
  0xde   : > { %1052 = vst [vmem:[%s1255_s30 + $0x48] sm:$0xff] %v1012_v59   ;;  %v1007_v3 = vpack.c.bf16 %v624_v60, %v623_v58  ;;  %v559_v5 = vmul.f32 %v1101_v2, %v1227_v18  ;;  %v421_v6 = vpop.f32.mrf.mxu0  ;;  %v595_v11 = vadd.f32 %v1233_v22, %v556_v61  ;;  %v629_v21 = vmax.f32 %v597_v4, 0.0 }
  0xdf   : > { %968 = vst [vmem:[%s1255_s30] sm:$0xff] %v967_v63   ;;  %v582_v8 = vadd.f32 %v1233_v22, %v543_v1  ;;  %v541_v9 = vmul.f32 %v1227_v18, %v421_v6  ;;  %v485_v10 = vpop.f32.mrf.mxu1  ;;  %v611_v27 = vmax.f32 %v579_v7, 0.0 }
  0xe0   : > { %1051 = vst [vmem:[%s1255_s30 + $0x40] sm:$0xff] %v1007_v3   ;;  %v598_v12 = vadd.f32 %v1233_v22, %v559_v5  ;;  %v557_v13 = vmul.f32 %v1227_v18, %v485_v10  ;;  %v1088_v14 = vpop.f32.mrf.mxu0  ;;  %v627_v32 = vmax.f32 %v595_v11, 0.0 }
  0xe1   : > { %v614_v16 = vmax.f32 %v582_v8, 0.0  ;;  %v580_v17 = vadd.f32 %v1233_v22, %v541_v9  ;;  %v546_v19 = vmul.f32 %v1088_v14, %v1227_v18  ;;  %v1104_v20 = vpop.f32.mrf.mxu1 }
  0xe2   : > { %v630_v23 = vmax.f32 %v598_v12, 0.0  ;;  %v596_v24 = vadd.f32 %v1233_v22, %v557_v13  ;;  %v562_v25 = vmul.f32 %v1104_v20, %v1227_v18  ;;  %v434_v26 = vpop.f32.mrf.mxu0 }
  0xe3   : > { %v982_v28 = vpack.c.bf16 %v614_v16, %v613_v15  ;;  %v612_v29 = vmax.f32 %v580_v17, 0.0  ;;  %v544_v30 = vmul.f32 %v1227_v18, %v434_v26  ;;  %v498_v31 = vpop.f32.mrf.mxu1  ;;  %v585_v38 = vadd.f32 %v1233_v22, %v546_v19 }
  0xe4   : > { %v1022_v33 = vpack.c.bf16 %v630_v23, %v629_v21  ;;  %v628_v34 = vmax.f32 %v596_v24, 0.0  ;;  %v560_v35 = vmul.f32 %v1227_v18, %v498_v31  ;;  %v1089_v36 = vpop.f32.mrf.mxu0  ;;  %v601_v42 = vadd.f32 %v1233_v22, %v562_v25 }
  0xe5   : > { %1046 = vst [vmem:[%s1255_s30 + $0x18] sm:$0xff] %v982_v28   ;;  %v977_v37 = vpack.c.bf16 %v612_v29, %v611_v27  ;;  %v547_v39 = vmul.f32 %v1089_v36, %v1227_v18  ;;  %v1105_v40 = vpop.f32.mrf.mxu1  ;;  %v583_v45 = vadd.f32 %v1233_v22, %v544_v30  ;;  %v617_v53 = vmax.f32 %v585_v38, 0.0 }
  0xe6   : > { %1054 = vst [vmem:[%s1255_s30 + $0x58] sm:$0xff] %v1022_v33   ;;  %v1017_v41 = vpack.c.bf16 %v628_v34, %v627_v32  ;;  %v563_v43 = vmul.f32 %v1105_v40, %v1227_v18  ;;  %v437_v44 = vpop.f32.mrf.mxu0  ;;  %v599_v49 = vadd.f32 %v1233_v22, %v560_v35  ;;  %v633_v58 = vmax.f32 %v601_v42, 0.0 }
  0xe7   : > { %1045 = vst [vmem:[%s1255_s30 + $0x10] sm:$0xff] %v977_v37   ;;  %v586_v46 = vadd.f32 %v1233_v22, %v547_v39  ;;  %v545_v47 = vmul.f32 %v1227_v18, %v437_v44  ;;  %v501_v48 = vpop.f32.mrf.mxu1  ;;  %v615_v63 = vmax.f32 %v583_v45, 0.0 }
  0xe8   : > { %1053 = vst [vmem:[%s1255_s30 + $0x50] sm:$0xff] %v1017_v41   ;;  %v602_v50 = vadd.f32 %v1233_v22, %v563_v43  ;;  %v561_v51 = vmul.f32 %v1227_v18, %v501_v48  ;;  %v1092_v52 = vpop.f32.mrf.mxu0  ;;  %v631_v4 = vmax.f32 %v599_v49, 0.0 }
  0xe9   : > { %v618_v54 = vmax.f32 %v586_v46, 0.0  ;;  %v584_v55 = vadd.f32 %v1233_v22, %v545_v47  ;;  %v550_v56 = vmul.f32 %v1092_v52, %v1227_v18  ;;  %v1108_v57 = vpop.f32.mrf.mxu1 }
  0xea   : > { %v634_v59 = vmax.f32 %v602_v50, 0.0  ;;  %v600_v60 = vadd.f32 %v1233_v22, %v561_v51  ;;  %v566_v61 = vmul.f32 %v1108_v57, %v1227_v18  ;;  %v450_v62 = vpop.f32.mrf.mxu0 }
  0xeb   : > { %v992_v0 = vpack.c.bf16 %v618_v54, %v617_v53  ;;  %v616_v1 = vmax.f32 %v584_v55, 0.0  ;;  %v548_v2 = vmul.f32 %v1227_v18, %v450_v62  ;;  %v514_v3 = vpop.f32.mrf.mxu1  ;;  %v589_v10 = vadd.f32 %v1233_v22, %v550_v56 }
  0xec   : > { %v1032_v5 = vpack.c.bf16 %v634_v59, %v633_v58  ;;  %v632_v6 = vmax.f32 %v600_v60, 0.0  ;;  %v564_v7 = vmul.f32 %v1227_v18, %v514_v3  ;;  %v1093_v8 = vpop.f32.mrf.mxu0  ;;  %v605_v14 = vadd.f32 %v1233_v22, %v566_v61 }
  0xed   : > { %1048 = vst [vmem:[%s1255_s30 + $0x28] sm:$0xff] %v992_v0   ;;  %v987_v9 = vpack.c.bf16 %v616_v1, %v615_v63  ;;  %v551_v11 = vmul.f32 %v1093_v8, %v1227_v18  ;;  %v1109_v12 = vpop.f32.mrf.mxu1  ;;  %v587_v17 = vadd.f32 %v1233_v22, %v548_v2  ;;  %v621_v26 = vmax.f32 %v589_v10, 0.0 }
  0xee   : > { %1056 = vst [vmem:[%s1255_s30 + $0x68] sm:$0xff] %v1032_v5   ;;  %v1027_v13 = vpack.c.bf16 %v632_v6, %v631_v4  ;;  %v567_v15 = vmul.f32 %v1109_v12, %v1227_v18  ;;  %v453_v16 = vpop.f32.mrf.mxu0  ;;  %v603_v23 = vadd.f32 %v1233_v22, %v564_v7  ;;  %v637_v29 = vmax.f32 %v605_v14, 0.0 }
  0xef   : > { %1047 = vst [vmem:[%s1255_s30 + $0x20] sm:$0xff] %v987_v9   ;;  %v590_v19 = vadd.f32 %v1233_v22, %v551_v11  ;;  %v549_v20 = vmul.f32 %v1227_v18, %v453_v16  ;;  %v517_v21 = vpop.f32.mrf.mxu1  ;;  %v619_v32 = vmax.f32 %v587_v17, 0.0 }
  0xf0   : > { %1055 = vst [vmem:[%s1255_s30 + $0x60] sm:$0xff] %v1027_v13   ;;  %v606_v24 = vadd.f32 %v1233_v22, %v567_v15  ;;  %v565_v25 = vmul.f32 %v1227_v18, %v517_v21  ;;  %v635_v35 = vmax.f32 %v603_v23, 0.0 }
  0xf1   : > { %v622_v27 = vmax.f32 %v590_v19, 0.0  ;;  %v588_v28 = vadd.f32 %v1233_v22, %v549_v20 }
  0xf2   : > { %v638_v30 = vmax.f32 %v606_v24, 0.0  ;;  %v604_v31 = vadd.f32 %v1233_v22, %v565_v25 }
  0xf3   : > { %v1002_v33 = vpack.c.bf16 %v622_v27, %v621_v26  ;;  %v620_v34 = vmax.f32 %v588_v28, 0.0 }
  0xf4   : > { %v1042_v36 = vpack.c.bf16 %v638_v30, %v637_v29  ;;  %v636_v37 = vmax.f32 %v604_v31, 0.0 }
  0xf5   : > { %1050 = vst [vmem:[%s1255_s30 + $0x38] sm:$0xff] %v1002_v33   ;;  %v997_v38 = vpack.c.bf16 %v620_v34, %v619_v32 }
  0xf6   : > { %1058 = vst [vmem:[%s1255_s30 + $0x78] sm:$0xff] %v1042_v36   ;;  %v1037_v18 = vpack.c.bf16 %v636_v37, %v635_v35 }
  0xf7   : > { %1049 = vst [vmem:[%s1255_s30 + $0x30] sm:$0xff] %v997_v38  }
  0xf8   : > { %1057 = vst [vmem:[%s1255_s30 + $0x70] sm:$0xff] %v1037_v18  }
  0xf9 PF: > { %s14_s15 = sadd.s32 1, %s1144_s15  }
  0xfa   : > { %p11_p4 = scmp.ge.s32.totalorder %s14_s15, 4  }
  0xfc   :  { %13 = sbr.rel (!%p11_p4) target bundleno = 1 (0x1), region = 66 }

// kernel: inception_b_forward.7
= control target key start
LH: loop header
LB: loop body
LE: loop exit
PB: predicated region body
PF: predicated region fallthrough
CT: control target
= control target key end

     0   :  { %s2467_s15 = smov 0   ;;  %s2770_s0 = inlined_call_operand.vmem [shape: bf16[2,4,65,96], index: 0, kind: input, shape index: {}]   ;;  %s2771_s1 = inlined_call_operand.vmem [shape: bf16[9,96,128], index: 1, kind: input, shape index: {}]   ;;  %s2772_s2 = inlined_call_operand.vmem [shape: f32[1,128], index: 2, kind: input, shape index: {}]   ;;  %s2773_s3 = inlined_call_operand.vmem [shape: f32[1,128], index: 3, kind: input, shape index: {}]   ;;  %s2774_s4 = inlined_call_operand.vmem [shape: f32[2,56,128], index: 4, kind: output, shape index: {}]  }
   0x1 LB: > { %s1783_s16 = sadd.s32 4294967295, %s2440_s15   ;;  %p1787_p0 = scmp.ge.s32.totalorder %s2440_s15, 1  ;;  %s2440_s15 = sphi %s2467_s15, %s14_s15  }
   0x2   : > { %p162_p1 = scmp.lt.s32.totalorder %s2440_s15, 3 }
   0x4   : > { %p163_p2 = pnand %p1787_p0, %p162_p1 }
   0x5   : > { %p188_p3 = scmp.lt.s32.totalorder (!%p163_p2), %s1783_s16, 1 }
   0x6   : > { %166 = sbr.rel (%p163_p2) target bundleno = 341 (0x155), region = 36 }
   0xb   : > { %v2344_v0 = vld [vmem:[%s2771_s1 + $0x58] sm:$0xff]   ;;  %v2345_v1 = vld [vmem:[%s2771_s1 + $0x28] sm:$0xff]   ;;  %v2346_v2 = vld [vmem:[%s2771_s1 + $0x50] sm:$0xff]   ;;  %s2776_s16 = smov (!%p188_p3, %s1783_s16), 1  ;;  %vm293_vm0 = vcmask 785408  }
   0xc   : > { %2142 = vmatprep.subr.bf16.mxu0 %v2344_v0  ;;  %2162 = vmatprep.subr.bf16.mxu1 %v2345_v1  ;;  %v2347_v3 = vld [vmem:[%s2771_s1 + $0x20] sm:$0xff]   ;;  %v2348_v4 = vld [vmem:[%s2771_s1 + $0x48] sm:$0xff]   ;;  %v2349_v5 = vld [vmem:[%s2771_s1 + $0x18] sm:$0xff]   ;;  %s2334_s29 = smul.u32 144, %s2776_s16  ;;  %vm541_vm1 = vsmask.f32 7424 }
   0xd   : > { %2143 = vmatpush3.bf16.msra.mxu0 %v2344_v0  ;;  %2163 = vmatpush3.bf16.msra.mxu1 %v2345_v1  ;;  %v2350_v6 = vld [vmem:[%s2771_s1 + $0x40] sm:$0xff]   ;;  %v2351_v7 = vld [vmem:[%s2771_s1 + $0x10] sm:$0xff]   ;;  %v2352_v8 = vld [vmem:[%s2771_s1 + $0x38] sm:$0xff]   ;;  %s2335_s12 = smul.u32 56, %s2776_s16 }
   0xe   : > { %2144 = vmatprep.subr.bf16.mxu0 %v2346_v2  ;;  %2164 = vmatprep.subr.bf16.mxu1 %v2347_v3  ;;  %s2505_s10 = scalar_lea.vmem %s2770_s0, %s2334_s29  ;;  %v2353_v9 = vld [vmem:[%s2771_s1 + $0x8] sm:$0xff]   ;;  %v2354_v12 = vld [vmem:[%s2771_s1 + $0x30] sm:$0xff]   ;;  %v2355_v13 = vld [vmem:[%s2771_s1] sm:$0xff]  }
   0xf   : > { %v2356_v10 = vld [vmem:[%s2505_s10 + $0x24] sm:$0xff]   ;;  %v2358_v14 = vld [vmem:[%s2505_s10 + $0x2c] sm:$0xff]   ;;  %v2361_v16 = vld [vmem:[%s2771_s1 + $0xb8] sm:$0xff]   ;;  %s197_s18 = scalar_lea.vmem %s2774_s4, %s2335_s12 }
  0x10   : > { %v2357_v11 = vld [vmem:[%s2505_s10] sm:$0xff]   ;;  %2154 = vmatprep.mubr.msk.bf16.mxu0 %vm293_vm0, %v2356_v10  ;;  %v2360_v15 = vld [vmem:[%s2771_s1 + $0x88] sm:$0xff]   ;;  %v2363_v19 = vld [vmem:[%s2771_s1 + $0xb0] sm:$0xff]  }
  0x11   : > { %2145 = vmatpush3.bf16.msra.mxu0 %v2346_v2  ;;  %2165 = vmatpush3.bf16.msra.mxu1 %v2347_v3  ;;  %v2359_v17 = vld [vmem:[%s2505_s10 + $0x8] sm:$0xff]   ;;  %v2362_v18 = vld [vmem:[%s2771_s1 + $0x80] sm:$0xff]   ;;  %v2366_v20 = vld [vmem:[%s2505_s10 + $0x34] sm:$0xff]  }
  0x12   : > { %2146 = vmatprep.subr.bf16.mxu0 %v2348_v4  ;;  %2166 = vmatprep.subr.bf16.mxu1 %v2349_v5  ;;  %v2364_v21 = vld [vmem:[%s2771_s1 + $0x78] sm:$0xff]   ;;  %v2367_v22 = vld [vmem:[%s2505_s10 + $0x10] sm:$0xff]   ;;  %v2365_v23 = vld [vmem:[%s2771_s1 + $0xa8] sm:$0xff]  }
  0x13   : > { %2174 = vmatprep.mubr.msk.bf16.mxu1 %vm293_vm0, %v2357_v11  ;;  %v2368_v24 = vld [vmem:[%s2505_s10 + $0x3c] ss:$0 sps:$4 sm:$0xff]   ;;  %v2369_v25 = vld [vmem:[%s2505_s10 + $0x18] ss:$0 sps:$4 sm:$0xff]   ;;  %v2370_v26 = vld [vmem:[%s2771_s1 + $0x70] sm:$0xff]  }
  0x14   : > { %v2371_v27 = vld [vmem:[%s2771_s1 + $0xa0] sm:$0xff]   ;;  %v2562_v30 = vld [vmem:[%s2505_s10 + $0x8] sm:$0xf]  ;;  %v2565_v31 = vld [vmem:[%s2505_s10 + $0xc] sm:$0xf] }
  0x15   : > { %2147 = vmatpush3.bf16.msra.mxu0 %v2348_v4  ;;  %2167 = vmatpush3.bf16.msra.mxu1 %v2349_v5  ;;  %v500_v28 = vld [vmem:[%s2505_s10] sm:$0xf]  ;;  %v2559_v29 = vld [vmem:[%s2505_s10 + $0x4] sm:$0xf]  ;;  %v2568_v32 = vld [vmem:[%s2505_s10 + $0x10] sm:$0xf]  ;;  %v1850_v35 = vcombine.low %v2562_v30, %v2565_v31 }
  0x16   : > { %2148 = vmatprep.subr.bf16.mxu0 %v2350_v6  ;;  %2168 = vmatprep.subr.bf16.mxu1 %v2351_v7  ;;  %v1849_v33 = vcombine.low %v500_v28, %v2559_v29  ;;  %v2572_v34 = vld [vmem:[%s2505_s10 + $0x14] sm:$0xf]  ;;  %v2380_v38 = vld [vmem:[%s2505_s10 + $0x48] sm:$0xff]   ;;  %v2373_v43 = vld [vmem:[%s2771_s1 + $0x98] sm:$0xff]  }
  0x17   : > { %v1851_v39 = vcombine.low %v2568_v32, %v2572_v34  ;;  %v550_v40 = vshll.u32 %v1850_v35, 16  ;;  %v2372_v41 = vld [vmem:[%s2771_s1 + $0x68] sm:$0xff]   ;;  %v554_v46 = vshrl.u32 %v1850_v35, 16  ;;  %v2374_v48 = vld [vmem:[%s2771_s1 + $0x60] sm:$0xff]   ;;  %v2593_v50 = vld [vmem:[%s2505_s10 + $0x18] sm:$0xf] }
  0x18   : > { %v543_v36 = vshrl.u32 %v1849_v33, 16  ;;  %v545_v37 = vshll.u32 %v1849_v33, 16  ;;  %v507_v51 = vld [vmem:[%s2505_s10 + $0x1c] sm:$0x1]  ;;  %v2375_v52 = vld [vmem:[%s2771_s1 + $0x90] sm:$0xff]   ;;  %v2382_v58 = vld [vmem:[%s2771_s1 + $0xe8] sm:$0xff]  }
  0x19   : > { %2149 = vmatpush3.bf16.msra.mxu0 %v2350_v6  ;;  %2169 = vmatpush3.bf16.msra.mxu1 %v2351_v7  ;;  %v552_v44 = vrot.slane %v550_v40, 1  ;;  %v558_v47 = vshll.u32 %v1851_v39, 16  ;;  %v1852_v53 = vcombine.low %v2593_v50, %v507_v51  ;;  %v562_v54 = vshrl.u32 %v1851_v39, 16  ;;  %v2383_v59 = vld [vmem:[%s2771_s1 + $0x118] sm:$0xff]   ;;  %v2381_v63 = vld [vmem:[%s2505_s10 + $0x50] sm:$0xff]   ;;  %v2384_v0 = vld [vmem:[%s2771_s1 + $0xe0] sm:$0xff]  }
  0x1a   : > { %2150 = vmatprep.subr.bf16.mxu0 %v2352_v8  ;;  %2170 = vmatprep.subr.bf16.mxu1 %v2353_v9  ;;  %v547_v42 = vrot.slane %v545_v37, 1  ;;  %v2385_v1 = vld [vmem:[%s2771_s1 + $0x110] sm:$0xff]   ;;  %v2387_v4 = vld [vmem:[%s2771_s1 + $0xd8] sm:$0xff]   ;;  %v2388_v6 = vld [vmem:[%s2771_s1 + $0x108] sm:$0xff]  }
  0x1b   : > { %v556_v55 = vor.u32 %v554_v46, %v552_v44  ;;  %v560_v56 = vrot.slane %v558_v47, 1  ;;  %v566_v57 = vshll.u32 %v1852_v53, 16  ;;  %v570_v3 = vshrl.u32 %v1852_v53, 16  ;;  %v2389_v5 = vld [vmem:[%s2505_s10 + $0x58] sm:$0xff]   ;;  %v2398_v7 = vld [vmem:[%s2505_s10 + $0x48] sm:$0xff]  }
  0x1c   : > { %v548_v45 = vor.u32 %v547_v42, %v543_v36  ;;  %v2390_v10 = vld [vmem:[%s2505_s10 + $0x60] ss:$0 sps:$4 sm:$0xff]   ;;  %v1050_v11 = vshrl.u32 %v2398_v7, 16  ;;  %v2402_v35 = vld [vmem:[%s2771_s1 + $0x148] sm:$0xff]   ;;  %v2403_v39 = vld [vmem:[%s2771_s1 + $0x178] sm:$0xff]  }
  0x1d   : > { %2151 = vmatpush3.bf16.msra.mxu0 %v2352_v8  ;;  %2171 = vmatpush3.bf16.msra.mxu1 %v2353_v9  ;;  %v564_v60 = vor.u32 %v562_v54, %v560_v56  ;;  %v568_v61 = vrot.slane %v566_v57, 1  ;;  %v561_v62 = vsel %vm541_vm1, %v556_v55, %v560_v56  ;;  %v2399_v8 = vld [vmem:[%s2505_s10 + $0x50] sm:$0xff]   ;;  %v2410_v28 = vld [vmem:[%s2505_s10 + $0x60] sm:$0x1f]   ;;  %v2409_v51 = vld [vmem:[%s2771_s1 + $0x168] sm:$0xff]   ;;  %v1975_v56 = vcombine.low %v2559_v29, %v2562_v30 }
  0x1e   : > { %2152 = vmatprep.subr.bf16.mxu0 %v2354_v12  ;;  %2172 = vmatprep.subr.bf16.mxu1 %v2355_v13  ;;  %v553_v49 = vsel %vm541_vm1, %v548_v45, %v552_v44  ;;  %v1073_v37 = vshll.u32 %v2410_v28, 16  ;;  %v2400_v40 = vld [vmem:[%s2505_s10 + $0x74] sm:$0xff]   ;;  %v2406_v46 = vld [vmem:[%s2505_s10 + $0x7c] sm:$0xff]   ;;  %v2418_v57 = vld [vmem:[%s2505_s10 + $0x28] sm:$0xff]  }
  0x1f   : > { %v569_v2 = vsel %vm541_vm1, %v564_v60, %v568_v61  ;;  %v572_v9 = vor.u32 %v570_v3, %v568_v61  ;;  %v2405_v45 = vld [vmem:[%s2771_s1 + $0x170] sm:$0xff]   ;;  %v2412_v55 = vld [vmem:[%s2771_s1 + $0x160] sm:$0xff]  }
  0x20   : > { %v2411_v54 = vld [vmem:[%s2771_s1 + $0x130] sm:$0xff]   ;;  %v2415_v29 = vld [vmem:[%s2771_s1 + $0x120] sm:$0xff]  }
  0x21   : > { %2153 = vmatpush3.bf16.msra.mxu0 %v2354_v12  ;;  %2173 = vmatpush3.bf16.msra.mxu1 %v2355_v13  ;;  %v1052_v12 = vshll.u32 %v2398_v7, 16  ;;  %v1057_v13 = vshll.u32 %v2399_v8, 16  ;;  %v2416_v30 = vld [vmem:[%s2771_s1 + $0x150] sm:$0xff]   ;;  %v2430_v60 = vld [vmem:[%s2505_s10 + $0x4] sm:$0xff]   ;;  %v2433_v3 = vld [vmem:[%s2505_s10 + $0x1c] sm:$0x1f]  }
  0x22   : > { %2182 = vmatprep.subr.bf16.mxu0 %v2360_v15  ;;  %2202 = vmatprep.subr.bf16.mxu1 %v2361_v16  ;;  %v2432_v61 = vld [vmem:[%s2505_s10 + $0x14] sm:$0xff]  }
  0x24   : > { %2155 = vmatmul.mubr.msk.bf16.vlgmr.msra.gmra.mxu0 %vm293_vm0, %v2358_v14  ;;  %2175 = vmatmul.mubr.msk.bf16.vlgmr.msra.gmra.mxu1 %vm293_vm0, %v2359_v17  ;;  %v2391_v14 = vld [vmem:[%s2771_s1 + $0xd0] sm:$0xff]   ;;  %v1054_v17 = vrot.slane %v1052_v12, 1 }
  0x25   : > { %2183 = vmatpush3.bf16.msra.mxu0 %v2360_v15  ;;  %2203 = vmatpush3.bf16.msra.mxu1 %v2361_v16  ;;  %v2392_v15 = vld [vmem:[%s2771_s1 + $0x100] sm:$0xff]   ;;  %v2397_v16 = vld [vmem:[%s2505_s10 + $0x6c] sm:$0xff]  }
  0x26   : > { %2184 = vmatprep.subr.bf16.mxu0 %v2362_v18  ;;  %2204 = vmatprep.subr.bf16.mxu1 %v2363_v19 }
  0x27   : > { %2158 = vmatprep.mubr.msk.bf16.mxu0 %vm293_vm0, %v2366_v20  ;;  %2178 = vmatprep.mubr.msk.bf16.mxu1 %vm293_vm0, %v2367_v22  ;;  %v1055_v20 = vor.u32 %v1054_v17, %v1050_v11  ;;  %v2394_v22 = vld [vmem:[%s2771_s1 + $0xf8] sm:$0xff]   ;;  %v1560_v11 = vshll.u32 %v2433_v3, 16  ;;  %v2427_v17 = vld [vmem:[%s2771_s1 + $0x190] sm:$0xff]  }
  0x29   : > { %2185 = vmatpush3.bf16.msra.mxu0 %v2362_v18  ;;  %2205 = vmatpush3.bf16.msra.mxu1 %v2363_v19  ;;  %v1059_v18 = vrot.slane %v1057_v13, 1  ;;  %v2401_v19 = vld [vmem:[%s2505_s10 + $0x58] sm:$0xff]  }
  0x2a   : > { %2186 = vmatprep.subr.bf16.mxu0 %v2364_v21  ;;  %2206 = vmatprep.subr.bf16.mxu1 %v2365_v23  ;;  %v1069_v36 = vshrl.u32 %v2401_v19, 16 }
  0x2c   : > { %2159 = vmatmul.mubr.msk.bf16.gmra.mxu0 %vm293_vm0, %v2368_v24  ;;  %2179 = vmatmul.mubr.msk.bf16.gmra.mxu1 %vm293_vm0, %v2369_v25  ;;  %v2395_v24 = vld [vmem:[%s2771_s1 + $0xc0] sm:$0xff]   ;;  %v1065_v25 = vshll.u32 %v2401_v19, 16 }
  0x2d   : > { %2187 = vmatpush3.bf16.msra.mxu0 %v2364_v21  ;;  %2207 = vmatpush3.bf16.msra.mxu1 %v2365_v23  ;;  %v2393_v21 = vld [vmem:[%s2771_s1 + $0xc8] sm:$0xff]   ;;  %v1060_v23 = vsel %vm541_vm1, %v1055_v20, %v1059_v18 }
  0x2e   : > { %2188 = vmatprep.subr.bf16.mxu0 %v2370_v26  ;;  %2208 = vmatprep.subr.bf16.mxu1 %v2371_v27  ;;  %v1067_v33 = vrot.slane %v1065_v25, 1  ;;  %v2428_v20 = vld [vmem:[%s2771_s1 + $0x188] sm:$0xff]  }
  0x2f   : > { %2214 = vmatprep.mubr.msk.bf16.mxu1 %vm293_vm0, %v2380_v38  ;;  %2194 = vmatprep.mubr.msk.bf16.mxu0 %vm293_vm0, %v553_v49  ;;  %v2408_v49 = vld [vmem:[%s2771_s1 + $0x138] sm:$0xff]  }
  0x30   : > { %v1071_v42 = vor.u32 %v1069_v36, %v1067_v33 }
  0x31   : > { %2189 = vmatpush3.bf16.msra.mxu0 %v2370_v26  ;;  %2209 = vmatpush3.bf16.msra.mxu1 %v2371_v27  ;;  %v2396_v26 = vld [vmem:[%s2771_s1 + $0xf0] sm:$0xff]   ;;  %v1061_v27 = vshrl.u32 %v2399_v8, 16 }
  0x32   : > { %2190 = vmatprep.subr.bf16.mxu0 %v2372_v41  ;;  %2210 = vmatprep.subr.bf16.mxu1 %v2373_v43 }
  0x33   : > { %v1063_v38 = vor.u32 %v1061_v27, %v1059_v18 }
  0x35   : > { %2191 = vmatpush3.bf16.msra.mxu0 %v2372_v41  ;;  %2211 = vmatpush3.bf16.msra.mxu1 %v2373_v43  ;;  %v2404_v41 = vld [vmem:[%s2771_s1 + $0x140] sm:$0xff]   ;;  %v1075_v43 = vrot.slane %v1073_v37, 1  ;;  %v1068_v44 = vsel %vm541_vm1, %v1063_v38, %v1067_v33 }
  0x36   : > { %2192 = vmatprep.subr.bf16.mxu0 %v2374_v48  ;;  %2212 = vmatprep.subr.bf16.mxu1 %v2375_v52 }
  0x37   : > { %v1076_v47 = vsel %vm541_vm1, %v1071_v42, %v1075_v43 }
  0x39   : > { %2193 = vmatpush3.bf16.msra.mxu0 %v2374_v48  ;;  %2213 = vmatpush3.bf16.msra.mxu1 %v2375_v52  ;;  %v1077_v48 = vshrl.u32 %v2410_v28, 16  ;;  %v2407_v52 = vld [vmem:[%s2505_s10 + $0x84] ss:$0 sps:$4 sm:$0xff]  }
  0x3a   : > { %2222 = vmatprep.subr.bf16.mxu0 %v2382_v58  ;;  %2242 = vmatprep.subr.bf16.mxu1 %v2383_v59 }
  0x3b   : > { %v1079_v53 = vor.u32 %v1077_v48, %v1075_v43 }
  0x3c   : > { %2195 = vmatmul.mubr.msk.bf16.vlgmr.msra.gmra.mxu0 %vm293_vm0, %v561_v62  ;;  %2215 = vmatmul.mubr.msk.bf16.vlgmr.msra.gmra.mxu1 %vm293_vm0, %v2381_v63  ;;  %v2420_v62 = vld [vmem:[%s2771_s1 + $0x1a8] sm:$0xff]   ;;  %v1976_v63 = vcombine.low %v2565_v31, %v2568_v32  ;;  %v2425_v31 = vld [vmem:[%s2505_s10 + $0x38] sm:$0xff]   ;;  %v1537_v32 = vshrl.u32 %v2430_v60, 16 }
  0x3d   : > { %2223 = vmatpush3.bf16.msra.mxu0 %v2382_v58  ;;  %2243 = vmatpush3.bf16.msra.mxu1 %v2383_v59  ;;  %v2413_v58 = vld [vmem:[%s2771_s1 + $0x128] sm:$0xff]   ;;  %v2414_v59 = vld [vmem:[%s2771_s1 + $0x158] sm:$0xff]  }
  0x3e   : > { %2224 = vmatprep.subr.bf16.mxu0 %v2384_v0  ;;  %2244 = vmatprep.subr.bf16.mxu1 %v2385_v1 }
  0x3f   : > { %2198 = vmatprep.mubr.msk.bf16.mxu0 %vm293_vm0, %v569_v2  ;;  %2218 = vmatprep.mubr.msk.bf16.mxu1 %vm293_vm0, %v2389_v5  ;;  %v2419_v2 = vld [vmem:[%s2505_s10 + $0x30] sm:$0xff]   ;;  %v2421_v5 = vld [vmem:[%s2771_s1 + $0x1a0] sm:$0xff]  }
  0x41   : > { %2225 = vmatpush3.bf16.msra.mxu0 %v2384_v0  ;;  %2245 = vmatpush3.bf16.msra.mxu1 %v2385_v1  ;;  %v2431_v0 = vld [vmem:[%s2505_s10 + $0xc] sm:$0xff]   ;;  %v1539_v1 = vshll.u32 %v2430_v60, 16 }
  0x42   : > { %2226 = vmatprep.subr.bf16.mxu0 %v2387_v4  ;;  %2246 = vmatprep.subr.bf16.mxu1 %v2388_v6  ;;  %v1544_v8 = vshll.u32 %v2431_v0, 16 }
  0x43   : > { %v1541_v7 = vrot.slane %v1539_v1, 1 }
  0x44   : > { %2199 = vmatmul.mubr.msk.bf16.gmra.mxu0 %vm293_vm0, %v572_v9  ;;  %2219 = vmatmul.mubr.msk.bf16.gmra.mxu1 %vm293_vm0, %v2390_v10  ;;  %v1556_v10 = vshrl.u32 %v2432_v61, 16  ;;  %v1546_v13 = vrot.slane %v1544_v8, 1 }
  0x45   : > { %2227 = vmatpush3.bf16.msra.mxu0 %v2387_v4  ;;  %2247 = vmatpush3.bf16.msra.mxu1 %v2388_v6  ;;  %v1552_v4 = vshll.u32 %v2432_v61, 16  ;;  %v1977_v6 = vcombine.low %v2572_v34, %v2593_v50  ;;  %v2424_v34 = vld [vmem:[%s2771_s1 + $0x198] sm:$0xff]   ;;  %v1542_v12 = vor.u32 %v1541_v7, %v1537_v32 }
  0x46   : > { %2228 = vmatprep.subr.bf16.mxu0 %v2391_v14  ;;  %2248 = vmatprep.subr.bf16.mxu1 %v2392_v15  ;;  %v2423_v50 = vld [vmem:[%s2505_s10 + $0x1c] ss:$0 sps:$4 sm:$0xff]  }
  0x47   : > { %2234 = vmatprep.mubr.msk.bf16.mxu0 %vm293_vm0, %v2397_v16  ;;  %2254 = vmatprep.mubr.msk.bf16.mxu1 %vm293_vm0, %v1060_v23  ;;  %v1554_v9 = vrot.slane %v1552_v4, 1  ;;  %v1562_v16 = vrot.slane %v1560_v11, 1  ;;  %v1547_v18 = vsel %vm541_vm1, %v1542_v12, %v1546_v13 }
  0x49   : > { %2229 = vmatpush3.bf16.msra.mxu0 %v2391_v14  ;;  %2249 = vmatpush3.bf16.msra.mxu1 %v2392_v15  ;;  %v2426_v14 = vld [vmem:[%s2505_s10 + $0x40] ss:$0 sps:$4 sm:$0xff]   ;;  %v1558_v15 = vor.u32 %v1556_v10, %v1554_v9 }
  0x4a   : > { %2230 = vmatprep.subr.bf16.mxu0 %v2393_v21  ;;  %2250 = vmatprep.subr.bf16.mxu1 %v2394_v22 }
  0x4b   : > { %v1563_v19 = vsel %vm541_vm1, %v1558_v15, %v1562_v16 }
  0x4d   : > { %2231 = vmatpush3.bf16.msra.mxu0 %v2393_v21  ;;  %2251 = vmatpush3.bf16.msra.mxu1 %v2394_v22  ;;  %v1548_v21 = vshrl.u32 %v2431_v0, 16  ;;  %v2429_v22 = vld [vmem:[%s2771_s1 + $0x180] sm:$0xff]  }
  0x4e   : > { %2232 = vmatprep.subr.bf16.mxu0 %v2395_v24  ;;  %2252 = vmatprep.subr.bf16.mxu1 %v2396_v26 }
  0x4f   : > { %v1550_v23 = vor.u32 %v1548_v21, %v1546_v13 }
  0x51   : > { %2233 = vmatpush3.bf16.msra.mxu0 %v2395_v24  ;;  %2253 = vmatpush3.bf16.msra.mxu1 %v2396_v26  ;;  %v1564_v24 = vshrl.u32 %v2433_v3, 16  ;;  %v1555_v26 = vsel %vm541_vm1, %v1550_v23, %v1554_v9 }
  0x52   : > { %2262 = vmatprep.subr.bf16.mxu0 %v2402_v35  ;;  %2282 = vmatprep.subr.bf16.mxu1 %v2403_v39 }
  0x53   : > { %v1566_v25 = vor.u32 %v1564_v24, %v1562_v16 }
  0x54   : > { %2235 = vmatmul.mubr.msk.bf16.vlgmr.msra.gmra.mxu0 %vm293_vm0, %v2400_v40  ;;  %2255 = vmatmul.mubr.msk.bf16.vlgmr.msra.gmra.mxu1 %vm293_vm0, %v1068_v44 }
  0x55   : > { %2263 = vmatpush3.bf16.msra.mxu0 %v2402_v35  ;;  %2283 = vmatpush3.bf16.msra.mxu1 %v2403_v39 }
  0x56   : > { %2264 = vmatprep.subr.bf16.mxu0 %v2404_v41  ;;  %2284 = vmatprep.subr.bf16.mxu1 %v2405_v45 }
  0x57   : > { %2238 = vmatprep.mubr.msk.bf16.mxu0 %vm293_vm0, %v2406_v46  ;;  %2258 = vmatprep.mubr.msk.bf16.mxu1 %vm293_vm0, %v1076_v47 }
  0x59   : > { %2265 = vmatpush3.bf16.msra.mxu0 %v2404_v41  ;;  %2285 = vmatpush3.bf16.msra.mxu1 %v2405_v45 }
  0x5a   : > { %2266 = vmatprep.subr.bf16.mxu0 %v2408_v49  ;;  %2286 = vmatprep.subr.bf16.mxu1 %v2409_v51 }
  0x5c   : > { %2239 = vmatmul.mubr.msk.bf16.gmra.mxu0 %vm293_vm0, %v2407_v52  ;;  %2259 = vmatmul.mubr.msk.bf16.gmra.mxu1 %vm293_vm0, %v1079_v53 }
  0x5d   : > { %2267 = vmatpush3.bf16.msra.mxu0 %v2408_v49  ;;  %2287 = vmatpush3.bf16.msra.mxu1 %v2409_v51 }
  0x5e   : > { %2268 = vmatprep.subr.bf16.mxu0 %v2411_v54  ;;  %2288 = vmatprep.subr.bf16.mxu1 %v2412_v55 }
  0x5f   : > { %2274 = vmatprep.mubr.msk.bf16.mxu0 %vm293_vm0, %v1975_v56  ;;  %2294 = vmatprep.mubr.msk.bf16.mxu1 %vm293_vm0, %v2418_v57 }
  0x61   : > { %2269 = vmatpush3.bf16.msra.mxu0 %v2411_v54  ;;  %2289 = vmatpush3.bf16.msra.mxu1 %v2412_v55 }
  0x62   : > { %2270 = vmatprep.subr.bf16.mxu0 %v2413_v58  ;;  %2290 = vmatprep.subr.bf16.mxu1 %v2414_v59 }
  0x65   : > { %2271 = vmatpush3.bf16.msra.mxu0 %v2413_v58  ;;  %2291 = vmatpush3.bf16.msra.mxu1 %v2414_v59 }
  0x66   : > { %2272 = vmatprep.subr.bf16.mxu0 %v2415_v29  ;;  %2292 = vmatprep.subr.bf16.mxu1 %v2416_v30 }
  0x69   : > { %2273 = vmatpush3.bf16.msra.mxu0 %v2415_v29  ;;  %2293 = vmatpush3.bf16.msra.mxu1 %v2416_v30 }
  0x6a   : > { %2302 = vmatprep.subr.bf16.mxu0 %v2420_v62  ;;  %2322 = vmatprep.subr.bf16.mxu1 %v2420_v62 }
  0x6c   : > { %2275 = vmatmul.mubr.msk.bf16.vlgmr.msra.gmra.mxu0 %vm293_vm0, %v1976_v63  ;;  %2295 = vmatmul.mubr.msk.bf16.vlgmr.msra.gmra.mxu1 %vm293_vm0, %v2419_v2 }
  0x6d   : > { %2303 = vmatpush3.bf16.msra.mxu0 %v2420_v62  ;;  %2328 = vmatpush3.bf16.msra.mxu1 %v2420_v62 }
  0x6e   : > { %2304 = vmatprep.subr.bf16.mxu0 %v2421_v5  ;;  %2323 = vmatprep.subr.bf16.mxu1 %v2421_v5 }
  0x6f   : > { %2278 = vmatprep.mubr.msk.bf16.mxu0 %vm293_vm0, %v1977_v6  ;;  %2298 = vmatprep.mubr.msk.bf16.mxu1 %vm293_vm0, %v2425_v31 }
  0x71   : > { %2305 = vmatpush3.bf16.msra.mxu0 %v2421_v5  ;;  %2329 = vmatpush3.bf16.msra.mxu1 %v2421_v5 }
  0x72   : > { %2306 = vmatprep.subr.bf16.mxu0 %v2424_v34  ;;  %2324 = vmatprep.subr.bf16.mxu1 %v2424_v34 }
  0x74   : > { %2279 = vmatmul.mubr.msk.bf16.gmra.mxu0 %vm293_vm0, %v2423_v50  ;;  %2299 = vmatmul.mubr.msk.bf16.gmra.mxu1 %vm293_vm0, %v2426_v14 }
  0x75   : > { %2307 = vmatpush3.bf16.msra.mxu0 %v2424_v34  ;;  %2330 = vmatpush3.bf16.msra.mxu1 %v2424_v34 }
  0x76   : > { %2308 = vmatprep.subr.bf16.mxu0 %v2427_v17  ;;  %2325 = vmatprep.subr.bf16.mxu1 %v2427_v17 }
  0x77   : > { %2314 = vmatprep.mubr.msk.bf16.mxu0 %vm293_vm0, %v1547_v18  ;;  %2318 = vmatprep.mubr.msk.bf16.mxu1 %vm293_vm0, %v1563_v19 }
  0x79   : > { %2309 = vmatpush3.bf16.msra.mxu0 %v2427_v17  ;;  %2331 = vmatpush3.bf16.msra.mxu1 %v2427_v17 }
  0x7a   : > { %2310 = vmatprep.subr.bf16.mxu0 %v2428_v20  ;;  %2326 = vmatprep.subr.bf16.mxu1 %v2428_v20 }
  0x7d   : > { %2311 = vmatpush3.bf16.msra.mxu0 %v2428_v20  ;;  %2332 = vmatpush3.bf16.msra.mxu1 %v2428_v20 }
  0x7e   : > { %2312 = vmatprep.subr.bf16.mxu0 %v2429_v22  ;;  %2327 = vmatprep.subr.bf16.mxu1 %v2429_v22 }
  0x81   : > { %2313 = vmatpush3.bf16.msra.mxu0 %v2429_v22  ;;  %2333 = vmatpush3.bf16.msra.mxu1 %v2429_v22 }
  0x84   : > { %2315 = vmatmul.mubr.msk.bf16.vlgmr.msra.gmra.mxu0 %vm293_vm0, %v1555_v26  ;;  %2319 = vmatmul.mubr.msk.bf16.vlgmr.msra.gmra.mxu1 %vm293_vm0, %v1566_v25 }
  0xe4   : > { %v2156_v27 = vpop.f32.mrf.mxu0  ;;  %v2176_v28 = vpop.f32.mrf.mxu1 }
  0xe5   : > { %v479_v33 = vadd.f32 %v2176_v28, %v2156_v27 }
  0xe6   : > { %v340_v35 = vpop.f32.mrf.mxu0  ;;  %v470_v36 = vpop.f32.mrf.mxu1 }
  0xe7   : > { %v471_v37 = vadd.f32 %v470_v36, %v340_v35 }
  0xe8   : > { %v2157_v38 = vpop.f32.mrf.mxu0  ;;  %v2177_v39 = vpop.f32.mrf.mxu1 }
  0xe9   : > { %v2751_v40 = vadd.f32 %v2177_v39, %v2157_v38 }
  0xea   : > { %v343_v41 = vpop.f32.mrf.mxu0  ;;  %v473_v42 = vpop.f32.mrf.mxu1 }
  0xeb   : > { %v2753_v43 = vadd.f32 %v473_v42, %v343_v41 }
  0xec   : > { %v2160_v44 = vpop.f32.mrf.mxu0  ;;  %v2180_v45 = vpop.f32.mrf.mxu1 }
  0xed   : > { %v495_v46 = vadd.f32 %v2180_v45, %v2160_v44 }
  0xee   : > { %v356_v47 = vpop.f32.mrf.mxu0  ;;  %v486_v48 = vpop.f32.mrf.mxu1 }
  0xef   : > { %v487_v49 = vadd.f32 %v486_v48, %v356_v47 }
  0xf0   : > { %v2161_v51 = vpop.f32.mrf.mxu0  ;;  %v2181_v52 = vpop.f32.mrf.mxu1 }
  0xf2   : > { %v359_v53 = vpop.f32.mrf.mxu0  ;;  %v489_v54 = vpop.f32.mrf.mxu1 }
  0xf3   : > { %v490_v55 = vadd.f32 %v489_v54, %v359_v53 }
  0xfc   : > { %v2196_v56 = vpop.f32.mrf.mxu0  ;;  %v2216_v57 = vpop.f32.mrf.mxu1 }
  0xfd   : > { %v687_v25 = vadd.f32 %v2196_v56, %v479_v33 }
  0xfe   : > { %v655_v58 = vpop.f32.mrf.mxu0  ;;  %v813_v59 = vpop.f32.mrf.mxu1 }
  0xff   : > { %v685_v35 = vadd.f32 %v655_v58, %v471_v37  ;;  %v845_v41 = vadd.f32 %v2216_v57, %v687_v25 }
 0x100   : > { %v2197_v29 = vpop.f32.mrf.mxu0  ;;  %v2217_v30 = vpop.f32.mrf.mxu1 }
 0x101   : > { %v688_v42 = vadd.f32 %v2197_v29, %v2751_v40  ;;  %v843_v48 = vadd.f32 %v813_v59, %v685_v35 }
 0x102   : > { %v658_v60 = vpop.f32.mrf.mxu0  ;;  %v816_v61 = vpop.f32.mrf.mxu1 }
 0x103   : > { %v686_v51 = vadd.f32 %v658_v60, %v2753_v43 }
 0x104   : > { %v2200_v62 = vpop.f32.mrf.mxu0  ;;  %v2220_v63 = vpop.f32.mrf.mxu1 }
 0x105   : > { %v691_v27 = vadd.f32 %v2200_v62, %v495_v46  ;;  %v846_v46 = vadd.f32 %v2217_v30, %v688_v42  ;;  %v844_v58 = vadd.f32 %v816_v61, %v686_v51 }
 0x106   : > { %v671_v0 = vpop.f32.mrf.mxu0  ;;  %v829_v1 = vpop.f32.mrf.mxu1 }
 0x107   : > { %v689_v38 = vadd.f32 %v671_v0, %v487_v49  ;;  %v849_v45 = vadd.f32 %v2220_v63, %v691_v27 }
 0x108   : > { %v2201_v2 = vpop.f32.mrf.mxu0  ;;  %v2221_v3 = vpop.f32.mrf.mxu1 }
 0x109   : > { %v847_v54 = vadd.f32 %v829_v1, %v689_v38 }
 0x10a   : > { %v674_v4 = vpop.f32.mrf.mxu0  ;;  %v832_v5 = vpop.f32.mrf.mxu1 }
 0x10b   : > { %v690_v33 = vadd.f32 %v674_v4, %v490_v55 }
 0x10d   : > { %v848_v57 = vadd.f32 %v832_v5, %v690_v33  ;;  %v2048_v5 = vld [vmem:[%s2772_s2] ss:$0 sm:$0xff] }
 0x114   : > { %v2236_v6 = vpop.f32.mrf.mxu0  ;;  %v2256_v31 = vpop.f32.mrf.mxu1 }
 0x115   : > { %v1003_v52 = vadd.f32 %v2236_v6, %v845_v41 }
 0x116   : > { %v971_v32 = vpop.f32.mrf.mxu0  ;;  %v1162_v7 = vpop.f32.mrf.mxu1 }
 0x117   : > { %v1001_v62 = vadd.f32 %v971_v32, %v843_v48  ;;  %v1194_v49 = vadd.f32 %v2256_v31, %v1003_v52 }
 0x118   : > { %v2237_v8 = vpop.f32.mrf.mxu0  ;;  %v2257_v9 = vpop.f32.mrf.mxu1 }
 0x119   : > { %v1004_v0 = vadd.f32 %v2237_v8, %v846_v46  ;;  %v1192_v40 = vadd.f32 %v1162_v7, %v1001_v62 }
 0x11a   : > { %v974_v10 = vpop.f32.mrf.mxu0  ;;  %v1165_v11 = vpop.f32.mrf.mxu1 }
 0x11b   : > { %v1002_v29 = vadd.f32 %v974_v10, %v844_v58  ;;  %v1195_v43 = vadd.f32 %v2257_v9, %v1004_v0 }
 0x11c   : > { %v2240_v34 = vpop.f32.mrf.mxu0  ;;  %v2260_v50 = vpop.f32.mrf.mxu1 }
 0x11d   : > { %v1007_v56 = vadd.f32 %v2240_v34, %v849_v45  ;;  %v1193_v1 = vadd.f32 %v1165_v11, %v1002_v29  ;;  %v2049_v11 = vld [vmem:[%s2773_s3] ss:$0 sm:$0xff] }
 0x11e   : > { %v987_v12 = vpop.f32.mrf.mxu0  ;;  %v1178_v13 = vpop.f32.mrf.mxu1 }
 0x11f   : > { %v1005_v37 = vadd.f32 %v987_v12, %v847_v54  ;;  %v1198_v2 = vadd.f32 %v2260_v50, %v1007_v56 }
 0x120   : > { %v2241_v14 = vpop.f32.mrf.mxu0  ;;  %v2261_v15 = vpop.f32.mrf.mxu1 }
 0x121   : > { %v1196_v3 = vadd.f32 %v1178_v13, %v1005_v37 }
 0x122   : > { %v990_v16 = vpop.f32.mrf.mxu0  ;;  %v1181_v17 = vpop.f32.mrf.mxu1 }
 0x123   : > { %v1006_v59 = vadd.f32 %v990_v16, %v848_v57 }
 0x125   : > { %v1197_v61 = vadd.f32 %v1181_v17, %v1006_v59 }
 0x12c   : > { %v2276_v18 = vpop.f32.mrf.mxu0  ;;  %v2296_v19 = vpop.f32.mrf.mxu1 }
 0x12d   : > { %v1333_v63 = vadd.f32 %v2276_v18, %v1194_v49 }
 0x12e   : > { %v1301_v20 = vpop.f32.mrf.mxu0  ;;  %v1458_v21 = vpop.f32.mrf.mxu1 }
 0x12f   : > { %v1331_v60 = vadd.f32 %v1301_v20, %v1192_v40  ;;  %v1490_v30 = vadd.f32 %v2296_v19, %v1333_v63 }
 0x130   : > { %v2277_v22 = vpop.f32.mrf.mxu0  ;;  %v2297_v23 = vpop.f32.mrf.mxu1 }
 0x131   : > { %v1334_v4 = vadd.f32 %v2277_v22, %v1195_v43  ;;  %v1488_v7 = vadd.f32 %v1458_v21, %v1331_v60 }
 0x132   : > { %v1304_v24 = vpop.f32.mrf.mxu0  ;;  %v1461_v26 = vpop.f32.mrf.mxu1 }
 0x133   : > { %v1332_v10 = vadd.f32 %v1304_v24, %v1193_v1  ;;  %v1491_v16 = vadd.f32 %v2297_v23, %v1334_v4 }
 0x134   : > { %v2280_v28 = vpop.f32.mrf.mxu0  ;;  %v2300_v36 = vpop.f32.mrf.mxu1 }
 0x135   : > { %v1337_v14 = vadd.f32 %v2280_v28, %v1198_v2  ;;  %v1489_v21 = vadd.f32 %v1461_v26, %v1332_v10 }
 0x136   : > { %v1317_v39 = vpop.f32.mrf.mxu0  ;;  %v1474_v44 = vpop.f32.mrf.mxu1 }
 0x137   : > { %v1335_v6 = vadd.f32 %v1317_v39, %v1196_v3  ;;  %v1494_v31 = vadd.f32 %v2300_v36, %v1337_v14 }
 0x138   : > { %v2281_v47 = vpop.f32.mrf.mxu0  ;;  %v2301_v53 = vpop.f32.mrf.mxu1 }
 0x139   : > { %v1492_v9 = vadd.f32 %v1474_v44, %v1335_v6 }
 0x13a   : > { %v1320_v55 = vpop.f32.mrf.mxu0  ;;  %v1477_v32 = vpop.f32.mrf.mxu1 }
 0x13b   : > { %v1336_v12 = vadd.f32 %v1320_v55, %v1197_v61 }
 0x13d   : > { %v1493_v36 = vadd.f32 %v1477_v32, %v1336_v12 }
 0x144   : > { %v2316_v8 = vpop.f32.mrf.mxu0  ;;  %v2320_v50 = vpop.f32.mrf.mxu1 }
 0x145   : > { %v1681_v34 = vadd.f32 %v2316_v8, %v1490_v30  ;;  %v1685_v13 = vadd.f32 %v2320_v50, %v1494_v31 }
 0x146   : > { %v1649_v15 = vpop.f32.mrf.mxu0  ;;  %v1665_v19 = vpop.f32.mrf.mxu1 }
 0x147   : > { %v1695_v17 = vmul.f32 %v2048_v5, %v1681_v34  ;;  %v1679_v18 = vadd.f32 %v1649_v15, %v1488_v7  ;;  %v1699_v20 = vmul.f32 %v2048_v5, %v1685_v13  ;;  %v1683_v22 = vadd.f32 %v1665_v19, %v1492_v9 }
 0x148   : > { %v2317_v25 = vpop.f32.mrf.mxu0  ;;  %v2321_v35 = vpop.f32.mrf.mxu1 }
 0x149   : > { %v1709_v24 = vadd.f32 %v2049_v11, %v1695_v17  ;;  %v1693_v27 = vmul.f32 %v2048_v5, %v1679_v18  ;;  %v1682_v28 = vadd.f32 %v2317_v25, %v1491_v16  ;;  %v1713_v38 = vadd.f32 %v2049_v11, %v1699_v20 }
 0x14a   : > { %v1697_v39 = vmul.f32 %v2048_v5, %v1683_v22  ;;  %v1652_v41 = vpop.f32.mrf.mxu0  ;;  %v1668_v47 = vpop.f32.mrf.mxu1 }
 0x14b   : > { %v1716_v23 = vmax.f32 %v1709_v24, 0.0  ;;  %v1707_v42 = vadd.f32 %v2049_v11, %v1693_v27  ;;  %v1696_v44 = vmul.f32 %v2048_v5, %v1682_v28  ;;  %v1680_v45 = vadd.f32 %v1652_v41, %v1489_v21 }
 0x14c   : > { %v1720_v48 = vmax.f32 %v1713_v38, 0.0  ;;  %v1711_v51 = vadd.f32 %v2049_v11, %v1697_v39  ;;  %v1684_v26 = vadd.f32 %v1668_v47, %v1493_v36 }
 0x14d   : > { %1723 = vst [vmem:[%s197_s18 + $0x10] sm:$0xff] %v1716_v23  ;;  %v1714_v52 = vmax.f32 %v1707_v42, 0.0  ;;  %v1710_v53 = vadd.f32 %v2049_v11, %v1696_v44  ;;  %v1694_v54 = vmul.f32 %v2048_v5, %v1680_v45 }
 0x14e   : > { %1727 = vst [vmem:[%s197_s18 + $0x30] sm:$0xff] %v1720_v48  ;;  %v1718_v33 = vmax.f32 %v1711_v51, 0.0  ;;  %v1698_v56 = vmul.f32 %v2048_v5, %v1684_v26 }
 0x14f   : > { %1721 = vst [vmem:[%s197_s18] sm:$0xff] %v1714_v52  ;;  %v1717_v46 = vmax.f32 %v1710_v53, 0.0  ;;  %v1708_v62 = vadd.f32 %v2049_v11, %v1694_v54 }
 0x150   : > { %1725 = vst [vmem:[%s197_s18 + $0x20] sm:$0xff] %v1718_v33  ;;  %v1712_v37 = vadd.f32 %v2049_v11, %v1698_v56 }
 0x151   : > { %1724 = vst [vmem:[%s197_s18 + $0x18] sm:$0xff] %v1717_v46  ;;  %v1715_v58 = vmax.f32 %v1708_v62, 0.0 }
 0x152   : > { %v1719_v49 = vmax.f32 %v1712_v37, 0.0 }
 0x153   : > { %1722 = vst [vmem:[%s197_s18 + $0x8] sm:$0xff] %v1715_v58 }
 0x154   : > { %1726 = vst [vmem:[%s197_s18 + $0x28] sm:$0xff] %v1719_v49 }
 0x155 PF: > { %s14_s15 = sadd.s32 1, %s2440_s15  }
 0x156   : > { %p11_p4 = scmp.ge.s32.totalorder %s14_s15, 4  }
 0x158   :  { %13 = sbr.rel (!%p11_p4) target bundleno = 1 (0x1), region = 77 }

// kernel: inception_b_forward.6
= control target key start
LH: loop header
LB: loop body
LE: loop exit
PB: predicated region body
PF: predicated region fallthrough
CT: control target
= control target key end

     0   :  { %s5512_s15 = smov 0   ;;  %s6985_s0 = inlined_call_operand.vmem [shape: bf16[2,1,326,64], index: 0, kind: input, shape index: {}]   ;;  %s6986_s1 = inlined_call_operand.vmem [shape: bf16[9,64,128], index: 1, kind: input, shape index: {}]   ;;  %s6987_s2 = inlined_call_operand.vmem [shape: f32[1,128], index: 2, kind: input, shape index: {}]   ;;  %s6988_s3 = inlined_call_operand.vmem [shape: f32[1,128], index: 3, kind: input, shape index: {}]   ;;  %s6989_s4 = inlined_call_operand.vmem [shape: bf16[2,288,128], index: 4, kind: output, shape index: {}]  }
   0x1 LB: > { %s4255_s16 = sadd.s32 4294967295, %s5485_s15   ;;  %p4259_p0 = scmp.ge.s32.totalorder %s5485_s15, 1  ;;  %s5485_s15 = sphi %s5512_s15, %s14_s15  }
   0x2   : > { %p162_p1 = scmp.lt.s32.totalorder %s5485_s15, 3 }
   0x4   : > { %p163_p2 = pnand %p4259_p0, %p162_p1 }
   0x6   : > { %166 = sbr.rel (%p163_p2) target bundleno = 558 (0x22e), region = 36 }
   0xb   : > { %v5381_v0 = vld [vmem:[%s6986_s1 + $0x38] sm:$0xff]   ;;  %p188_p3 = scmp.lt.s32.totalorder %s4255_s16, 1  ;;  %v5382_v1 = vld [vmem:[%s6986_s1 + $0x30] sm:$0xff]   ;;  %v5383_v2 = vld [vmem:[%s6986_s1 + $0x28] sm:$0xff]   ;;  %vm346_vm0 = vsmask.f32 7424 }
   0xc   : > { %4967 = vmatprep.subr.bf16.mxu0 %v5381_v0  ;;  %5363 = vmatprep.subr.bf16.mxu1 %v5381_v0  ;;  %v5384_v3 = vld [vmem:[%s6986_s1 + $0x20] sm:$0xff]   ;;  %v5391_v14 = vld [vmem:[%s6986_s1 + $0x58] sm:$0xff]   ;;  %vm519_vm1 = vcmask 523264   ;;  %v5397_v48 = vld [vmem:[%s6986_s1 + $0x50] sm:$0xff]   ;;  %vm1001_vm2 = vcmask 1046528   ;;  %vm2285_vm3 = vcmask 1045504  }
   0xd   : > { %s7033_s16 = smov (!%p188_p3, %s4255_s16), 1  ;;  %4968 = vmatpush3.bf16.msra.mxu0 %v5381_v0  ;;  %5367 = vmatpush3.bf16.msra.mxu1 %v5381_v0  ;;  %v5392_v15 = vld [vmem:[%s6986_s1 + $0x18] sm:$0xff]   ;;  %v5398_v57 = vld [vmem:[%s6986_s1 + $0x10] sm:$0xff]   ;;  %vm1810_vm4 = vsmask.f32 6400  ;;  %vm3569_vm5 = vcmask 1044480  }
   0xe   : > { %4969 = vmatprep.subr.bf16.mxu0 %v5382_v1  ;;  %5364 = vmatprep.subr.bf16.mxu1 %v5382_v1  ;;  %s5371_s23 = smul.u32 164, %s7033_s16  ;;  %vm3094_vm6 = vsmask.f32 5376 }
   0xf   : > { %s5372_s26 = smul.u32 144, %s7033_s16 }
  0x10   : > { %s5538_s28 = scalar_lea.vmem %s6985_s0, %s5371_s23 }
  0x11   : > { %4970 = vmatpush3.bf16.msra.mxu0 %v5382_v1  ;;  %5368 = vmatpush3.bf16.msra.mxu1 %v5382_v1  ;;  %v199_v4 = vld [vmem:[%s5538_s28] sm:$0xf]  ;;  %v5542_v5 = vld [vmem:[%s5538_s28 + $0x4] sm:$0xf]  ;;  %v5548_v7 = vld [vmem:[%s5538_s28 + $0x8] sm:$0xff]   ;;  %s6868_s29 = scalar_lea.vmem %s6989_s4, %s5372_s26 }
  0x12   : > { %4971 = vmatprep.subr.bf16.mxu0 %v5383_v2  ;;  %5365 = vmatprep.subr.bf16.mxu1 %v5383_v2  ;;  %v5545_v6 = vcombine.low %v199_v4, %v5542_v5  ;;  %v355_v10 = vshll.u32 %v5548_v7, 16  ;;  %v359_v11 = vshrl.u32 %v5548_v7, 16  ;;  %v5555_v12 = vld [vmem:[%s5538_s28 + $0x50] sm:$0xff]   ;;  %v5558_v13 = vld [vmem:[%s5538_s28 + $0x58] sm:$0xff]   ;;  %v5575_v24 = vld [vmem:[%s5538_s28 + $0x60] sm:$0xff]  }
  0x13   : > { %v5567_v16 = vld [vmem:[%s5538_s28 + $0x10] sm:$0xff]   ;;  %v427_v19 = vshll.u32 %v5555_v12, 16  ;;  %v431_v20 = vshrl.u32 %v5555_v12, 16  ;;  %v435_v21 = vshll.u32 %v5558_v13, 16  ;;  %v439_v22 = vshrl.u32 %v5558_v13, 16  ;;  %v5580_v28 = vld [vmem:[%s5538_s28 + $0x18] sm:$0xff]  }
  0x14   : > { %v348_v8 = vshrl.u32 %v5545_v6, 16  ;;  %v350_v9 = vshll.u32 %v5545_v6, 16  ;;  %v357_v18 = vrot.slane %v355_v10, 1  ;;  %v363_v23 = vshll.u32 %v5567_v16, 16  ;;  %v5588_v36 = vld [vmem:[%s5538_s28 + $0x68] sm:$0xff]   ;;  %v5592_v38 = vld [vmem:[%s5538_s28 + $0x20] sm:$0xff]  }
  0x15   : > { %4972 = vmatpush3.bf16.msra.mxu0 %v5383_v2  ;;  %5369 = vmatpush3.bf16.msra.mxu1 %v5383_v2  ;;  %v5577_v27 = vrot.slane %v427_v19, 1  ;;  %v437_v29 = vrot.slane %v435_v21, 1  ;;  %v443_v31 = vshll.u32 %v5575_v24, 16  ;;  %v367_v32 = vshrl.u32 %v5567_v16, 16  ;;  %v5597_v43 = vld [vmem:[%s5538_s28 + $0x70] sm:$0xff]   ;;  %v5617_v58 = vld [vmem:[%s5538_s28 + $0x28] sm:$0xff]  }
  0x16   : > { %4973 = vmatprep.subr.bf16.mxu0 %v5384_v3  ;;  %5366 = vmatprep.subr.bf16.mxu1 %v5384_v3  ;;  %v352_v17 = vrot.slane %v350_v9, 1  ;;  %v361_v26 = vor.u32 %v359_v11, %v357_v18  ;;  %v365_v30 = vrot.slane %v363_v23, 1  ;;  %v371_v35 = vshll.u32 %v5580_v28, 16  ;;  %v5630_v9 = vld [vmem:[%s5538_s28 + $0x30] sm:$0xff]   ;;  %v5634_v11 = vld [vmem:[%s5538_s28 + $0x80] sm:$0xff]   ;;  %v5404_v23 = vld [vmem:[%s6986_s1 + $0x8] sm:$0xff]  }
  0x17   : > { %v433_v34 = vor.u32 %v431_v20, %v5577_v27  ;;  %v447_v37 = vshrl.u32 %v5575_v24, 16  ;;  %v441_v39 = vor.u32 %v439_v22, %v437_v29  ;;  %v445_v41 = vrot.slane %v443_v31, 1  ;;  %v5403_v22 = vld [vmem:[%s6986_s1 + $0x48] sm:$0xff]  }
  0x18   : > { %v353_v25 = vor.u32 %v352_v17, %v348_v8  ;;  %v366_v40 = vsel %vm346_vm0, %v361_v26, %v365_v30  ;;  %v369_v42 = vor.u32 %v367_v32, %v365_v30  ;;  %v373_v45 = vrot.slane %v371_v35, 1 }
  0x19   : > { %4974 = vmatpush3.bf16.msra.mxu0 %v5384_v3  ;;  %5370 = vmatpush3.bf16.msra.mxu1 %v5384_v3  ;;  %v438_v44 = vsel %vm346_vm0, %v433_v34, %v437_v29  ;;  %v451_v46 = vshll.u32 %v5588_v36, 16  ;;  %v375_v47 = vshrl.u32 %v5580_v28, 16  ;;  %v446_v49 = vsel %vm346_vm0, %v441_v39, %v445_v41  ;;  %v5626_v3 = vld [vmem:[%s5538_s28 + $0x78] sm:$0xff]  }
  0x1a   : > { %v358_v33 = vsel %vm346_vm0, %v353_v25, %v357_v18  ;;  %5055 = vmatprep.subr.bf16.mxu0 %v5391_v14  ;;  %5011 = vmatprep.subr.bf16.mxu1 %v5392_v15  ;;  %v449_v50 = vor.u32 %v447_v37, %v445_v41  ;;  %v379_v51 = vshll.u32 %v5592_v38, 16  ;;  %v455_v52 = vshrl.u32 %v5588_v36, 16  ;;  %v5651_v29 = vld [vmem:[%s5538_s28 + $0x38] sm:$0xff]   ;;  %v5659_v37 = vld [vmem:[%s5538_s28 + $0x88] sm:$0xff]  }
  0x1b   : > { %4975 = vmatprep.mubr.msk.bf16.mxu0 %vm519_vm1, %v358_v33  ;;  %4995 = vmatprep.mubr.msk.bf16.mxu1 %vm519_vm1, %v438_v44  ;;  %v374_v53 = vsel %vm346_vm0, %v369_v42, %v373_v45  ;;  %v453_v54 = vrot.slane %v451_v46, 1  ;;  %v377_v55 = vor.u32 %v375_v47, %v373_v45  ;;  %v459_v56 = vshll.u32 %v5597_v43, 16  ;;  %v5664_v44 = vld [vmem:[%s5538_s28 + $0x40] sm:$0xff]  }
  0x1c   : > { %4976 = vmatmul.mubr.msk.bf16.vlgmr.msra.gmra.mxu0 %vm519_vm1, %v366_v40  ;;  %4996 = vmatmul.mubr.msk.bf16.vlgmr.msra.gmra.mxu1 %vm519_vm1, %v446_v49  ;;  %v381_v59 = vrot.slane %v379_v51, 1  ;;  %v383_v60 = vshrl.u32 %v5592_v38, 16  ;;  %v387_v0 = vshll.u32 %v5617_v58, 16  ;;  %v463_v4 = vshrl.u32 %v5597_v43, 16  ;;  %v5409_v46 = vld [vmem:[%s6986_s1] sm:$0xff]  }
  0x1d   : > { %5056 = vmatpush3.bf16.msra.mxu0 %v5391_v14  ;;  %4979 = vmatprep.mubr.msk.bf16.mxu0 %vm519_vm1, %v374_v53  ;;  %v454_v61 = vsel %vm346_vm0, %v449_v50, %v453_v54  ;;  %v457_v62 = vor.u32 %v455_v52, %v453_v54  ;;  %v461_v63 = vrot.slane %v459_v56, 1  ;;  %v391_v10 = vshrl.u32 %v5617_v58, 16  ;;  %v5408_v49 = vld [vmem:[%s5538_s28 + $0x90] ss:$0 sps:$4 sm:$0x11]   ;;  %v5410_v51 = vld [vmem:[%s6986_s1 + $0x40] sm:$0xff]  }
  0x1e   : > { %5057 = vmatprep.subr.bf16.mxu0 %v5397_v48  ;;  %5012 = vmatpush3.bf16.msra.mxu1 %v5392_v15  ;;  %v382_v1 = vsel %vm346_vm0, %v377_v55, %v381_v59  ;;  %v385_v2 = vor.u32 %v383_v60, %v381_v59  ;;  %v389_v8 = vrot.slane %v387_v0, 1  ;;  %v467_v17 = vshll.u32 %v5626_v3, 16  ;;  %v5680_v55 = vld [vmem:[%s5538_s28 + $0x48] sm:$0xff]  }
  0x1f   : > { %5013 = vmatprep.subr.bf16.mxu1 %v5398_v57  ;;  %4999 = vmatprep.mubr.msk.bf16.mxu1 %vm519_vm1, %v454_v61  ;;  %v462_v14 = vsel %vm346_vm0, %v457_v62, %v461_v63  ;;  %v465_v15 = vor.u32 %v463_v4, %v461_v63  ;;  %v471_v18 = vshrl.u32 %v5626_v3, 16  ;;  %v395_v20 = vshll.u32 %v5630_v9, 16  ;;  %v5412_v4 = vld [vmem:[%s6986_s1 + $0x78] sm:$0xff]  }
  0x20   : > { %v390_v19 = vsel %vm346_vm0, %v385_v2, %v389_v8  ;;  %v475_v21 = vshll.u32 %v5634_v11, 16  ;;  %v469_v25 = vrot.slane %v467_v17, 1  ;;  %v393_v26 = vor.u32 %v391_v10, %v389_v8  ;;  %v988_v8 = vld [vmem:[%s5538_s28] sm:$0xe]  ;;  %v5414_v10 = vld [vmem:[%s6986_s1 + $0x98] sm:$0xff]  }
  0x21   : > { %5058 = vmatpush3.bf16.msra.mxu0 %v5397_v48  ;;  %v397_v30 = vrot.slane %v395_v20, 1  ;;  %v399_v34 = vshrl.u32 %v5630_v9, 16  ;;  %v403_v35 = vshll.u32 %v5651_v29, 16  ;;  %v479_v39 = vshrl.u32 %v5634_v11, 16 }
  0x22   : > { %5014 = vmatpush3.bf16.msra.mxu1 %v5398_v57  ;;  %v477_v31 = vrot.slane %v475_v21, 1  ;;  %5059 = vmatprep.subr.bf16.mxu0 %v5403_v22  ;;  %v470_v32 = vsel %vm346_vm0, %v465_v15, %v469_v25  ;;  %v473_v33 = vor.u32 %v471_v18, %v469_v25  ;;  %v407_v45 = vshrl.u32 %v5651_v29, 16 }
  0x23   : > { %5015 = vmatprep.subr.bf16.mxu1 %v5404_v23  ;;  %v398_v40 = vsel %vm346_vm0, %v393_v26, %v397_v30  ;;  %v401_v41 = vor.u32 %v399_v34, %v397_v30  ;;  %v405_v42 = vrot.slane %v403_v35, 1  ;;  %v483_v48 = vshll.u32 %v5659_v37, 16 }
  0x24   : > { %4980 = vmatmul.mubr.msk.bf16.gmra.mxu0 %vm519_vm1, %v382_v1  ;;  %5000 = vmatmul.mubr.msk.bf16.gmra.mxu1 %vm519_vm1, %v462_v14  ;;  %v481_v47 = vor.u32 %v479_v39, %v477_v31  ;;  %v487_v50 = vshrl.u32 %v5659_v37, 16  ;;  %v478_v52 = vsel %vm346_vm0, %v473_v33, %v477_v31  ;;  %v411_v54 = vshll.u32 %v5664_v44, 16  ;;  %v5415_v31 = vld [vmem:[%s6986_s1 + $0x70] sm:$0xff]   ;;  %v5417_v33 = vld [vmem:[%s6986_s1 + $0x68] sm:$0xff]  }
  0x25   : > { %4983 = vmatprep.mubr.msk.bf16.mxu0 %vm519_vm1, %v390_v19  ;;  %5060 = vmatpush3.bf16.msra.mxu0 %v5403_v22  ;;  %v406_v53 = vsel %vm346_vm0, %v401_v41, %v405_v42  ;;  %v485_v56 = vrot.slane %v483_v48, 1  ;;  %v491_v57 = vshll.u32 %v5408_v49, 16  ;;  %v409_v59 = vor.u32 %v407_v45, %v405_v42  ;;  %v5416_v39 = vld [vmem:[%s6986_s1 + $0x90] sm:$0xff]   ;;  %v5418_v41 = vld [vmem:[%s6986_s1 + $0x88] sm:$0xff]   ;;  %v5752_v42 = vld [vmem:[%s6986_s1 + $0xb8] sm:$0xff]  }
  0x26   : > { %5003 = vmatprep.mubr.msk.bf16.mxu1 %vm519_vm1, %v470_v32  ;;  %5016 = vmatpush3.bf16.msra.mxu1 %v5404_v23  ;;  %v413_v60 = vrot.slane %v411_v54, 1  ;;  %v415_v61 = vshrl.u32 %v5664_v44, 16  ;;  %v419_v63 = vshll.u32 %v5680_v55, 16  ;;  %v423_v17 = vshrl.u32 %v5680_v55, 16  ;;  %v5769_v48 = vld [vmem:[%s6986_s1 + $0xd8] sm:$0xff]  }
  0x27   : > { %5017 = vmatprep.subr.bf16.mxu1 %v5409_v46  ;;  %5061 = vmatprep.subr.bf16.mxu0 %v5410_v51  ;;  %v486_v62 = vsel %vm346_vm0, %v481_v47, %v485_v56  ;;  %v489_v0 = vor.u32 %v487_v50, %v485_v56  ;;  %v493_v1 = vrot.slane %v491_v57, 1  ;;  %v4341_v19 = vcombine.low %v988_v8, %v5542_v5  ;;  %v2272_v54 = vld [vmem:[%s5538_s28 + $0x8] sm:$0xc]  ;;  %v5797_v56 = vld [vmem:[%s5538_s28 + $0x10] sm:$0xff]  }
  0x28   : > { %v417_v2 = vor.u32 %v415_v61, %v413_v60  ;;  %v421_v14 = vrot.slane %v419_v63, 1  ;;  %v414_v15 = vsel %vm346_vm0, %v409_v59, %v413_v60  ;;  %v1003_v23 = vrot.slane %v5548_v7, 1  ;;  %v5801_v60 = vld [vmem:[%s5538_s28 + $0x18] sm:$0xff]   ;;  %v5804_v61 = vld [vmem:[%s5538_s28 + $0x20] sm:$0xff]   ;;  %v5809_v63 = vld [vmem:[%s5538_s28 + $0x28] sm:$0xff]  }
  0x29   : > { %5062 = vmatpush3.bf16.msra.mxu0 %v5410_v51  ;;  %v494_v20 = vsel %vm346_vm0, %v489_v0, %v493_v1  ;;  %v1002_v22 = vrot.slane %v4341_v19, 1  ;;  %v1035_v5 = vrot.slane %v5659_v37, 1  ;;  %v1037_v30 = vrot.slane %v5408_v49, 1  ;;  %v5838_v19 = vld [vmem:[%s5538_s28 + $0x40] sm:$0xff]  }
  0x2a   : > { %5018 = vmatpush3.bf16.msra.mxu1 %v5409_v46  ;;  %5143 = vmatprep.subr.bf16.mxu0 %v5414_v10  ;;  %v422_v18 = vsel %vm346_vm0, %v417_v2, %v421_v14  ;;  %v425_v21 = vor.u32 %v423_v17, %v421_v14  ;;  %v1005_v32 = vrot.slane %v5567_v16, 1  ;;  %v5420_v46 = vld [vmem:[%s6986_s1 + $0x80] sm:$0xff]   ;;  %v1015_v47 = vrot.slane %v5651_v29, 1  ;;  %v5815_v2 = vld [vmem:[%s5538_s28 + $0x30] sm:$0xff]  }
  0x2b   : > { %5099 = vmatprep.subr.bf16.mxu1 %v5412_v4  ;;  %v1004_v26 = vsel %vm1001_vm2, %v1002_v22, %v1003_v23  ;;  %v2289_v0 = vrot.slane %v5801_v60, 2  ;;  %v2291_v1 = vrot.slane %v5804_v61, 2  ;;  %v1025_v8 = vrot.slane %v5575_v24, 1 }
  0x2c   : > { %4984 = vmatmul.mubr.msk.bf16.gmra.mxu0 %vm519_vm1, %v398_v40  ;;  %5004 = vmatmul.mubr.msk.bf16.gmra.mxu1 %vm519_vm1, %v478_v52  ;;  %v430_v25 = vsel %vm346_vm0, %v425_v21, %v5577_v27  ;;  %v1007_v27 = vrot.slane %v5580_v28, 1  ;;  %v1006_v34 = vsel %vm1001_vm2, %v1003_v23, %v1005_v32  ;;  %v1011_v40 = vrot.slane %v5617_v58, 1 }
  0x2d   : > { %4987 = vmatprep.mubr.msk.bf16.mxu0 %vm519_vm1, %v406_v53  ;;  %5007 = vmatprep.mubr.msk.bf16.mxu1 %vm519_vm1, %v486_v62  ;;  %v1021_v53 = vrot.slane %v5555_v12, 1  ;;  %v1027_v17 = vrot.slane %v5588_v36, 1  ;;  %v2295_v21 = vrot.slane %v5815_v2, 2 }
  0x2e   : > { %v1008_v35 = vsel %vm1001_vm2, %v1005_v32, %v1007_v27  ;;  %v2299_v32 = vrot.slane %v5838_v19, 2 }
  0x34   : > { %4988 = vmatmul.mubr.msk.bf16.gmra.mxu0 %vm519_vm1, %v414_v15  ;;  %5008 = vmatmul.mubr.msk.bf16.gmra.mxu1 %vm519_vm1, %v494_v20  ;;  %v5829_v15 = vsel %vm2285_vm3, %v2289_v0, %v2291_v1  ;;  %v5841_v20 = vld [vmem:[%s5538_s28 + $0x48] sm:$0xff]  }
  0x35   : > { %4991 = vmatprep.mubr.msk.bf16.mxu0 %vm519_vm1, %v422_v18  ;;  %5019 = vmatprep.mubr.msk.bf16.mxu1 %vm519_vm1, %v5545_v6  ;;  %v5720_v6 = vsel %vm1001_vm2, %v1035_v5, %v1037_v30  ;;  %v2293_v18 = vrot.slane %v5809_v63, 2 }
  0x37   : > { %v5846_v23 = vsel %vm2285_vm3, %v2291_v1, %v2293_v18 }
  0x3c   : > { %4992 = vmatmul.mubr.msk.bf16.gmra.mxu0 %vm519_vm1, %v430_v25  ;;  %5020 = vmatmul.mubr.msk.bf16.vlgmr.msra.gmra.mxu1 %vm519_vm1, %v5548_v7  ;;  %v5419_v7 = vld [vmem:[%s6986_s1 + $0x60] sm:$0xff]   ;;  %v1330_v25 = vld [vmem:[%s5538_s28 + $0x8] sm:$0xe] }
  0x3d   : > { %5063 = vmatprep.mubr.msk.bf16.mxu0 %vm519_vm1, %v1004_v26  ;;  %5023 = vmatprep.mubr.msk.bf16.mxu1 %vm519_vm1, %v5567_v16  ;;  %v1009_v16 = vrot.slane %v5592_v38, 1  ;;  %v5851_v26 = vsel %vm2285_vm3, %v2293_v18, %v2295_v21  ;;  %v1832_v18 = vshll.u32 %v5801_v60, 16 }
  0x3e   : > { %5100 = vmatpush3.bf16.msra.mxu1 %v5412_v4 }
  0x3f   : > { %5101 = vmatprep.subr.bf16.mxu1 %v5415_v31  ;;  %v1010_v45 = vsel %vm1001_vm2, %v1007_v27, %v1009_v16  ;;  %v2301_v27 = vrot.slane %v5841_v20, 2 }
  0x42   : > { %5102 = vmatpush3.bf16.msra.mxu1 %v5415_v31  ;;  %v5858_v31 = vld [vmem:[%s5538_s28 + $0x50] sm:$0xff]  }
  0x43   : > { %5103 = vmatprep.subr.bf16.mxu1 %v5417_v33 }
  0x44   : > { %5064 = vmatmul.mubr.msk.bf16.vlgmr.msra.gmra.mxu0 %vm519_vm1, %v1006_v34  ;;  %5024 = vmatmul.mubr.msk.bf16.gmra.mxu1 %vm519_vm1, %v5580_v28  ;;  %v1012_v28 = vsel %vm1001_vm2, %v1009_v16, %v1011_v40 }
  0x45   : > { %5144 = vmatpush3.bf16.msra.mxu0 %v5414_v10  ;;  %5067 = vmatprep.mubr.msk.bf16.mxu0 %vm519_vm1, %v1008_v35  ;;  %v5823_v10 = vld [vmem:[%s5538_s28 + $0x38] sm:$0xff]   ;;  %v5870_v35 = vsel %vm2285_vm3, %v2299_v32, %v2301_v27 }
  0x46   : > { %5145 = vmatprep.subr.bf16.mxu0 %v5416_v39  ;;  %5027 = vmatprep.mubr.msk.bf16.mxu1 %vm519_vm1, %v5592_v38  ;;  %v1013_v38 = vrot.slane %v5630_v9, 1  ;;  %v2297_v22 = vrot.slane %v5823_v10, 2 }
  0x47   : > { %5104 = vmatpush3.bf16.msra.mxu1 %v5417_v33  ;;  %v5863_v33 = vld [vmem:[%s5538_s28 + $0x58] sm:$0xff]  }
  0x48   : > { %5105 = vmatprep.subr.bf16.mxu1 %v5419_v7  ;;  %v1014_v49 = vsel %vm1001_vm2, %v1011_v40, %v1013_v38  ;;  %v1016_v50 = vsel %vm1001_vm2, %v1013_v38, %v1015_v47  ;;  %v5854_v30 = vsel %vm2285_vm3, %v2295_v21, %v2297_v22  ;;  %v5867_v34 = vsel %vm2285_vm3, %v2297_v22, %v2299_v32 }
  0x49   : > { %5146 = vmatpush3.bf16.msra.mxu0 %v5416_v39  ;;  %v2303_v39 = vrot.slane %v5858_v31, 2  ;;  %v2305_v16 = vrot.slane %v5863_v33, 2  ;;  %v1031_v40 = vrot.slane %v5626_v3, 1  ;;  %v1472_v32 = vrot.slane %v5801_v60, 1 }
  0x4a   : > { %5147 = vmatprep.subr.bf16.mxu0 %v5418_v41 }
  0x4b   : > { %5106 = vmatpush3.bf16.msra.mxu1 %v5419_v7  ;;  %v1029_v7 = vrot.slane %v5597_v43, 1 }
  0x4c   : > { %5068 = vmatmul.mubr.msk.bf16.gmra.mxu0 %vm519_vm1, %v1010_v45  ;;  %5187 = vmatprep.subr.bf16.mxu1 %v5752_v42  ;;  %v5880_v45 = vsel %vm2285_vm3, %v2301_v27, %v2303_v39  ;;  %v1474_v27 = vrot.slane %v5804_v61, 1 }
  0x4d   : > { %5071 = vmatprep.mubr.msk.bf16.mxu0 %vm519_vm1, %v1012_v28  ;;  %5148 = vmatpush3.bf16.msra.mxu0 %v5418_v41  ;;  %v1033_v28 = vrot.slane %v5634_v11, 1 }
  0x4e   : > { %5028 = vmatmul.mubr.msk.bf16.gmra.mxu1 %vm519_vm1, %v5617_v58  ;;  %5149 = vmatprep.subr.bf16.mxu0 %v5420_v46  ;;  %v1017_v58 = vrot.slane %v5664_v44, 1 }
  0x4f   : > { %5031 = vmatprep.mubr.msk.bf16.mxu1 %vm519_vm1, %v5630_v9  ;;  %v1019_v9 = vrot.slane %v5680_v55, 1 }
  0x50   : > { %v1018_v51 = vsel %vm1001_vm2, %v1015_v47, %v1017_v58  ;;  %v5889_v47 = vld [vmem:[%s5538_s28 + $0x60] sm:$0xff]  }
  0x51   : > { %5150 = vmatpush3.bf16.msra.mxu0 %v5420_v46  ;;  %v1020_v52 = vsel %vm1001_vm2, %v1017_v58, %v1019_v9  ;;  %v1022_v59 = vsel %vm1001_vm2, %v1019_v9, %v1021_v53  ;;  %v5886_v46 = vsel %vm2285_vm3, %v2303_v39, %v2305_v16  ;;  %v1032_v58 = vsel %vm1001_vm2, %v1029_v7, %v1031_v40  ;;  %v5944_v39 = vld [vmem:[%s5538_s28 + $0x80] sm:$0xff]  }
  0x52   : > { %5231 = vmatprep.subr.bf16.mxu0 %v5769_v48  ;;  %v1820_v9 = vshrl.u32 %v5797_v56, 16 }
  0x54   : > { %5072 = vmatmul.mubr.msk.bf16.gmra.mxu0 %vm519_vm1, %v1014_v49  ;;  %v1030_v49 = vsel %vm1001_vm2, %v1027_v17, %v1029_v7  ;;  %v1822_v1 = vrot.slane %v1820_v9, 1 }
  0x55   : > { %5075 = vmatprep.mubr.msk.bf16.mxu0 %vm519_vm1, %v1016_v50  ;;  %v5893_v50 = vld [vmem:[%s5538_s28 + $0x68] sm:$0xff]  }
  0x56   : > { %5032 = vmatmul.mubr.msk.bf16.gmra.mxu1 %vm519_vm1, %v5651_v29  ;;  %v1023_v29 = vrot.slane %v5558_v13, 1 }
  0x57   : > { %5035 = vmatprep.mubr.msk.bf16.mxu1 %vm519_vm1, %v5664_v44  ;;  %v1331_v44 = vld [vmem:[%s5538_s28 + $0xc] sm:$0xf] }
  0x58   : > { %v4452_v57 = vcombine.low %v2272_v54, %v1331_v44  ;;  %v1024_v62 = vsel %vm1001_vm2, %v1021_v53, %v1023_v29  ;;  %v4372_v41 = vcombine.low %v1330_v25, %v1331_v44  ;;  %v1470_v44 = vrot.slane %v5797_v56, 1 }
  0x59   : > { %v1838_v25 = vshrl.u32 %v5804_v61, 16 }
  0x5a   : > { %v1812_v38 = vshrl.u32 %v4372_v41, 16 }
  0x5c   : > { %5076 = vmatmul.mubr.msk.bf16.gmra.mxu0 %vm519_vm1, %v1018_v51  ;;  %v1823_v51 = vshll.u32 %v5797_v56, 16 }
  0x5d   : > { %5079 = vmatprep.mubr.msk.bf16.mxu0 %vm519_vm1, %v1020_v52  ;;  %v2309_v52 = vrot.slane %v5893_v50, 2 }
  0x5e   : > { %5036 = vmatmul.mubr.msk.bf16.gmra.mxu1 %vm519_vm1, %v5680_v55  ;;  %v2287_v55 = vrot.slane %v5797_v56, 2 }
  0x5f   : > { %5039 = vmatprep.mubr.msk.bf16.mxu1 %vm519_vm1, %v5555_v12  ;;  %v2286_v12 = vrot.slane %v4452_v57, 2  ;;  %v5914_v57 = vld [vmem:[%s5538_s28 + $0x70] sm:$0xff]  }
  0x60   : > { %v5826_v14 = vsel %vm2285_vm3, %v2287_v55, %v2289_v0 }
  0x61   : > { %v5818_v4 = vsel %vm2285_vm3, %v2286_v12, %v2287_v55  ;;  %v1036_v55 = vsel %vm1001_vm2, %v1033_v28, %v1035_v5  ;;  %v5921_v12 = vld [vmem:[%s5538_s28 + $0x78] sm:$0xff]   ;;  %v1829_v5 = vshrl.u32 %v5801_v60, 16  ;;  %v1475_v60 = vsel %vm1001_vm2, %v1472_v32, %v1474_v27 }
  0x63   : > { %v1831_v7 = vrot.slane %v1829_v5, 1 }
  0x64   : > { %5080 = vmatmul.mubr.msk.bf16.gmra.mxu0 %vm519_vm1, %v1022_v59  ;;  %v1034_v59 = vsel %vm1001_vm2, %v1031_v40, %v1033_v28  ;;  %v5947_v40 = vld [vmem:[%s5538_s28 + $0x88] sm:$0xff]  }
  0x65   : > { %5083 = vmatprep.mubr.msk.bf16.mxu0 %vm519_vm1, %v1024_v62  ;;  %v1814_v62 = vrot.slane %v1812_v38, 1  ;;  %v2315_v38 = vrot.slane %v5944_v39, 2 }
  0x66   : > { %5040 = vmatmul.mubr.msk.bf16.gmra.mxu1 %vm519_vm1, %v5558_v13  ;;  %v1026_v13 = vsel %vm1001_vm2, %v1023_v29, %v1025_v8  ;;  %v1469_v29 = vrot.slane %v4372_v41, 1 }
  0x67   : > { %5043 = vmatprep.mubr.msk.bf16.mxu1 %vm519_vm1, %v5575_v24  ;;  %v1028_v24 = vsel %vm1001_vm2, %v1025_v8, %v1027_v17  ;;  %v2311_v8 = vrot.slane %v5914_v57, 2 }
  0x68   : > { %v1471_v56 = vsel %vm1001_vm2, %v1469_v29, %v1470_v44  ;;  %v1856_v29 = vshrl.u32 %v5815_v2, 16 }
  0x69   : > { %v5928_v17 = vsel %vm2285_vm3, %v2309_v52, %v2311_v8 }
  0x6c   : > { %5084 = vmatmul.mubr.msk.bf16.gmra.mxu0 %vm519_vm1, %v1026_v13 }
  0x6d   : > { %5087 = vmatprep.mubr.msk.bf16.mxu0 %vm519_vm1, %v1028_v24  ;;  %v1841_v24 = vshll.u32 %v5804_v61, 16  ;;  %v5432_v61 = vld [vmem:[%s6986_s1 + $0xb0] sm:$0xff]  }
  0x6e   : > { %5044 = vmatmul.mubr.msk.bf16.gmra.mxu1 %vm519_vm1, %v5588_v36  ;;  %v1815_v36 = vshll.u32 %v4372_v41, 16  ;;  %v1840_v41 = vrot.slane %v1838_v25, 1  ;;  %v5444_v25 = vld [vmem:[%s6986_s1 + $0xa0] sm:$0xff]  }
  0x6f   : > { %5047 = vmatprep.mubr.msk.bf16.mxu1 %vm519_vm1, %v5597_v43  ;;  %v2307_v43 = vrot.slane %v5889_v47, 2  ;;  %v1843_v28 = vrot.slane %v1841_v24, 2 }
  0x70   : > { %v1817_v0 = vrot.slane %v1815_v36, 2  ;;  %v2317_v36 = vrot.slane %v5947_v40, 2 }
  0x71   : > { %v5902_v53 = vsel %vm2285_vm3, %v2305_v16, %v2307_v43  ;;  %v5906_v54 = vsel %vm2285_vm3, %v2307_v43, %v2309_v52  ;;  %v1834_v16 = vrot.slane %v1832_v18, 2  ;;  %v1847_v43 = vshrl.u32 %v5809_v63, 16 }
  0x72   : > { %v1818_v22 = vor.u32 %v1817_v0, %v1814_v62  ;;  %v1844_v52 = vor.u32 %v1843_v28, %v1840_v41  ;;  %v5438_v62 = vld [vmem:[%s6986_s1 + $0xa8] sm:$0xff]   ;;  %v5979_v0 = vld [vmem:[%s5538_s28 + $0x90] sm:$0xff]   ;;  %v1874_v41 = vshrl.u32 %v5838_v19, 16  ;;  %v1877_v28 = vshll.u32 %v5838_v19, 16 }
  0x73   : > { %v1835_v9 = vor.u32 %v1834_v16, %v1831_v7  ;;  %v1868_v7 = vshll.u32 %v5823_v10, 16 }
  0x74   : > { %5088 = vmatmul.mubr.msk.bf16.gmra.mxu0 %vm519_vm1, %v1030_v49  ;;  %v1473_v49 = vsel %vm1001_vm2, %v1470_v44, %v1472_v32  ;;  %v1859_v44 = vshll.u32 %v5815_v2, 16 }
  0x75   : > { %5091 = vmatprep.mubr.msk.bf16.mxu0 %vm519_vm1, %v1032_v58 }
  0x76   : > { %5048 = vmatmul.mubr.msk.bf16.gmra.mxu1 %vm519_vm1, %v5626_v3  ;;  %v1825_v3 = vrot.slane %v1823_v51, 2  ;;  %v1850_v51 = vshll.u32 %v5809_v63, 16  ;;  %v1861_v5 = vrot.slane %v1859_v44, 2 }
  0x77   : > { %5051 = vmatprep.mubr.msk.bf16.mxu1 %vm519_vm1, %v5634_v11  ;;  %v2313_v11 = vrot.slane %v5921_v12, 2 }
  0x78   : > { %v1826_v13 = vor.u32 %v1825_v3, %v1822_v1  ;;  %v1849_v3 = vrot.slane %v1847_v43, 1 }
  0x79   : > { %v5934_v21 = vsel %vm2285_vm3, %v2311_v8, %v2313_v11  ;;  %v5960_v58 = vsel %vm2285_vm3, %v2313_v11, %v2315_v38  ;;  %v1852_v8 = vrot.slane %v1850_v51, 2  ;;  %v5983_v11 = vld [vmem:[%s5538_s28 + $0x98] ss:$0 sps:$4 sm:$0x33]   ;;  %v1876_v51 = vrot.slane %v1874_v41, 1 }
  0x7a   : > { %v1836_v1 = vsel %vm1810_vm4, %v1826_v13, %v1835_v9 }
  0x7b   : > { %v1853_v32 = vor.u32 %v1852_v8, %v1849_v3  ;;  %v1895_v3 = vshll.u32 %v5858_v31, 16  ;;  %v6039_v8 = vld [vmem:[%s6986_s1 + $0x118] sm:$0xff]  }
  0x7c   : > { %5092 = vmatmul.mubr.msk.bf16.gmra.mxu0 %vm519_vm1, %v1034_v59  ;;  %v1476_v59 = vrot.slane %v5809_v63, 1  ;;  %v5433_v63 = vld [vmem:[%s6986_s1 + $0xd0] sm:$0xff]  }
  0x7d   : > { %5095 = vmatprep.mubr.msk.bf16.mxu0 %vm519_vm1, %v1036_v55  ;;  %v1478_v55 = vrot.slane %v5815_v2, 1  ;;  %v2319_v2 = vrot.slane %v5979_v0, 2 }
  0x7e   : > { %5052 = vmatmul.mubr.msk.bf16.gmra.mxu1 %vm519_vm1, %v5659_v37  ;;  %v1827_v37 = vsel %vm1810_vm4, %v1818_v22, %v1826_v13  ;;  %v1477_v18 = vsel %vm1001_vm2, %v1474_v27, %v1476_v59  ;;  %v2321_v22 = vrot.slane %v5983_v11, 2  ;;  %v1865_v27 = vshrl.u32 %v5823_v10, 16 }
  0x7f   : > { %5107 = vmatprep.mubr.msk.bf16.mxu1 %vm519_vm1, %v1471_v56  ;;  %v1845_v56 = vsel %vm1810_vm4, %v1835_v9, %v1844_v52  ;;  %v1479_v13 = vsel %vm1001_vm2, %v1476_v59, %v1478_v55  ;;  %v5998_v24 = vsel %vm2285_vm3, %v2317_v36, %v2319_v2  ;;  %v1870_v9 = vrot.slane %v1868_v7, 2 }
  0x80   : > { %v6005_v16 = vsel %vm2285_vm3, %v2319_v2, %v2321_v22  ;;  %v1883_v59 = vshrl.u32 %v5841_v20, 16  ;;  %v6049_v2 = vld [vmem:[%s5538_s28 + $0x18] sm:$0xff]  }
  0x84   : > { %5096 = vmatmul.mubr.msk.bf16.gmra.mxu0 %vm519_vm1, %v5720_v6  ;;  %v5966_v6 = vsel %vm2285_vm3, %v2315_v38, %v2317_v36  ;;  %v1480_v38 = vrot.slane %v5823_v10, 1  ;;  %v6019_v36 = vld [vmem:[%s6986_s1 + $0xf8] sm:$0xff]   ;;  %v5445_v10 = vld [vmem:[%s6986_s1 + $0xc0] sm:$0xff]  }
  0x85   : > { %5151 = vmatprep.mubr.msk.bf16.mxu0 %vm519_vm1, %v1827_v37 }
  0x86   : > { %5108 = vmatmul.mubr.msk.bf16.vlgmr.msra.gmra.mxu1 %vm519_vm1, %v1473_v49  ;;  %v1482_v49 = vrot.slane %v5838_v19, 1  ;;  %v1481_v19 = vsel %vm1001_vm2, %v1478_v55, %v1480_v38 }
  0x87   : > { %5111 = vmatprep.mubr.msk.bf16.mxu1 %vm519_vm1, %v1475_v60  ;;  %5188 = vmatpush3.bf16.msra.mxu1 %v5752_v42  ;;  %v1858_v42 = vrot.slane %v1856_v29, 1  ;;  %v1854_v60 = vsel %vm1810_vm4, %v1844_v52, %v1853_v32  ;;  %v1879_v29 = vrot.slane %v1877_v28, 2 }
  0x88   : > { %5189 = vmatprep.subr.bf16.mxu1 %v5432_v61  ;;  %v1483_v52 = vsel %vm1001_vm2, %v1480_v38, %v1482_v49 }
  0x89   : > { %v1862_v37 = vor.u32 %v1861_v5, %v1858_v42  ;;  %v1880_v55 = vor.u32 %v1879_v29, %v1876_v51  ;;  %v6044_v42 = vld [vmem:[%s5538_s28 + $0x14] sm:$0xf]  ;;  %v3556_v5 = vld [vmem:[%s5538_s28 + $0x10] sm:$0x8]  ;;  %v1910_v51 = vshrl.u32 %v5889_v47, 16  ;;  %v1913_v29 = vshll.u32 %v5889_v47, 16 }
  0x8b   : > { %5190 = vmatpush3.bf16.msra.mxu1 %v5432_v61  ;;  %v1867_v61 = vrot.slane %v1865_v27, 1  ;;  %v1863_v43 = vsel %vm1810_vm4, %v1853_v32, %v1862_v37  ;;  %v6054_v27 = vld [vmem:[%s5538_s28 + $0x20] sm:$0xff]  }
  0x8c   : > { %5152 = vmatmul.mubr.msk.bf16.vlgmr.msra.gmra.mxu0 %vm519_vm1, %v1836_v1  ;;  %5191 = vmatprep.subr.bf16.mxu1 %v5438_v62  ;;  %v1892_v1 = vshrl.u32 %v5858_v31, 16 }
  0x8d   : > { %5232 = vmatpush3.bf16.msra.mxu0 %v5769_v48  ;;  %5155 = vmatprep.mubr.msk.bf16.mxu0 %vm519_vm1, %v1845_v56  ;;  %v5439_v48 = vld [vmem:[%s6986_s1 + $0xc8] sm:$0xff]   ;;  %v1871_v44 = vor.u32 %v1870_v9, %v1867_v61  ;;  %v1484_v56 = vrot.slane %v5841_v20, 1  ;;  %v1901_v61 = vshrl.u32 %v5863_v33, 16  ;;  %v1904_v9 = vshll.u32 %v5863_v33, 16 }
  0x8e   : > { %5112 = vmatmul.mubr.msk.bf16.gmra.mxu1 %vm519_vm1, %v1477_v18  ;;  %5233 = vmatprep.subr.bf16.mxu0 %v5433_v63  ;;  %v4563_v18 = vcombine.low %v3556_v5, %v6044_v42  ;;  %v1894_v32 = vrot.slane %v1892_v1, 1  ;;  %v6083_v1 = vld [vmem:[%s5538_s28 + $0x30] sm:$0xff]   ;;  %v1915_v5 = vrot.slane %v1913_v29, 2 }
  0x8f   : > { %5115 = vmatprep.mubr.msk.bf16.mxu1 %vm519_vm1, %v1479_v13  ;;  %5192 = vmatpush3.bf16.msra.mxu1 %v5438_v62  ;;  %v1886_v62 = vshll.u32 %v5841_v20, 16  ;;  %v1872_v22 = vsel %vm1810_vm4, %v1862_v37, %v1871_v44  ;;  %v1885_v13 = vrot.slane %v1883_v59, 1  ;;  %v1881_v7 = vsel %vm1810_vm4, %v1871_v44, %v1880_v55 }
  0x90   : > { %5193 = vmatprep.subr.bf16.mxu1 %v5444_v25  ;;  %v1897_v20 = vrot.slane %v1895_v3, 2  ;;  %v3570_v41 = vrot.slane %v4563_v18, 3  ;;  %v1485_v28 = vsel %vm1001_vm2, %v1482_v49, %v1484_v56  ;;  %v1903_v59 = vrot.slane %v1901_v61, 1 }
  0x91   : > { %5234 = vmatpush3.bf16.msra.mxu0 %v5433_v63  ;;  %v1486_v63 = vrot.slane %v5858_v31, 1  ;;  %v3571_v31 = vrot.slane %v6049_v2, 3 }
  0x92   : > { %5235 = vmatprep.subr.bf16.mxu0 %v5439_v48 }
  0x93   : > { %5194 = vmatpush3.bf16.msra.mxu1 %v5444_v25  ;;  %v1888_v25 = vrot.slane %v1886_v62, 2  ;;  %v1487_v37 = vsel %vm1001_vm2, %v1484_v56, %v1486_v63  ;;  %v6064_v38 = vsel %vm3569_vm5, %v3570_v41, %v3571_v31  ;;  %v1906_v62 = vrot.slane %v1904_v9, 2  ;;  %v6111_v9 = vld [vmem:[%s5538_s28 + $0x40] sm:$0xff]  }
  0x94   : > { %5156 = vmatmul.mubr.msk.bf16.gmra.mxu0 %vm519_vm1, %v1854_v60  ;;  %5275 = vmatprep.subr.bf16.mxu1 %v6019_v36  ;;  %v1912_v56 = vrot.slane %v1910_v51, 1  ;;  %v1931_v41 = vshll.u32 %v5914_v57, 16 }
  0x95   : > { %5159 = vmatprep.mubr.msk.bf16.mxu0 %vm519_vm1, %v1863_v43  ;;  %5236 = vmatpush3.bf16.msra.mxu0 %v5439_v48  ;;  %v3573_v48 = vrot.slane %v6054_v27, 3  ;;  %v1889_v60 = vor.u32 %v1888_v25, %v1885_v13  ;;  %v1898_v43 = vor.u32 %v1897_v20, %v1894_v32  ;;  %v1907_v13 = vor.u32 %v1906_v62, %v1903_v59 }
  0x96   : > { %5116 = vmatmul.mubr.msk.bf16.gmra.mxu1 %vm519_vm1, %v1481_v19  ;;  %5237 = vmatprep.subr.bf16.mxu0 %v5445_v10  ;;  %v1490_v19 = vrot.slane %v5889_v47, 1  ;;  %v1919_v25 = vshrl.u32 %v5893_v50, 16  ;;  %v1922_v32 = vshll.u32 %v5893_v50, 16  ;;  %v1928_v20 = vshrl.u32 %v5914_v57, 16 }
  0x97   : > { %5119 = vmatprep.mubr.msk.bf16.mxu1 %vm519_vm1, %v1483_v52  ;;  %v6070_v49 = vsel %vm3569_vm5, %v3571_v31, %v3573_v48  ;;  %v6079_v52 = vld [vmem:[%s5538_s28 + $0x28] sm:$0xff]   ;;  %v1890_v44 = vsel %vm1810_vm4, %v1880_v55, %v1889_v60  ;;  %v1899_v3 = vsel %vm1810_vm4, %v1889_v60, %v1898_v43  ;;  %v1492_v31 = vrot.slane %v5893_v50, 1 }
  0x98   : > { %v3575_v18 = vrot.slane %v6079_v52, 3  ;;  %v1921_v60 = vrot.slane %v1919_v25, 1  ;;  %v1924_v61 = vrot.slane %v1922_v32, 2  ;;  %v1930_v29 = vrot.slane %v1928_v20, 1 }
  0x99   : > { %5238 = vmatpush3.bf16.msra.mxu0 %v5445_v10  ;;  %v1488_v10 = vrot.slane %v5863_v33, 1  ;;  %v3577_v33 = vrot.slane %v6083_v1, 3  ;;  %v1493_v59 = vsel %vm1001_vm2, %v1490_v19, %v1492_v31  ;;  %v6990_v50 = vrot.slane %v6111_v9, 3 }
  0x9a   : > { %5319 = vmatprep.subr.bf16.mxu0 %v6039_v8  ;;  %v6092_v55 = vsel %vm3569_vm5, %v3573_v48, %v3575_v18  ;;  %v6107_v48 = vld [vmem:[%s5538_s28 + $0x38] sm:$0xff]   ;;  %v1925_v62 = vor.u32 %v1924_v61, %v1921_v60 }
  0x9b   : > { %v1491_v47 = vsel %vm1001_vm2, %v1488_v10, %v1490_v19 }
  0x9c   : > { %5160 = vmatmul.mubr.msk.bf16.gmra.mxu0 %vm519_vm1, %v1872_v22  ;;  %v1489_v22 = vsel %vm1001_vm2, %v1486_v63, %v1488_v10  ;;  %v6098_v63 = vsel %vm3569_vm5, %v3575_v18, %v3577_v33  ;;  %v1933_v10 = vrot.slane %v1931_v41, 2  ;;  %v1946_v18 = vshrl.u32 %v5944_v39, 16 }
  0x9d   : > { %5163 = vmatprep.mubr.msk.bf16.mxu0 %vm519_vm1, %v1881_v7  ;;  %v1916_v7 = vor.u32 %v1915_v5, %v1912_v56  ;;  %v1940_v56 = vshll.u32 %v5921_v12, 16 }
  0x9e   : > { %5120 = vmatmul.mubr.msk.bf16.gmra.mxu1 %vm519_vm1, %v1485_v28  ;;  %v1494_v28 = vrot.slane %v5914_v57, 1  ;;  %v1934_v5 = vor.u32 %v1933_v10, %v1930_v29  ;;  %v1948_v41 = vrot.slane %v1946_v18, 1  ;;  %v1967_v29 = vshll.u32 %v5979_v0, 16 }
  0x9f   : > { %5123 = vmatprep.mubr.msk.bf16.mxu1 %vm519_vm1, %v1487_v37  ;;  %v1908_v37 = vsel %vm1810_vm4, %v1898_v43, %v1907_v13  ;;  %v1917_v51 = vsel %vm1810_vm4, %v1907_v13, %v1916_v7  ;;  %v1926_v13 = vsel %vm1810_vm4, %v1916_v7, %v1925_v62  ;;  %v1942_v32 = vrot.slane %v1940_v56, 2 }
  0xa0   : > { %v1495_v57 = vsel %vm1001_vm2, %v1492_v31, %v1494_v28  ;;  %v1935_v20 = vsel %vm1810_vm4, %v1925_v62, %v1934_v5  ;;  %v1502_v10 = vrot.slane %v5979_v0, 1  ;;  %v1969_v56 = vrot.slane %v1967_v29, 2 }
  0xa1   : > { %v2758_v29 = vrot.slane %v6079_v52, 2 }
  0xa4   : > { %5164 = vmatmul.mubr.msk.bf16.gmra.mxu0 %vm519_vm1, %v1890_v44  ;;  %v3579_v44 = vrot.slane %v6107_v48, 3 }
  0xa5   : > { %5167 = vmatprep.mubr.msk.bf16.mxu0 %vm519_vm1, %v1899_v3  ;;  %v1937_v3 = vshrl.u32 %v5921_v12, 16 }
  0xa6   : > { %5124 = vmatmul.mubr.msk.bf16.gmra.mxu1 %vm519_vm1, %v1489_v22  ;;  %v6120_v43 = vsel %vm3569_vm5, %v3577_v33, %v3579_v44  ;;  %v6128_v19 = vsel %vm3569_vm5, %v3579_v44, %v6990_v50  ;;  %v1949_v22 = vshll.u32 %v5944_v39, 16  ;;  %v1496_v33 = vrot.slane %v5921_v12, 1  ;;  %v6344_v50 = vld [vmem:[%s5538_s28 + $0x88] sm:$0xff]  }
  0xa7   : > { %5127 = vmatprep.mubr.msk.bf16.mxu1 %vm519_vm1, %v1491_v47  ;;  %v1498_v47 = vrot.slane %v5944_v39, 1  ;;  %v1939_v25 = vrot.slane %v1937_v3, 1  ;;  %v1955_v12 = vshrl.u32 %v5947_v40, 16  ;;  %v1958_v39 = vshll.u32 %v5947_v40, 16  ;;  %7011 = vst [vmem:[#allocation16_spill] sm:$0xff] %v6344_v50 }
  0xa8   : > { %v1951_v31 = vrot.slane %v1949_v22, 2  ;;  %v5447_v22 = vld [vmem:[%s5538_s28 + $0x98] ss:$0 sps:$4 sm:$0x11]  }
  0xa9   : > { %v1499_v60 = vsel %vm1001_vm2, %v1496_v33, %v1498_v47  ;;  %v1943_v61 = vor.u32 %v1942_v32, %v1939_v25  ;;  %v1504_v25 = vrot.slane %v5447_v22, 1  ;;  %v2614_v32 = vld [vmem:[%s5538_s28 + $0x10] sm:$0xc] }
  0xaa   : > { %v1952_v7 = vor.u32 %v1951_v31, %v1948_v41 }
  0xab   : > { %v1944_v44 = vsel %vm1810_vm4, %v1934_v5, %v1943_v61  ;;  %v1976_v5 = vshll.u32 %v5983_v11, 16 }
  0xac   : > { %5168 = vmatmul.mubr.msk.bf16.gmra.mxu0 %vm519_vm1, %v1908_v37  ;;  %v1497_v37 = vsel %vm1001_vm2, %v1494_v28, %v1496_v33  ;;  %v1500_v28 = vrot.slane %v5947_v40, 1  ;;  %v1953_v62 = vsel %vm1810_vm4, %v1943_v61, %v1952_v7 }
  0xad   : > { %5171 = vmatprep.mubr.msk.bf16.mxu0 %vm519_vm1, %v1917_v51  ;;  %v1964_v51 = vshrl.u32 %v5979_v0, 16  ;;  %v1973_v0 = vshrl.u32 %v5983_v11, 16  ;;  %v1978_v41 = vrot.slane %v1976_v5, 2  ;;  %v6240_v5 = vld [vmem:[%s5538_s28 + $0x50] sm:$0xff]  }
  0xae   : > { %5128 = vmatmul.mubr.msk.bf16.gmra.mxu1 %vm519_vm1, %v1493_v59  ;;  %v1957_v59 = vrot.slane %v1955_v12, 1  ;;  %v1501_v18 = vsel %vm1001_vm2, %v1498_v47, %v1500_v28  ;;  %v1503_v33 = vsel %vm1001_vm2, %v1500_v28, %v1502_v10  ;;  %v2754_v12 = vrot.slane %v6049_v2, 2 }
  0xaf   : > { %5131 = vmatprep.mubr.msk.bf16.mxu1 %vm519_vm1, %v1495_v57  ;;  %v1960_v57 = vrot.slane %v1958_v39, 2  ;;  %v1966_v3 = vrot.slane %v1964_v51, 1  ;;  %v2756_v51 = vrot.slane %v6054_v27, 2 }
  0xb1   : > { %v1961_v40 = vor.u32 %v1960_v57, %v1957_v59  ;;  %v2757_v28 = vsel %vm2285_vm3, %v2754_v12, %v2756_v51  ;;  %v5466_v59 = vld [vmem:[%s6986_s1 + $0x108] sm:$0xff]  }
  0xb3   : > { %v1962_v47 = vsel %vm1810_vm4, %v1952_v7, %v1961_v40  ;;  %v5459_v7 = vld [vmem:[%s6986_s1 + $0xf0] sm:$0xff]  }
  0xb4   : > { %5172 = vmatmul.mubr.msk.bf16.gmra.mxu0 %vm519_vm1, %v1926_v13  ;;  %v1970_v13 = vor.u32 %v1969_v56, %v1966_v3 }
  0xb5   : > { %5175 = vmatprep.mubr.msk.bf16.mxu0 %vm519_vm1, %v1935_v20  ;;  %v1975_v20 = vrot.slane %v1973_v0, 1 }
  0xb6   : > { %5132 = vmatmul.mubr.msk.bf16.gmra.mxu1 %vm519_vm1, %v1497_v37  ;;  %v1971_v31 = vsel %vm1810_vm4, %v1961_v40, %v1970_v13  ;;  %v6165_v37 = vcombine.low %v2614_v32, %v6044_v42  ;;  %v6248_v32 = vld [vmem:[%s5538_s28 + $0x58] sm:$0xff]  }
  0xb7   : > { %5135 = vmatprep.mubr.msk.bf16.mxu1 %vm519_vm1, %v1499_v60  ;;  %v1505_v60 = vsel %vm1001_vm2, %v1502_v10, %v1504_v25  ;;  %v1979_v11 = vor.u32 %v1978_v41, %v1975_v20  ;;  %v2759_v10 = vsel %vm2285_vm3, %v2756_v51, %v2758_v29  ;;  %v2768_v20 = vrot.slane %v6240_v5, 2  ;;  %v6280_v51 = vld [vmem:[%s5538_s28 + $0x68] sm:$0xff]  }
  0xb8   : > { %v2753_v61 = vrot.slane %v6165_v37, 2 }
  0xb9   : > { %v1980_v39 = vsel %vm1810_vm4, %v1970_v13, %v1979_v11 }
  0xba   : > { %v2755_v42 = vsel %vm2285_vm3, %v2753_v61, %v2754_v12 }
  0xbc   : > { %5176 = vmatmul.mubr.msk.bf16.gmra.mxu0 %vm519_vm1, %v1944_v44  ;;  %v2762_v44 = vrot.slane %v6107_v48, 2 }
  0xbd   : > { %5179 = vmatprep.mubr.msk.bf16.mxu0 %vm519_vm1, %v1953_v62  ;;  %v6215_v62 = vld [vmem:[%s5538_s28 + $0x48] sm:$0xff]  }
  0xbe   : > { %5136 = vmatmul.mubr.msk.bf16.gmra.mxu1 %vm519_vm1, %v1501_v18  ;;  %v2766_v22 = vrot.slane %v6215_v62, 2 }
  0xbf   : > { %5139 = vmatprep.mubr.msk.bf16.mxu1 %vm519_vm1, %v1503_v33 }
  0xc0   : > { %v2769_v12 = vsel %vm2285_vm3, %v2766_v22, %v2768_v20 }
  0xc4   : > { %5180 = vmatmul.mubr.msk.bf16.gmra.mxu0 %vm519_vm1, %v1962_v47 }
  0xc5   : > { %5183 = vmatprep.mubr.msk.bf16.mxu0 %vm519_vm1, %v1971_v31 }
  0xc6   : > { %5140 = vmatmul.mubr.msk.bf16.gmra.mxu1 %vm519_vm1, %v1505_v60  ;;  %v2770_v60 = vrot.slane %v6248_v32, 2 }
  0xc7   : > { %5195 = vmatprep.mubr.msk.bf16.mxu1 %vm519_vm1, %v5818_v4  ;;  %v5465_v4 = vld [vmem:[%s6986_s1 + $0xe8] sm:$0xff]  }
  0xcc   : > { %5184 = vmatmul.mubr.msk.bf16.gmra.mxu0 %vm519_vm1, %v1980_v39  ;;  %v6272_v39 = vld [vmem:[%s5538_s28 + $0x60] sm:$0xff]  }
  0xcd   : > { %5239 = vmatprep.mubr.msk.bf16.mxu0 %vm519_vm1, %v2755_v42 }
  0xce   : > { %5196 = vmatmul.mubr.msk.bf16.vlgmr.msra.gmra.mxu1 %vm519_vm1, %v5826_v14  ;;  %v5460_v14 = vld [vmem:[%s6986_s1 + $0x110] sm:$0xff]  }
  0xcf   : > { %5199 = vmatprep.mubr.msk.bf16.mxu1 %vm519_vm1, %v5829_v15  ;;  %5276 = vmatpush3.bf16.msra.mxu1 %v6019_v36  ;;  %v5471_v15 = vld [vmem:[%s6986_s1 + $0xe0] sm:$0xff]   ;;  %v2760_v36 = vrot.slane %v6083_v1, 2 }
  0xd0   : > { %5277 = vmatprep.subr.bf16.mxu1 %v5459_v7 }
  0xd1   : > { %v2763_v57 = vsel %vm2285_vm3, %v2760_v36, %v2762_v44 }
  0xd3   : > { %5278 = vmatpush3.bf16.msra.mxu1 %v5459_v7 }
  0xd4   : > { %5240 = vmatmul.mubr.msk.bf16.vlgmr.msra.gmra.mxu0 %vm519_vm1, %v2757_v28  ;;  %5279 = vmatprep.subr.bf16.mxu1 %v5465_v4 }
  0xd5   : > { %5320 = vmatpush3.bf16.msra.mxu0 %v6039_v8  ;;  %5243 = vmatprep.mubr.msk.bf16.mxu0 %vm519_vm1, %v2759_v10  ;;  %v2761_v8 = vsel %vm2285_vm3, %v2758_v29, %v2760_v36 }
  0xd6   : > { %5200 = vmatmul.mubr.msk.bf16.gmra.mxu1 %vm519_vm1, %v5846_v23  ;;  %5321 = vmatprep.subr.bf16.mxu0 %v5460_v14  ;;  %v5472_v23 = vld [vmem:[%s6986_s1 + $0x100] sm:$0xff]  }
  0xd7   : > { %5203 = vmatprep.mubr.msk.bf16.mxu1 %vm519_vm1, %v5851_v26  ;;  %5280 = vmatpush3.bf16.msra.mxu1 %v5465_v4  ;;  %v2764_v26 = vrot.slane %v6111_v9, 2  ;;  %v2772_v4 = vrot.slane %v6272_v39, 2 }
  0xd8   : > { %5281 = vmatprep.subr.bf16.mxu1 %v5471_v15 }
  0xd9   : > { %5322 = vmatpush3.bf16.msra.mxu0 %v5460_v14  ;;  %v2765_v0 = vsel %vm2285_vm3, %v2762_v44, %v2764_v26  ;;  %v2767_v25 = vsel %vm2285_vm3, %v2764_v26, %v2766_v22  ;;  %v2774_v14 = vrot.slane %v6280_v51, 2  ;;  %v2773_v44 = vsel %vm2285_vm3, %v2770_v60, %v2772_v4 }
  0xda   : > { %5323 = vmatprep.subr.bf16.mxu0 %v5466_v59 }
  0xdb   : > { %5282 = vmatpush3.bf16.msra.mxu1 %v5471_v15 }
  0xdc   : > { %v6220_v3 = vpop.f32.mrf.mxu0  ;;  %5244 = vmatmul.mubr.msk.bf16.gmra.mxu0 %vm519_vm1, %v2761_v8  ;;  %v6225_v56 = vpop.f32.mrf.mxu1 }
  0xdd   : > { %5247 = vmatprep.mubr.msk.bf16.mxu0 %vm519_vm1, %v2763_v57  ;;  %5324 = vmatpush3.bf16.msra.mxu0 %v5466_v59  ;;  %v6304_v59 = vld [vmem:[%s5538_s28 + $0x70] sm:$0xff]  }
  0xde   : > { %5204 = vmatmul.mubr.msk.bf16.gmra.mxu1 %vm519_vm1, %v5854_v30  ;;  %v6229_v18 = vpop.f32.mrf.mxu0  ;;  %5325 = vmatprep.subr.bf16.mxu0 %v5472_v23  ;;  %v6234_v33 = vpop.f32.mrf.mxu1  ;;  %v2776_v22 = vrot.slane %v6304_v59, 2 }
  0xdf   : > { %5207 = vmatprep.mubr.msk.bf16.mxu1 %vm519_vm1, %v5867_v34 }
  0xe0   : > { %v6236_v40 = vpop.f32.mrf.mxu0  ;;  %v6242_v13 = vpop.f32.mrf.mxu1 }
  0xe1   : > { %5326 = vmatpush3.bf16.msra.mxu0 %v5472_v23  ;;  %v6312_v23 = vld [vmem:[%s5538_s28 + $0x78] sm:$0xff]  }
  0xe2   : > { %v6244_v30 = vpop.f32.mrf.mxu0  ;;  %v6250_v47 = vpop.f32.mrf.mxu1  ;;  %7005 = vst [vmem:[#allocation10_spill] sm:$0xff] %v6312_v23 }
  0xe3   : > { %6997 = vst [vmem:[#allocation2_spill] sm:$0xff] %v6250_v47 }
  0xe4   : > { %v6252_v34 = vpop.f32.mrf.mxu0  ;;  %5248 = vmatmul.mubr.msk.bf16.gmra.mxu0 %vm519_vm1, %v2765_v0  ;;  %v6257_v41 = vpop.f32.mrf.mxu1 }
  0xe5   : > { %5251 = vmatprep.mubr.msk.bf16.mxu0 %vm519_vm1, %v2767_v25  ;;  %6998 = vst [vmem:[#allocation3_spill] sm:$0xff] %v6257_v41 }
  0xe6   : > { %5208 = vmatmul.mubr.msk.bf16.gmra.mxu1 %vm519_vm1, %v5870_v35  ;;  %v6261_v31 = vpop.f32.mrf.mxu0  ;;  %v6266_v11 = vpop.f32.mrf.mxu1  ;;  %v2771_v35 = vsel %vm2285_vm3, %v2768_v20, %v2770_v60  ;;  %v2778_v20 = vrot.slane %v6312_v23, 2 }
  0xe7   : > { %5211 = vmatprep.mubr.msk.bf16.mxu1 %vm519_vm1, %v5880_v45  ;;  %6999 = vst [vmem:[#allocation4_spill] sm:$0xff] %v6266_v11 }
  0xe8   : > { %v6268_v61 = vpop.f32.mrf.mxu0  ;;  %v6274_v42 = vpop.f32.mrf.mxu1 }
  0xe9   : > { %7000 = vst [vmem:[#allocation5_spill] sm:$0xff] %v6274_v42 }
  0xea   : > { %v6276_v7 = vpop.f32.mrf.mxu0  ;;  %v6282_v29 = vpop.f32.mrf.mxu1 }
  0xeb   : > { %7001 = vst [vmem:[#allocation6_spill] sm:$0xff] %v6282_v29 }
  0xec   : > { %v6284_v45 = vpop.f32.mrf.mxu0  ;;  %5252 = vmatmul.mubr.msk.bf16.gmra.mxu0 %vm519_vm1, %v2769_v12  ;;  %v6289_v28 = vpop.f32.mrf.mxu1 }
  0xed   : > { %5255 = vmatprep.mubr.msk.bf16.mxu0 %vm519_vm1, %v2771_v35  ;;  %7002 = vst [vmem:[#allocation7_spill] sm:$0xff] %v6289_v28  ;;  %v2777_v35 = vsel %vm2285_vm3, %v2774_v14, %v2776_v22 }
  0xee   : > { %5212 = vmatmul.mubr.msk.bf16.gmra.mxu1 %vm519_vm1, %v5886_v46  ;;  %v6293_v10 = vpop.f32.mrf.mxu0  ;;  %v6298_v15 = vpop.f32.mrf.mxu1  ;;  %v2775_v46 = vsel %vm2285_vm3, %v2772_v4, %v2774_v14  ;;  %v6336_v4 = vld [vmem:[%s5538_s28 + $0x80] sm:$0xff]  }
  0xef   : > { %5215 = vmatprep.mubr.msk.bf16.mxu1 %vm519_vm1, %v5902_v53  ;;  %7003 = vst [vmem:[#allocation8_spill] sm:$0xff] %v6298_v15  ;;  %7009 = vst [vmem:[#allocation14_spill] sm:$0xff] %v6336_v4  ;;  %v3104_v15 = vshrl.u32 %v6049_v2, 16 }
  0xf0   : > { %v6300_v36 = vpop.f32.mrf.mxu0  ;;  %v6306_v8 = vpop.f32.mrf.mxu1 }
  0xf1   : > { %7004 = vst [vmem:[#allocation9_spill] sm:$0xff] %v6306_v8  ;;  %v3099_v8 = vshll.u32 %v6165_v37, 16 }
  0xf2   : > { %v6308_v57 = vpop.f32.mrf.mxu0  ;;  %v6314_v26 = vpop.f32.mrf.mxu1 }
  0xf3   : > { %7006 = vst [vmem:[#allocation11_spill] sm:$0xff] %v6314_v26  ;;  %v3101_v41 = vrot.slane %v3099_v8, 3 }
  0xf4   : > { %v6316_v53 = vpop.f32.mrf.mxu0  ;;  %5256 = vmatmul.mubr.msk.bf16.gmra.mxu0 %vm519_vm1, %v2773_v44  ;;  %v6321_v0 = vpop.f32.mrf.mxu1 }
  0xf5   : > { %5259 = vmatprep.mubr.msk.bf16.mxu0 %vm519_vm1, %v2775_v46  ;;  %7007 = vst [vmem:[#allocation12_spill] sm:$0xff] %v6321_v0 }
  0xf6   : > { %5216 = vmatmul.mubr.msk.bf16.gmra.mxu1 %vm519_vm1, %v5906_v54  ;;  %v6325_v25 = vpop.f32.mrf.mxu0  ;;  %v6330_v60 = vpop.f32.mrf.mxu1  ;;  %v2779_v54 = vsel %vm2285_vm3, %v2776_v22, %v2778_v20  ;;  %v2782_v22 = vrot.slane %v6344_v50, 2  ;;  %v6370_v50 = vld [vmem:[%s5538_s28 + $0x90] sm:$0xff]  }
  0xf7   : > { %5219 = vmatprep.mubr.msk.bf16.mxu1 %vm519_vm1, %v5928_v17  ;;  %7008 = vst [vmem:[#allocation13_spill] sm:$0xff] %v6330_v60  ;;  %v2780_v17 = vrot.slane %v6336_v4, 2  ;;  %v6376_v4 = vld [vmem:[%s5538_s28 + $0x98] sm:$0xff]  }
  0xf8   : > { %v6332_v12 = vpop.f32.mrf.mxu0  ;;  %v6338_v44 = vpop.f32.mrf.mxu1 }
  0xf9   : > { %7010 = vst [vmem:[#allocation15_spill] sm:$0xff] %v6338_v44  ;;  %v2781_v29 = vsel %vm2285_vm3, %v2778_v20, %v2780_v17 }
  0xfa   : > { %v6340_v46 = vpop.f32.mrf.mxu0  ;;  %v6346_v0 = vpop.f32.mrf.mxu1 }
  0xfb   : > { %7012 = vst [vmem:[#allocation17_spill] sm:$0xff] %v6346_v0 }
  0xfc   : > { %v6348_v26 = vpop.f32.mrf.mxu0  ;;  %5260 = vmatmul.mubr.msk.bf16.gmra.mxu0 %vm519_vm1, %v2777_v35  ;;  %v5021_v14 = vpop.f32.mrf.mxu1 }
  0xfd   : > { %5263 = vmatprep.mubr.msk.bf16.mxu0 %vm519_vm1, %v2779_v54  ;;  %v854_v0 = vadd.f32 %v5021_v14, %v6220_v3  ;;  %v3096_v54 = vshrl.u32 %v6165_v37, 16 }
  0xfe   : > { %5220 = vmatmul.mubr.msk.bf16.gmra.mxu1 %vm519_vm1, %v5934_v21  ;;  %v6355_v44 = vpop.f32.mrf.mxu0  ;;  %v845_v35 = vpop.f32.mrf.mxu1  ;;  %v3107_v21 = vshll.u32 %v6049_v2, 16 }
  0xff   : > { %5223 = vmatprep.mubr.msk.bf16.mxu1 %vm519_vm1, %v5960_v58  ;;  %v846_v28 = vadd.f32 %v845_v35, %v6229_v18  ;;  %v2783_v58 = vsel %vm2285_vm3, %v2780_v17, %v2782_v22  ;;  %v3098_v2 = vrot.slane %v3096_v54, 2  ;;  %v3106_v18 = vrot.slane %v3104_v15, 2 }
 0x100   : > { %v6361_v60 = vpop.f32.mrf.mxu0  ;;  %v5022_v3 = vpop.f32.mrf.mxu1  ;;  %v3109_v35 = vrot.slane %v3107_v21, 3  ;;  %v2784_v17 = vrot.slane %v6370_v50, 2 }
 0x101   : > { %v857_v42 = vadd.f32 %v5022_v3, %v6236_v40  ;;  %v2786_v3 = vrot.slane %v6376_v4, 2  ;;  %v3102_v54 = vor.u32 %v3101_v41, %v3098_v2 }
 0x102   : > { %v6372_v14 = vpop.f32.mrf.mxu0  ;;  %v848_v37 = vpop.f32.mrf.mxu1  ;;  %v3110_v21 = vor.u32 %v3109_v35, %v3106_v18 }
 0x103   : > { %v849_v20 = vadd.f32 %v848_v37, %v6244_v30  ;;  %v3113_v30 = vshrl.u32 %v6054_v27, 16 }
 0x104   : > { %v5065_v11 = vpop.f32.mrf.mxu0  ;;  %5264 = vmatmul.mubr.msk.bf16.gmra.mxu0 %vm519_vm1, %v2781_v29  ;;  %v5025_v23 = vpop.f32.mrf.mxu1 }
 0x105   : > { %v6381_v47 = vadd.f32 %v5065_v11, %v854_v0  ;;  %5267 = vmatprep.mubr.msk.bf16.mxu0 %vm519_vm1, %v2783_v58  ;;  %v870_v29 = vadd.f32 %v5025_v23, %v6252_v34  ;;  %v3116_v11 = vshll.u32 %v6054_v27, 16  ;;  %v3125_v58 = vshll.u32 %v6079_v52, 16 }
 0x106   : > { %5224 = vmatmul.mubr.msk.bf16.gmra.mxu1 %vm519_vm1, %v5966_v6  ;;  %v1151_v40 = vpop.f32.mrf.mxu0  ;;  %v861_v8 = vpop.f32.mrf.mxu1  ;;  %v3122_v6 = vshrl.u32 %v6079_v52, 16  ;;  %v2787_v27 = vsel %vm2285_vm3, %v2784_v17, %v2786_v3  ;;  %v3115_v2 = vrot.slane %v3113_v30, 2  ;;  %v3131_v30 = vshrl.u32 %v6083_v1, 16 }
 0x107   : > { %v6389_v15 = vadd.f32 %v1151_v40, %v846_v28  ;;  %5227 = vmatprep.mubr.msk.bf16.mxu1 %vm519_vm1, %v5998_v24  ;;  %v862_v37 = vadd.f32 %v861_v8, %v6261_v31  ;;  %v2785_v28 = vsel %vm2285_vm3, %v2782_v22, %v2784_v17  ;;  %v5476_v24 = vld [vmem:[%s5538_s28 + $0xa0] ss:$0 sps:$4 sm:$0x33]   ;;  %v3118_v18 = vrot.slane %v3116_v11, 3 }
 0x108   : > { %v5066_v0 = vpop.f32.mrf.mxu0  ;;  %v5026_v23 = vpop.f32.mrf.mxu1  ;;  %v3111_v31 = vsel %vm3094_vm6, %v3102_v54, %v3110_v21  ;;  %v3127_v22 = vrot.slane %v3125_v58, 3  ;;  %v2788_v17 = vrot.slane %v5476_v24, 2  ;;  %v3134_v11 = vshll.u32 %v6083_v1, 16 }
 0x109   : > { %7013 = vst [vmem:[#allocation18_spill] sm:$0xff] %v6389_v15  ;;  %v6398_v34 = vadd.f32 %v5066_v0, %v857_v42  ;;  %v873_v15 = vadd.f32 %v5026_v23, %v6268_v61  ;;  %v3124_v42 = vrot.slane %v3122_v6, 2  ;;  %v3140_v24 = vshrl.u32 %v6107_v48, 16 }
 0x10a   : > { %v1154_v40 = vpop.f32.mrf.mxu0  ;;  %v864_v35 = vpop.f32.mrf.mxu1  ;;  %v3143_v23 = vshll.u32 %v6107_v48, 16  ;;  %v2789_v1 = vsel %vm2285_vm3, %v2786_v3, %v2788_v17 }
 0x10b   : > { %v6404_v41 = vadd.f32 %v1154_v40, %v849_v20  ;;  %v865_v8 = vadd.f32 %v864_v35, %v6276_v7  ;;  %v3119_v7 = vor.u32 %v3118_v18, %v3115_v2  ;;  %v3136_v35 = vrot.slane %v3134_v11, 3 }
 0x10c   : > { %v5069_v52 = vpop.f32.mrf.mxu0  ;;  %5268 = vmatmul.mubr.msk.bf16.gmra.mxu0 %vm519_vm1, %v2785_v28  ;;  %v3128_v28 = vor.u32 %v3127_v22, %v3124_v42 }
 0x10d   : > { %v6409_v0 = vadd.f32 %v5069_v52, %v870_v29  ;;  %5271 = vmatprep.mubr.msk.bf16.mxu0 %vm519_vm1, %v2787_v27  ;;  %v3120_v18 = vsel %vm3094_vm6, %v3110_v21, %v3119_v7 }
 0x10e   : > { %v5029_v61 = vpop.f32.mrf.mxu1  ;;  %5228 = vmatmul.mubr.msk.bf16.gmra.mxu1 %vm519_vm1, %v6005_v16  ;;  %v1167_v20 = vpop.f32.mrf.mxu0  ;;  %v3129_v48 = vsel %vm3094_vm6, %v3119_v7, %v3128_v28  ;;  %v3161_v7 = vshll.u32 %v6215_v62, 16 }
 0x10f   : > { %v886_v54 = vadd.f32 %v5029_v61, %v6284_v45  ;;  %v6417_v6 = vadd.f32 %v1167_v20, %v862_v37  ;;  %5283 = vmatprep.mubr.msk.bf16.mxu1 %vm519_vm1, %v3111_v31  ;;  %v3133_v37 = vrot.slane %v3131_v30, 2  ;;  %v3149_v20 = vshrl.u32 %v6111_v9, 16 }
 0x110   : > { %v877_v29 = vpop.f32.mrf.mxu1  ;;  %v5070_v58 = vpop.f32.mrf.mxu0 }
 0x111   : > { %v878_v16 = vadd.f32 %v877_v29, %v6293_v10  ;;  %v6423_v40 = vadd.f32 %v5070_v58, %v873_v15  ;;  %v3142_v10 = vrot.slane %v3140_v24, 2  ;;  %v3145_v15 = vrot.slane %v3143_v23, 3 }
 0x112   : > { %v5030_v27 = vpop.f32.mrf.mxu1  ;;  %v1170_v45 = vpop.f32.mrf.mxu0  ;;  %v3137_v21 = vor.u32 %v3136_v35, %v3133_v37 }
 0x113   : > { %v889_v52 = vadd.f32 %v5030_v27, %v6300_v36  ;;  %v6427_v2 = vadd.f32 %v1170_v45, %v865_v8  ;;  %v3151_v27 = vrot.slane %v3149_v20, 2 }
 0x114   : > { %v880_v31 = vpop.f32.mrf.mxu1  ;;  %v5073_v42 = vpop.f32.mrf.mxu0  ;;  %5272 = vmatmul.mubr.msk.bf16.gmra.mxu0 %vm519_vm1, %v2789_v1  ;;  %v3138_v23 = vsel %vm3094_vm6, %v3128_v28, %v3137_v21 }
 0x115   : > { %v881_v3 = vadd.f32 %v880_v31, %v6308_v57  ;;  %v6433_v22 = vadd.f32 %v5073_v42, %v886_v54  ;;  %5327 = vmatprep.mubr.msk.bf16.mxu0 %vm519_vm1, %v6064_v38  ;;  %v3152_v57 = vshll.u32 %v6111_v9, 16  ;;  %v3146_v54 = vor.u32 %v3145_v15, %v3142_v10 }
 0x116   : > { %v5033_v36 = vpop.f32.mrf.mxu1  ;;  %5284 = vmatmul.mubr.msk.bf16.vlgmr.msra.gmra.mxu1 %vm519_vm1, %v3120_v18  ;;  %v1183_v8 = vpop.f32.mrf.mxu0  ;;  %v3158_v38 = vshrl.u32 %v6215_v62, 16  ;;  %v3170_v10 = vshll.u32 %v6240_v5, 16 }
 0x117   : > { %v902_v17 = vadd.f32 %v5033_v36, %v6316_v53  ;;  %v6439_v61 = vadd.f32 %v1183_v8, %v878_v16  ;;  %5287 = vmatprep.mubr.msk.bf16.mxu1 %vm519_vm1, %v3129_v48  ;;  %v3154_v45 = vrot.slane %v3152_v57, 3  ;;  %v3147_v18 = vsel %vm3094_vm6, %v3137_v21, %v3146_v54 }
 0x118   : > { %v893_v30 = vpop.f32.mrf.mxu1  ;;  %v5074_v11 = vpop.f32.mrf.mxu0  ;;  %v3167_v48 = vshrl.u32 %v6240_v5, 16  ;;  %v3179_v21 = vshll.u32 %v6248_v32, 16 }
 0x119   : > { %v894_v29 = vadd.f32 %v893_v30, %v6325_v25  ;;  %v6447_v58 = vadd.f32 %v5074_v11, %v889_v52  ;;  %v3160_v25 = vrot.slane %v3158_v38, 2  ;;  %v3163_v52 = vrot.slane %v3161_v7, 3 }
 0x11a   : > { %v5034_v53 = vpop.f32.mrf.mxu1  ;;  %v1186_v24 = vpop.f32.mrf.mxu0  ;;  %v3169_v11 = vrot.slane %v3167_v48, 2 }
 0x11b   : > { %v905_v16 = vadd.f32 %v5034_v53, %v6332_v12  ;;  %v6451_v1 = vadd.f32 %v1186_v24, %v881_v3  ;;  %v3164_v8 = vor.u32 %v3163_v52, %v3160_v25 }
 0x11c   : > { %v896_v37 = vpop.f32.mrf.mxu1  ;;  %v5077_v35 = vpop.f32.mrf.mxu0  ;;  %5328 = vmatmul.mubr.msk.bf16.vlgmr.msra.gmra.mxu0 %vm519_vm1, %v6070_v49 }
 0x11d   : > { %v897_v31 = vadd.f32 %v896_v37, %v6340_v46  ;;  %v6457_v42 = vadd.f32 %v5077_v35, %v902_v17  ;;  %5331 = vmatprep.mubr.msk.bf16.mxu0 %vm519_vm1, %v6092_v55  ;;  %v3155_v46 = vor.u32 %v3154_v45, %v3151_v27  ;;  %v3176_v55 = vshrl.u32 %v6248_v32, 16 }
 0x11e   : > { %v5037_v12 = vpop.f32.mrf.mxu1  ;;  %5288 = vmatmul.mubr.msk.bf16.gmra.mxu1 %vm519_vm1, %v3138_v23  ;;  %v1199_v28 = vpop.f32.mrf.mxu0  ;;  %v3583_v35 = vrot.slane %v6215_v62, 3 }
 0x11f   : > { %v918_v49 = vadd.f32 %v5037_v12, %v6348_v26  ;;  %v6465_v15 = vadd.f32 %v1199_v28, %v894_v29  ;;  %5291 = vmatprep.mubr.msk.bf16.mxu1 %vm519_vm1, %v3147_v18  ;;  %v3172_v26 = vrot.slane %v3170_v10, 3  ;;  %v3156_v29 = vsel %vm3094_vm6, %v3146_v54, %v3155_v46 }
 0x120   : > { %v909_v3 = vpop.f32.mrf.mxu1  ;;  %v5078_v36 = vpop.f32.mrf.mxu0  ;;  %v3165_v23 = vsel %vm3094_vm6, %v3155_v46, %v3164_v8  ;;  %v3197_v12 = vshll.u32 %v6280_v51, 16 }
 0x121   : > { %v910_v17 = vadd.f32 %v909_v3, %v6355_v44  ;;  %v6471_v20 = vadd.f32 %v5078_v36, %v905_v16  ;;  %v3178_v44 = vrot.slane %v3176_v55, 2  ;;  %v3181_v16 = vrot.slane %v3179_v21, 3 }
 0x122   : > { %v5038_v57 = vpop.f32.mrf.mxu1  ;;  %v1202_v30 = vpop.f32.mrf.mxu0  ;;  %v3173_v37 = vor.u32 %v3172_v26, %v3169_v11  ;;  %v3199_v26 = vrot.slane %v3197_v12, 3 }
 0x123   : > { %v921_v38 = vadd.f32 %v5038_v57, %v6361_v60  ;;  %v6474_v7 = vadd.f32 %v1202_v30, %v897_v31  ;;  %v3182_v31 = vor.u32 %v3181_v16, %v3178_v44 }
 0x124   : > { %v912_v53 = vpop.f32.mrf.mxu1  ;;  %v5081_v24 = vpop.f32.mrf.mxu0  ;;  %5332 = vmatmul.mubr.msk.bf16.gmra.mxu0 %vm519_vm1, %v6098_v63  ;;  %v3185_v63 = vshrl.u32 %v6272_v39, 16  ;;  %v3174_v62 = vsel %vm3094_vm6, %v3164_v8, %v3173_v37 }
 0x125   : > { %v913_v27 = vadd.f32 %v912_v53, %v6372_v14  ;;  %v6481_v45 = vadd.f32 %v5081_v24, %v918_v49  ;;  %5335 = vmatprep.mubr.msk.bf16.mxu0 %vm519_vm1, %v6120_v43  ;;  %v3188_v14 = vshll.u32 %v6272_v39, 16  ;;  %v3194_v43 = vshrl.u32 %v6280_v51, 16 }
 0x126   : > { %v5041_v60 = vpop.f32.mrf.mxu1  ;;  %5292 = vmatmul.mubr.msk.bf16.gmra.mxu1 %vm519_vm1, %v3156_v29  ;;  %v1215_v54 = vpop.f32.mrf.mxu0  ;;  %v7014_v49 = vrot.slane %v6111_v9, 3  ;;  %v3187_v55 = vrot.slane %v3185_v63, 2  ;;  %v3183_v30 = vsel %vm3094_vm6, %v3173_v37, %v3182_v31  ;;  %v3587_v53 = vrot.slane %v6248_v32, 3  ;;  %v7016_v63 = vld [vmem:[#allocation2_spill] sm:$0xff] }
 0x127   : > { %v6487_v18 = vadd.f32 %v1215_v54, %v910_v17  ;;  %5295 = vmatprep.mubr.msk.bf16.mxu1 %vm519_vm1, %v3165_v23  ;;  %v934_v3 = vadd.f32 %v5041_v60, %v6225_v56  ;;  %v3190_v21 = vrot.slane %v3188_v14, 3  ;;  %v3196_v11 = vrot.slane %v3194_v43, 2  ;;  %v7015_v60 = vld [vmem:[#allocation10_spill] sm:$0xff] }
 0x128   : > { %v925_v25 = vpop.f32.mrf.mxu1  ;;  %v5082_v52 = vpop.f32.mrf.mxu0  ;;  %v3584_v46 = vsel %vm3569_vm5, %v7014_v49, %v3583_v35  ;;  %v3585_v56 = vrot.slane %v6240_v5, 3  ;;  %v3206_v24 = vshll.u32 %v6304_v59, 16  ;;  %v3212_v54 = vshrl.u32 %v7015_v60, 16 }
 0x129   : > { %v6494_v28 = vadd.f32 %v5082_v52, %v921_v38  ;;  %v926_v8 = vadd.f32 %v925_v25, %v6234_v33  ;;  %v3191_v33 = vor.u32 %v3190_v21, %v3187_v55  ;;  %v3200_v5 = vor.u32 %v3199_v26, %v3196_v11 }
 0x12a   : > { %v5042_v48 = vpop.f32.mrf.mxu1  ;;  %v1218_v10 = vpop.f32.mrf.mxu0  ;;  %v3215_v37 = vshll.u32 %v7015_v60, 16  ;;  %v3586_v25 = vsel %vm3569_vm5, %v3583_v35, %v3585_v56  ;;  %v3588_v43 = vsel %vm3569_vm5, %v3585_v56, %v3587_v53  ;;  %v3589_v26 = vrot.slane %v6272_v39, 3 }
 0x12b   : > { %v6501_v36 = vadd.f32 %v1218_v10, %v913_v27  ;;  %v937_v23 = vadd.f32 %v5042_v48, %v6242_v13  ;;  %v3208_v48 = vrot.slane %v3206_v24, 3  ;;  %v7017_v10 = vld [vmem:[#allocation3_spill] sm:$0xff]  ;;  %v3201_v21 = vsel %vm3094_vm6, %v3191_v33, %v3200_v5 }
 0x12c   : > { %v928_v17 = vpop.f32.mrf.mxu1  ;;  %v5085_v57 = vpop.f32.mrf.mxu0  ;;  %5336 = vmatmul.mubr.msk.bf16.gmra.mxu0 %vm519_vm1, %v6128_v19  ;;  %v3203_v19 = vshrl.u32 %v6304_v59, 16  ;;  %v3217_v35 = vrot.slane %v3215_v37, 3  ;;  %v7021_v37 = vld [vmem:[#allocation16_spill] sm:$0xff] }
 0x12d   : > { %v6507_v9 = vadd.f32 %v5085_v57, %v934_v3  ;;  %5339 = vmatprep.mubr.msk.bf16.mxu0 %vm519_vm1, %v3584_v46  ;;  %v929_v32 = vadd.f32 %v928_v17, %v7016_v63  ;;  %v3192_v46 = vsel %vm3094_vm6, %v3182_v31, %v3191_v33  ;;  %v3214_v17 = vrot.slane %v3212_v54, 2  ;;  %v7018_v57 = vld [vmem:[#allocation4_spill] sm:$0xff] }
 0x12e   : > { %v5045_v38 = vpop.f32.mrf.mxu1  ;;  %5296 = vmatmul.mubr.msk.bf16.gmra.mxu1 %vm519_vm1, %v3174_v62  ;;  %v1231_v29 = vpop.f32.mrf.mxu0  ;;  %v3205_v12 = vrot.slane %v3203_v19, 2  ;;  %v3230_v63 = vshrl.u32 %v7021_v37, 16 }
 0x12f   : > { %v6516_v44 = vadd.f32 %v1231_v29, %v926_v8  ;;  %5299 = vmatprep.mubr.msk.bf16.mxu1 %vm519_vm1, %v3183_v30  ;;  %v950_v62 = vadd.f32 %v5045_v38, %v7017_v10  ;;  %v3591_v38 = vrot.slane %v6280_v51, 3  ;;  %v7019_v29 = vld [vmem:[#allocation5_spill] sm:$0xff]  ;;  %v3218_v39 = vor.u32 %v3217_v35, %v3214_v17 }
 0x130   : > { %v941_v16 = vpop.f32.mrf.mxu1  ;;  %v5086_v27 = vpop.f32.mrf.mxu0  ;;  %v3209_v56 = vor.u32 %v3208_v48, %v3205_v12 }
 0x131   : > { %v6522_v14 = vadd.f32 %v5086_v27, %v937_v23  ;;  %v942_v30 = vadd.f32 %v941_v16, %v7018_v57  ;;  %v7020_v23 = vld [vmem:[#allocation14_spill] sm:$0xff]  ;;  %v3592_v10 = vsel %vm3569_vm5, %v3589_v26, %v3591_v38 }
 0x132   : > { %v5046_v52 = vpop.f32.mrf.mxu1  ;;  %v1234_v13 = vpop.f32.mrf.mxu0  ;;  %v3221_v33 = vshrl.u32 %v7020_v23, 16  ;;  %v3224_v16 = vshll.u32 %v7020_v23, 16  ;;  %v3210_v48 = vsel %vm3094_vm6, %v3200_v5, %v3209_v56  ;;  %v3593_v5 = vrot.slane %v6304_v59, 3 }
 0x133   : > { %v6527_v49 = vadd.f32 %v1234_v13, %v929_v32  ;;  %v953_v19 = vadd.f32 %v5046_v52, %v7019_v29  ;;  %v3233_v32 = vshll.u32 %v7021_v37, 16  ;;  %v3590_v52 = vsel %vm3569_vm5, %v3587_v53, %v3589_v26 }
 0x134   : > { %v944_v3 = vpop.f32.mrf.mxu1  ;;  %v5089_v55 = vpop.f32.mrf.mxu0  ;;  %5340 = vmatmul.mubr.msk.bf16.gmra.mxu0 %vm519_vm1, %v3586_v25  ;;  %v7022_v25 = vld [vmem:[#allocation6_spill] sm:$0xff]  ;;  %v3226_v17 = vrot.slane %v3224_v16, 3  ;;  %v3239_v16 = vshrl.u32 %v6370_v50, 16 }
 0x135   : > { %v6533_v11 = vadd.f32 %v5089_v55, %v950_v62  ;;  %5343 = vmatprep.mubr.msk.bf16.mxu0 %vm519_vm1, %v3588_v43  ;;  %v945_v13 = vadd.f32 %v944_v3, %v7022_v25  ;;  %v7023_v62 = vld [vmem:[#allocation7_spill] sm:$0xff]  ;;  %v3219_v3 = vsel %vm3094_vm6, %v3209_v56, %v3218_v39  ;;  %v3235_v53 = vrot.slane %v3233_v32, 3 }
 0x136   : > { %v5049_v8 = vpop.f32.mrf.mxu1  ;;  %5300 = vmatmul.mubr.msk.bf16.gmra.mxu1 %vm519_vm1, %v3192_v46  ;;  %v1247_v31 = vpop.f32.mrf.mxu0  ;;  %v3242_v56 = vshll.u32 %v6370_v50, 16 }
 0x137   : > { %v6540_v24 = vadd.f32 %v1247_v31, %v942_v30  ;;  %5303 = vmatprep.mubr.msk.bf16.mxu1 %vm519_vm1, %v3201_v21  ;;  %v966_v46 = vadd.f32 %v5049_v8, %v7023_v62  ;;  %v3223_v21 = vrot.slane %v3221_v33, 2  ;;  %v3232_v30 = vrot.slane %v3230_v63, 2  ;;  %v7024_v31 = vld [vmem:[#allocation8_spill] sm:$0xff] }
 0x138   : > { %v957_v27 = vpop.f32.mrf.mxu1  ;;  %v5090_v54 = vpop.f32.mrf.mxu0  ;;  %v3595_v33 = vrot.slane %v7015_v60, 3  ;;  %v7026_v60 = vld [vmem:[#allocation11_spill] sm:$0xff]  ;;  %v3594_v62 = vsel %vm3569_vm5, %v3591_v38, %v3593_v5 }
 0x139   : > { %v6548_v51 = vadd.f32 %v5090_v54, %v953_v19  ;;  %v958_v29 = vadd.f32 %v957_v27, %v7024_v31  ;;  %v7025_v54 = vld [vmem:[#allocation9_spill] sm:$0xff]  ;;  %v3227_v27 = vor.u32 %v3226_v17, %v3223_v21  ;;  %v3241_v31 = vrot.slane %v3239_v16, 2  ;;  %v6579_v21 = vld [vmem:[%s5538_s28 + $0xa0] ss:$0 sps:$4 sm:$0x77]   ;;  %v7027_v17 = vld [vmem:[#allocation12_spill] sm:$0xff] }
 0x13a   : > { %v5050_v43 = vpop.f32.mrf.mxu1  ;;  %v1250_v12 = vpop.f32.mrf.mxu0 }
 0x13b   : > { %v6554_v55 = vadd.f32 %v1250_v12, %v945_v13  ;;  %v969_v63 = vadd.f32 %v5050_v43, %v7025_v54  ;;  %v3236_v13 = vor.u32 %v3235_v53, %v3232_v30  ;;  %v3251_v12 = vshll.u32 %v6376_v4, 16 }
 0x13c   : > { %v960_v35 = vpop.f32.mrf.mxu1  ;;  %v5093_v57 = vpop.f32.mrf.mxu0  ;;  %5344 = vmatmul.mubr.msk.bf16.gmra.mxu0 %vm519_vm1, %v3590_v52  ;;  %v3248_v52 = vshrl.u32 %v6376_v4, 16 }
 0x13d   : > { %v6559_v19 = vadd.f32 %v5093_v57, %v966_v46  ;;  %5347 = vmatprep.mubr.msk.bf16.mxu0 %vm519_vm1, %v3592_v10  ;;  %v3596_v57 = vsel %vm3569_vm5, %v3593_v5, %v3595_v33  ;;  %v3237_v38 = vsel %vm3094_vm6, %v3227_v27, %v3236_v13 }
 0x13e   : > { %v5053_v26 = vpop.f32.mrf.mxu1  ;;  %5304 = vmatmul.mubr.msk.bf16.gmra.mxu1 %vm519_vm1, %v3210_v48  ;;  %v1263_v8 = vpop.f32.mrf.mxu0  ;;  %v961_v48 = vadd.f32 %v960_v35, %v7026_v60  ;;  %v3250_v54 = vrot.slane %v3248_v52, 2 }
 0x13f   : > { %v6568_v32 = vadd.f32 %v1263_v8, %v958_v29  ;;  %5307 = vmatprep.mubr.msk.bf16.mxu1 %vm519_vm1, %v3219_v3  ;;  %v3244_v3 = vrot.slane %v3242_v56, 3  ;;  %v982_v30 = vadd.f32 %v5053_v26, %v7027_v17  ;;  %v3228_v29 = vsel %vm3094_vm6, %v3218_v39, %v3227_v27  ;;  %v7029_v27 = vld [vmem:[#allocation15_spill] sm:$0xff] }
 0x140   : > { %v973_v25 = vpop.f32.mrf.mxu1  ;;  %v5094_v59 = vpop.f32.mrf.mxu0  ;;  %v3597_v26 = vrot.slane %v7020_v23, 3 }
 0x141   : > { %v6574_v10 = vadd.f32 %v5094_v59, %v969_v63  ;;  %v3253_v63 = vrot.slane %v3251_v12, 3  ;;  %v7028_v59 = vld [vmem:[#allocation13_spill] sm:$0xff]  ;;  %v3245_v60 = vor.u32 %v3244_v3, %v3241_v31  ;;  %v7031_v31 = vld [vmem:[#allocation18_spill] sm:$0xff] }
 0x142   : > { %v5054_v43 = vpop.f32.mrf.mxu1  ;;  %v1266_v46 = vpop.f32.mrf.mxu0  ;;  %v974_v5 = vadd.f32 %v973_v25, %v7028_v59 }
 0x143   : > { %v6582_v53 = vadd.f32 %v1266_v46, %v961_v48  ;;  %v3599_v48 = vrot.slane %v7021_v37, 3  ;;  %v985_v52 = vadd.f32 %v5054_v43, %v7029_v27  ;;  %v3260_v46 = vshll.u32 %v6579_v21, 16 }
 0x144   : > { %v976_v8 = vpop.f32.mrf.mxu1  ;;  %v5097_v35 = vpop.f32.mrf.mxu0  ;;  %5348 = vmatmul.mubr.msk.bf16.gmra.mxu0 %vm519_vm1, %v3594_v62  ;;  %v3257_v62 = vshrl.u32 %v6579_v21, 16  ;;  %v3254_v17 = vor.u32 %v3253_v63, %v3250_v54 }
 0x145   : > { %v6588_v16 = vadd.f32 %v5097_v35, %v982_v30  ;;  %5351 = vmatprep.mubr.msk.bf16.mxu0 %vm519_vm1, %v3596_v57  ;;  %v7030_v30 = vld [vmem:[#allocation17_spill] sm:$0xff]  ;;  %v3598_v35 = vsel %vm3569_vm5, %v3595_v33, %v3597_v26  ;;  %v3262_v54 = vrot.slane %v3260_v46, 3 }
 0x146   : > { %v5109_v56 = vpop.f32.mrf.mxu1  ;;  %5308 = vmatmul.mubr.msk.bf16.gmra.mxu1 %vm519_vm1, %v3228_v29  ;;  %v1279_v39 = vpop.f32.mrf.mxu0  ;;  %v977_v29 = vadd.f32 %v976_v8, %v7030_v30  ;;  %v3255_v27 = vsel %vm3094_vm6, %v3245_v60, %v3254_v17 }
 0x147   : > { %v1763_v12 = vadd.f32 %v5109_v56, %v6381_v47  ;;  %v6597_v25 = vadd.f32 %v1279_v39, %v974_v5  ;;  %5311 = vmatprep.mubr.msk.bf16.mxu1 %vm519_vm1, %v3237_v38  ;;  %v3246_v47 = vsel %vm3094_vm6, %v3236_v13, %v3245_v60  ;;  %v3600_v5 = vsel %vm3569_vm5, %v3597_v26, %v3599_v48 }
 0x148   : > { %v1618_v23 = vpop.f32.mrf.mxu1  ;;  %v5098_v57 = vpop.f32.mrf.mxu0  ;;  %v3259_v39 = vrot.slane %v3257_v62, 2  ;;  %v3601_v13 = vrot.slane %v6370_v50, 3  ;;  %v3603_v62 = vrot.slane %v6376_v4, 3 }
 0x149   : > { %v1761_v3 = vadd.f32 %v1618_v23, %v7031_v31  ;;  %v6603_v37 = vadd.f32 %v5098_v57, %v985_v52 }
 0x14a   : > { %v5110_v43 = vpop.f32.mrf.mxu1  ;;  %v1282_v59 = vpop.f32.mrf.mxu0  ;;  %v3263_v60 = vor.u32 %v3262_v54, %v3259_v39  ;;  %v3602_v50 = vsel %vm3569_vm5, %v3599_v48, %v3601_v13  ;;  %v3605_v48 = vrot.slane %v6579_v21, 3 }
 0x14b   : > { %v1764_v38 = vadd.f32 %v5110_v43, %v6398_v34  ;;  %v6609_v56 = vadd.f32 %v1282_v59, %v977_v29 }
 0x14c   : > { %v1621_v63 = vpop.f32.mrf.mxu1  ;;  %v5153_v8 = vpop.f32.mrf.mxu0  ;;  %5352 = vmatmul.mubr.msk.bf16.gmra.mxu0 %vm519_vm1, %v3598_v35  ;;  %v3604_v35 = vsel %vm3569_vm5, %v3601_v13, %v3603_v62 }
 0x14d   : > { %v1762_v33 = vadd.f32 %v1621_v63, %v6404_v41  ;;  %v6614_v52 = vadd.f32 %v5153_v8, %v1763_v12  ;;  %5355 = vmatprep.mubr.msk.bf16.mxu0 %vm519_vm1, %v3600_v5 }
 0x14e   : > { %v5113_v26 = vpop.f32.mrf.mxu1  ;;  %5312 = vmatmul.mubr.msk.bf16.gmra.mxu1 %vm519_vm1, %v3246_v47  ;;  %v2093_v34 = vpop.f32.mrf.mxu0 }
 0x14f   : > { %v1767_v46 = vadd.f32 %v5113_v26, %v6409_v0  ;;  %v6621_v23 = vadd.f32 %v2093_v34, %v1761_v3  ;;  %5315 = vmatprep.mubr.msk.bf16.mxu1 %vm519_vm1, %v3255_v27  ;;  %v3264_v3 = vsel %vm3094_vm6, %v3254_v17, %v3263_v60 }
 0x150   : > { %v1634_v41 = vpop.f32.mrf.mxu1  ;;  %v5154_v12 = vpop.f32.mrf.mxu0 }
 0x151   : > { %v1765_v57 = vadd.f32 %v1634_v41, %v6417_v6  ;;  %v6625_v30 = vadd.f32 %v5154_v12, %v1764_v38 }
 0x152   : > { %v5114_v29 = vpop.f32.mrf.mxu1  ;;  %v2096_v31 = vpop.f32.mrf.mxu0 }
 0x153   : > { %v1768_v4 = vadd.f32 %v5114_v29, %v6423_v40  ;;  %v6630_v0 = vadd.f32 %v2096_v31, %v1762_v33 }
 0x154   : > { %v1637_v43 = vpop.f32.mrf.mxu1  ;;  %v5157_v59 = vpop.f32.mrf.mxu0  ;;  %5356 = vmatmul.mubr.msk.bf16.gmra.mxu0 %vm519_vm1, %v3602_v50 }
 0x155   : > { %v1766_v6 = vadd.f32 %v1637_v43, %v6427_v2  ;;  %v6635_v47 = vadd.f32 %v5157_v59, %v1767_v46  ;;  %5359 = vmatprep.mubr.msk.bf16.mxu0 %vm519_vm1, %v3604_v35  ;;  %v3606_v2 = vsel %vm3569_vm5, %v3603_v62, %v3605_v48 }
 0x156   : > { %v5117_v5 = vpop.f32.mrf.mxu1  ;;  %5316 = vmatmul.mubr.msk.bf16.gmra.mxu1 %vm519_vm1, %v3264_v3  ;;  %v2109_v40 = vpop.f32.mrf.mxu0 }
 0x157   : > { %v1771_v38 = vadd.f32 %v5117_v5, %v6433_v22  ;;  %v6641_v39 = vadd.f32 %v2109_v40, %v1765_v57 }
 0x158   : > { %v1650_v17 = vpop.f32.mrf.mxu1  ;;  %v5158_v54 = vpop.f32.mrf.mxu0 }
 0x159   : > { %v1769_v63 = vadd.f32 %v1650_v17, %v6439_v61  ;;  %v6644_v8 = vadd.f32 %v5158_v54, %v1768_v4 }
 0x15a   : > { %v5118_v27 = vpop.f32.mrf.mxu1  ;;  %v2112_v33 = vpop.f32.mrf.mxu0 }
 0x15b   : > { %v1772_v21 = vadd.f32 %v5118_v27, %v6447_v58  ;;  %v6648_v13 = vadd.f32 %v2112_v33, %v1766_v6 }
 0x15c   : > { %v1653_v26 = vpop.f32.mrf.mxu1  ;;  %v5161_v34 = vpop.f32.mrf.mxu0  ;;  %5360 = vmatmul.mubr.msk.bf16.gmra.mxu0 %vm519_vm1, %v3606_v2 }
 0x15d   : > { %v1770_v22 = vadd.f32 %v1653_v26, %v6451_v1  ;;  %v6652_v46 = vadd.f32 %v5161_v34, %v1771_v38 }
 0x15e   : > { %v5121_v60 = vpop.f32.mrf.mxu1  ;;  %v2125_v61 = vpop.f32.mrf.mxu0 }
 0x15f   : > { %v1775_v41 = vadd.f32 %v5121_v60, %v6457_v42  ;;  %v6655_v12 = vadd.f32 %v2125_v61, %v1769_v63 }
 0x160   : > { %v1666_v62 = vpop.f32.mrf.mxu1  ;;  %v5162_v57 = vpop.f32.mrf.mxu0 }
 0x161   : > { %v1773_v58 = vadd.f32 %v1666_v62, %v6465_v15  ;;  %v6658_v50 = vadd.f32 %v5162_v57, %v1772_v21 }
 0x162   : > { %v5122_v29 = vpop.f32.mrf.mxu1  ;;  %v2128_v31 = vpop.f32.mrf.mxu0 }
 0x163   : > { %v1776_v35 = vadd.f32 %v5122_v29, %v6471_v20  ;;  %v6661_v4 = vadd.f32 %v2128_v31, %v1770_v22 }
 0x164   : > { %v1669_v1 = vpop.f32.mrf.mxu1  ;;  %v5165_v3 = vpop.f32.mrf.mxu0 }
 0x165   : > { %v1774_v43 = vadd.f32 %v1669_v1, %v6474_v7  ;;  %v6664_v59 = vadd.f32 %v5165_v3, %v1775_v41 }
 0x166   : > { %v5125_v42 = vpop.f32.mrf.mxu1  ;;  %v2141_v6 = vpop.f32.mrf.mxu0 }
 0x167   : > { %v1779_v48 = vadd.f32 %v5125_v42, %v6481_v45  ;;  %v6667_v5 = vadd.f32 %v2141_v6, %v1773_v58 }
 0x168   : > { %v1682_v15 = vpop.f32.mrf.mxu1  ;;  %v5166_v40 = vpop.f32.mrf.mxu0 }
 0x169   : > { %v1777_v38 = vadd.f32 %v1682_v15, %v6487_v18  ;;  %v6670_v17 = vadd.f32 %v5166_v40, %v1776_v35 }
 0x16a   : > { %v5126_v20 = vpop.f32.mrf.mxu1  ;;  %v2144_v54 = vpop.f32.mrf.mxu0 }
 0x16b   : > { %v1780_v63 = vadd.f32 %v5126_v20, %v6494_v28  ;;  %v6673_v2 = vadd.f32 %v2144_v54, %v1774_v43 }
 0x16c   : > { %v1685_v7 = vpop.f32.mrf.mxu1  ;;  %v5169_v27 = vpop.f32.mrf.mxu0 }
 0x16d   : > { %v1778_v33 = vadd.f32 %v1685_v7, %v6501_v36  ;;  %v6676_v21 = vadd.f32 %v5169_v27, %v1779_v48 }
 0x16e   : > { %v5129_v45 = vpop.f32.mrf.mxu1  ;;  %v2157_v26 = vpop.f32.mrf.mxu0 }
 0x16f   : > { %v1783_v34 = vadd.f32 %v5129_v45, %v6507_v9  ;;  %v6679_v22 = vadd.f32 %v2157_v26, %v1777_v38 }
 0x170   : > { %v1698_v18 = vpop.f32.mrf.mxu1  ;;  %v5170_v60 = vpop.f32.mrf.mxu0 }
 0x171   : > { %v1781_v61 = vadd.f32 %v1698_v18, %v6516_v44  ;;  %v6682_v41 = vadd.f32 %v5170_v60, %v1780_v63 }
 0x172   : > { %v5130_v28 = vpop.f32.mrf.mxu1  ;;  %v2160_v62 = vpop.f32.mrf.mxu0 }
 0x173   : > { %v1784_v57 = vadd.f32 %v5130_v28, %v6522_v14  ;;  %v6685_v58 = vadd.f32 %v2160_v62, %v1778_v33 }
 0x174   : > { %v1701_v36 = vpop.f32.mrf.mxu1  ;;  %v5173_v29 = vpop.f32.mrf.mxu0 }
 0x175   : > { %v1782_v31 = vadd.f32 %v1701_v36, %v6527_v49  ;;  %v6688_v35 = vadd.f32 %v5173_v29, %v1783_v34 }
 0x176   : > { %v5133_v9 = vpop.f32.mrf.mxu1  ;;  %v2173_v1 = vpop.f32.mrf.mxu0 }
 0x177   : > { %v1787_v3 = vadd.f32 %v5133_v9, %v6533_v11  ;;  %v6691_v43 = vadd.f32 %v2173_v1, %v1781_v61 }
 0x178   : > { %v1714_v44 = vpop.f32.mrf.mxu1  ;;  %v5174_v42 = vpop.f32.mrf.mxu0 }
 0x179   : > { %v1785_v6 = vadd.f32 %v1714_v44, %v6540_v24  ;;  %v6694_v48 = vadd.f32 %v5174_v42, %v1784_v57 }
 0x17a   : > { %v5134_v14 = vpop.f32.mrf.mxu1  ;;  %v2176_v15 = vpop.f32.mrf.mxu0 }
 0x17b   : > { %v1788_v40 = vadd.f32 %v5134_v14, %v6548_v51  ;;  %v6697_v38 = vadd.f32 %v2176_v15, %v1782_v31 }
 0x17c   : > { %v1717_v49 = vpop.f32.mrf.mxu1  ;;  %v5177_v20 = vpop.f32.mrf.mxu0 }
 0x17d   : > { %v1786_v54 = vadd.f32 %v1717_v49, %v6554_v55  ;;  %v6700_v63 = vadd.f32 %v5177_v20, %v1787_v3 }
 0x17e   : > { %v5137_v11 = vpop.f32.mrf.mxu1  ;;  %v2189_v7 = vpop.f32.mrf.mxu0 }
 0x17f   : > { %v1791_v27 = vadd.f32 %v5137_v11, %v6559_v19  ;;  %v6703_v33 = vadd.f32 %v2189_v7, %v1785_v6 }
 0x180   : > { %v1730_v24 = vpop.f32.mrf.mxu1  ;;  %v5178_v45 = vpop.f32.mrf.mxu0 }
 0x181   : > { %v1789_v26 = vadd.f32 %v1730_v24, %v6568_v32  ;;  %v6706_v34 = vadd.f32 %v5178_v45, %v1788_v40 }
 0x182   : > { %v5138_v51 = vpop.f32.mrf.mxu1  ;;  %v2192_v18 = vpop.f32.mrf.mxu0 }
 0x183   : > { %v1792_v60 = vadd.f32 %v5138_v51, %v6574_v10  ;;  %v6709_v61 = vadd.f32 %v2192_v18, %v1786_v54 }
 0x184   : > { %v1733_v55 = vpop.f32.mrf.mxu1  ;;  %v5181_v28 = vpop.f32.mrf.mxu0 }
 0x185   : > { %v1790_v62 = vadd.f32 %v1733_v55, %v6582_v53  ;;  %v6712_v57 = vadd.f32 %v5181_v28, %v1791_v27 }
 0x186   : > { %v5141_v19 = vpop.f32.mrf.mxu1  ;;  %v2205_v36 = vpop.f32.mrf.mxu0 }
 0x187   : > { %v1795_v29 = vadd.f32 %v5141_v19, %v6588_v16  ;;  %v6715_v31 = vadd.f32 %v2205_v36, %v1789_v26 }
 0x188   : > { %v1746_v32 = vpop.f32.mrf.mxu1  ;;  %v5182_v9 = vpop.f32.mrf.mxu0 }
 0x189   : > { %v1793_v1 = vadd.f32 %v1746_v32, %v6597_v25  ;;  %v6718_v3 = vadd.f32 %v5182_v9, %v1792_v60 }
 0x18a   : > { %v5142_v10 = vpop.f32.mrf.mxu1  ;;  %v2208_v44 = vpop.f32.mrf.mxu0 }
 0x18b   : > { %v1796_v42 = vadd.f32 %v5142_v10, %v6603_v37  ;;  %v6721_v6 = vadd.f32 %v2208_v44, %v1790_v62 }
 0x18c   : > { %v1749_v53 = vpop.f32.mrf.mxu1  ;;  %v5185_v14 = vpop.f32.mrf.mxu0 }
 0x18d   : > { %v1794_v15 = vadd.f32 %v1749_v53, %v6609_v56  ;;  %v6724_v40 = vadd.f32 %v5185_v14, %v1795_v29 }
 0x18e   : > { %v5197_v16 = vpop.f32.mrf.mxu1  ;;  %v2221_v49 = vpop.f32.mrf.mxu0 }
 0x18f   : > { %v2580_v20 = vadd.f32 %v5197_v16, %v6614_v52  ;;  %v6727_v54 = vadd.f32 %v2221_v49, %v1793_v1 }
 0x190   : > { %v2435_v25 = vpop.f32.mrf.mxu1  ;;  %v5186_v11 = vpop.f32.mrf.mxu0 }
 0x191   : > { %v2578_v7 = vadd.f32 %v2435_v25, %v6621_v23  ;;  %v6730_v27 = vadd.f32 %v5186_v11, %v1796_v42 }
 0x192   : > { %v5198_v37 = vpop.f32.mrf.mxu1  ;;  %v2224_v24 = vpop.f32.mrf.mxu0 }
 0x193   : > { %v2581_v45 = vadd.f32 %v5198_v37, %v6625_v30  ;;  %v6733_v26 = vadd.f32 %v2224_v24, %v1794_v15 }
 0x194   : > { %v2438_v56 = vpop.f32.mrf.mxu1  ;;  %v5241_v51 = vpop.f32.mrf.mxu0 }
 0x195   : > { %v2579_v18 = vadd.f32 %v2438_v56, %v6630_v0  ;;  %v6736_v60 = vadd.f32 %v5241_v51, %v2580_v20 }
 0x196   : > { %v5201_v52 = vpop.f32.mrf.mxu1  ;;  %v2902_v55 = vpop.f32.mrf.mxu0 }
 0x197   : > { %v2584_v28 = vadd.f32 %v5201_v52, %v6635_v47  ;;  %v6739_v62 = vadd.f32 %v2902_v55, %v2578_v7 }
 0x198   : > { %v2451_v23 = vpop.f32.mrf.mxu1  ;;  %v5242_v19 = vpop.f32.mrf.mxu0 }
 0x199   : > { %v2582_v36 = vadd.f32 %v2451_v23, %v6641_v39  ;;  %v6742_v29 = vadd.f32 %v5242_v19, %v2581_v45 }
 0x19a   : > { %v5202_v30 = vpop.f32.mrf.mxu1  ;;  %v2905_v32 = vpop.f32.mrf.mxu0 }
 0x19b   : > { %v2585_v9 = vadd.f32 %v5202_v30, %v6644_v8  ;;  %v6745_v1 = vadd.f32 %v2905_v32, %v2579_v18 }
 0x19c   : > { %v2454_v0 = vpop.f32.mrf.mxu1  ;;  %v5245_v10 = vpop.f32.mrf.mxu0 }
 0x19d   : > { %v2583_v44 = vadd.f32 %v2454_v0, %v6648_v13  ;;  %v6748_v42 = vadd.f32 %v5245_v10, %v2584_v28 }
 0x19e   : > { %v5205_v47 = vpop.f32.mrf.mxu1  ;;  %v2918_v53 = vpop.f32.mrf.mxu0 }
 0x19f   : > { %v2588_v14 = vadd.f32 %v5205_v47, %v6652_v46  ;;  %v6751_v15 = vadd.f32 %v2918_v53, %v2582_v36 }
 0x1a0   : > { %v2467_v39 = vpop.f32.mrf.mxu1  ;;  %v5246_v16 = vpop.f32.mrf.mxu0 }
 0x1a1   : > { %v2586_v49 = vadd.f32 %v2467_v39, %v6655_v12  ;;  %v6754_v20 = vadd.f32 %v5246_v16, %v2585_v9 }
 0x1a2   : > { %v5206_v8 = vpop.f32.mrf.mxu1  ;;  %v2921_v25 = vpop.f32.mrf.mxu0 }
 0x1a3   : > { %v2589_v11 = vadd.f32 %v5206_v8, %v6658_v50  ;;  %v6757_v7 = vadd.f32 %v2921_v25, %v2583_v44 }
 0x1a4   : > { %v2470_v13 = vpop.f32.mrf.mxu1  ;;  %v5249_v37 = vpop.f32.mrf.mxu0 }
 0x1a5   : > { %v2587_v24 = vadd.f32 %v2470_v13, %v6661_v4  ;;  %v6760_v45 = vadd.f32 %v5249_v37, %v2588_v14 }
 0x1a6   : > { %v5209_v46 = vpop.f32.mrf.mxu1  ;;  %v2934_v56 = vpop.f32.mrf.mxu0 }
 0x1a7   : > { %v2592_v51 = vadd.f32 %v5209_v46, %v6664_v59  ;;  %v6763_v18 = vadd.f32 %v2934_v56, %v2586_v49 }
 0x1a8   : > { %v2483_v12 = vpop.f32.mrf.mxu1  ;;  %v5250_v52 = vpop.f32.mrf.mxu0 }
 0x1a9   : > { %v2590_v55 = vadd.f32 %v2483_v12, %v6667_v5  ;;  %v6766_v28 = vadd.f32 %v5250_v52, %v2589_v11 }
 0x1aa   : > { %v5210_v50 = vpop.f32.mrf.mxu1  ;;  %v2937_v23 = vpop.f32.mrf.mxu0 }
 0x1ab   : > { %v2593_v19 = vadd.f32 %v5210_v50, %v6670_v17  ;;  %v6769_v36 = vadd.f32 %v2937_v23, %v2587_v24 }
 0x1ac   : > { %v2486_v4 = vpop.f32.mrf.mxu1  ;;  %v5253_v30 = vpop.f32.mrf.mxu0 }
 0x1ad   : > { %v2591_v32 = vadd.f32 %v2486_v4, %v6673_v2  ;;  %v6772_v9 = vadd.f32 %v5253_v30, %v2592_v51 }
 0x1ae   : > { %v5213_v59 = vpop.f32.mrf.mxu1  ;;  %v2950_v0 = vpop.f32.mrf.mxu0 }
 0x1af   : > { %v2596_v10 = vadd.f32 %v5213_v59, %v6676_v21  ;;  %v6775_v44 = vadd.f32 %v2950_v0, %v2590_v55 }
 0x1b0   : > { %v2499_v5 = vpop.f32.mrf.mxu1  ;;  %v5254_v47 = vpop.f32.mrf.mxu0 }
 0x1b1   : > { %v2594_v53 = vadd.f32 %v2499_v5, %v6679_v22  ;;  %v6778_v14 = vadd.f32 %v5254_v47, %v2593_v19 }
 0x1b2   : > { %v5214_v17 = vpop.f32.mrf.mxu1  ;;  %v2953_v39 = vpop.f32.mrf.mxu0 }
 0x1b3   : > { %v2597_v16 = vadd.f32 %v5214_v17, %v6682_v41  ;;  %v6781_v49 = vadd.f32 %v2953_v39, %v2591_v32 }
 0x1b4   : > { %v2502_v2 = vpop.f32.mrf.mxu1  ;;  %v5257_v8 = vpop.f32.mrf.mxu0 }
 0x1b5   : > { %v2595_v25 = vadd.f32 %v2502_v2, %v6685_v58  ;;  %v6784_v11 = vadd.f32 %v5257_v8, %v2596_v10 }
 0x1b6   : > { %v5217_v21 = vpop.f32.mrf.mxu1  ;;  %v2966_v13 = vpop.f32.mrf.mxu0 }
 0x1b7   : > { %v2600_v37 = vadd.f32 %v5217_v21, %v6688_v35  ;;  %v6787_v24 = vadd.f32 %v2966_v13, %v2594_v53 }
 0x1b8   : > { %v2515_v22 = vpop.f32.mrf.mxu1  ;;  %v5258_v46 = vpop.f32.mrf.mxu0 }
 0x1b9   : > { %v2598_v56 = vadd.f32 %v2515_v22, %v6691_v43  ;;  %v6790_v51 = vadd.f32 %v5258_v46, %v2597_v16 }
 0x1ba   : > { %v5218_v41 = vpop.f32.mrf.mxu1  ;;  %v2969_v12 = vpop.f32.mrf.mxu0 }
 0x1bb   : > { %v2601_v52 = vadd.f32 %v5218_v41, %v6694_v48  ;;  %v6793_v55 = vadd.f32 %v2969_v12, %v2595_v25 }
 0x1bc   : > { %v2518_v58 = vpop.f32.mrf.mxu1  ;;  %v5261_v50 = vpop.f32.mrf.mxu0 }
 0x1bd   : > { %v2599_v23 = vadd.f32 %v2518_v58, %v6697_v38  ;;  %v6796_v19 = vadd.f32 %v5261_v50, %v2600_v37 }
 0x1be   : > { %v5221_v35 = vpop.f32.mrf.mxu1  ;;  %v2982_v4 = vpop.f32.mrf.mxu0 }
 0x1bf   : > { %v2604_v30 = vadd.f32 %v5221_v35, %v6700_v63  ;;  %v6799_v32 = vadd.f32 %v2982_v4, %v2598_v56 }
 0x1c0   : > { %v2531_v43 = vpop.f32.mrf.mxu1  ;;  %v5262_v59 = vpop.f32.mrf.mxu0 }
 0x1c1   : > { %v2602_v0 = vadd.f32 %v2531_v43, %v6703_v33  ;;  %v6802_v10 = vadd.f32 %v5262_v59, %v2601_v52 }
 0x1c2   : > { %v5222_v48 = vpop.f32.mrf.mxu1  ;;  %v2985_v5 = vpop.f32.mrf.mxu0 }
 0x1c3   : > { %v2605_v47 = vadd.f32 %v5222_v48, %v6706_v34  ;;  %v6805_v53 = vadd.f32 %v2985_v5, %v2599_v23 }
 0x1c4   : > { %v2534_v38 = vpop.f32.mrf.mxu1  ;;  %v5265_v17 = vpop.f32.mrf.mxu0 }
 0x1c5   : > { %v2603_v39 = vadd.f32 %v2534_v38, %v6709_v61  ;;  %v6808_v16 = vadd.f32 %v5265_v17, %v2604_v30 }
 0x1c6   : > { %v5225_v63 = vpop.f32.mrf.mxu1  ;;  %v2998_v2 = vpop.f32.mrf.mxu0 }
 0x1c7   : > { %v2608_v8 = vadd.f32 %v5225_v63, %v6712_v57  ;;  %v6811_v25 = vadd.f32 %v2998_v2, %v2602_v0 }
 0x1c8   : > { %v2547_v33 = vpop.f32.mrf.mxu1  ;;  %v5266_v21 = vpop.f32.mrf.mxu0 }
 0x1c9   : > { %v2606_v13 = vadd.f32 %v2547_v33, %v6715_v31  ;;  %v6814_v37 = vadd.f32 %v5266_v21, %v2605_v47 }
 0x1ca   : > { %v5226_v34 = vpop.f32.mrf.mxu1  ;;  %v3001_v22 = vpop.f32.mrf.mxu0 }
 0x1cb   : > { %v2609_v46 = vadd.f32 %v5226_v34, %v6718_v3  ;;  %v6817_v56 = vadd.f32 %v3001_v22, %v2603_v39 }
 0x1cc   : > { %v2550_v61 = vpop.f32.mrf.mxu1  ;;  %v5269_v41 = vpop.f32.mrf.mxu0 }
 0x1cd   : > { %v2607_v12 = vadd.f32 %v2550_v61, %v6721_v6  ;;  %v6820_v52 = vadd.f32 %v5269_v41, %v2608_v8 }
 0x1ce   : > { %v5229_v57 = vpop.f32.mrf.mxu1  ;;  %v3014_v58 = vpop.f32.mrf.mxu0 }
 0x1cf   : > { %v2612_v50 = vadd.f32 %v5229_v57, %v6724_v40  ;;  %v6823_v23 = vadd.f32 %v3014_v58, %v2606_v13  ;;  %v6852_v57 = vld [vmem:[%s6988_s3] ss:$0 sm:$0xff] }
 0x1d0   : > { %v2563_v31 = vpop.f32.mrf.mxu1  ;;  %v5270_v35 = vpop.f32.mrf.mxu0 }
 0x1d1   : > { %v2610_v4 = vadd.f32 %v2563_v31, %v6727_v54  ;;  %v6826_v30 = vadd.f32 %v5270_v35, %v2609_v46 }
 0x1d2   : > { %v5230_v3 = vpop.f32.mrf.mxu1  ;;  %v3017_v43 = vpop.f32.mrf.mxu0 }
 0x1d3   : > { %v2613_v59 = vadd.f32 %v5230_v3, %v6730_v27  ;;  %v6829_v0 = vadd.f32 %v3017_v43, %v2607_v12 }
 0x1d4   : > { %v2566_v6 = vpop.f32.mrf.mxu1  ;;  %v5273_v48 = vpop.f32.mrf.mxu0 }
 0x1d5   : > { %v2611_v5 = vadd.f32 %v2566_v6, %v6733_v26  ;;  %v6832_v47 = vadd.f32 %v5273_v48, %v2612_v50  ;;  %v6844_v26 = vld [vmem:[%s6987_s2] ss:$0 sm:$0xff] }
 0x1d6   : > { %v5285_v40 = vpop.f32.mrf.mxu1  ;;  %v3030_v38 = vpop.f32.mrf.mxu0 }
 0x1d7   : > { %v6834_v17 = vadd.f32 %v3030_v38, %v2610_v4  ;;  %v3522_v27 = vadd.f32 %v5285_v40, %v6736_v60 }
 0x1d8   : > { %v3377_v39 = vpop.f32.mrf.mxu1  ;;  %v5274_v54 = vpop.f32.mrf.mxu0 }
 0x1d9   : > { %v6836_v63 = vadd.f32 %v5274_v54, %v2613_v59  ;;  %v3520_v34 = vadd.f32 %v3377_v39, %v6739_v62 }
 0x1da   : > { %v5286_v2 = vpop.f32.mrf.mxu1  ;;  %v3033_v8 = vpop.f32.mrf.mxu0 }
 0x1db   : > { %v6839_v33 = vadd.f32 %v3033_v8, %v2611_v5  ;;  %v3523_v41 = vadd.f32 %v5286_v2, %v6742_v29 }
 0x1dc   : > { %v3380_v21 = vpop.f32.mrf.mxu1  ;;  %v5329_v13 = vpop.f32.mrf.mxu0 }
 0x1dd   : > { %v3864_v22 = vadd.f32 %v5329_v13, %v3522_v27  ;;  %v3521_v35 = vadd.f32 %v3380_v21, %v6745_v1 }
 0x1de   : > { %v5289_v46 = vpop.f32.mrf.mxu1  ;;  %v3719_v61 = vpop.f32.mrf.mxu0 }
 0x1df   : > { %v3907_v12 = vmul.f32 %v6844_v26, %v3864_v22  ;;  %v3862_v60 = vadd.f32 %v3719_v61, %v3520_v34  ;;  %v3526_v43 = vadd.f32 %v5289_v46, %v6748_v42 }
 0x1e0   : > { %v3393_v58 = vpop.f32.mrf.mxu1  ;;  %v5330_v50 = vpop.f32.mrf.mxu0 }
 0x1e1   : > { %v3865_v31 = vadd.f32 %v5330_v50, %v3523_v41  ;;  %v3905_v62 = vmul.f32 %v6844_v26, %v3862_v60  ;;  %v3950_v29 = vadd.f32 %v6852_v57, %v3907_v12  ;;  %v3524_v40 = vadd.f32 %v3393_v58, %v6751_v15 }
 0x1e2   : > { %v5290_v4 = vpop.f32.mrf.mxu1  ;;  %v3722_v3 = vpop.f32.mrf.mxu0 }
 0x1e3   : > { %v3908_v59 = vmul.f32 %v6844_v26, %v3865_v31  ;;  %v3863_v48 = vadd.f32 %v3722_v3, %v3521_v35  ;;  %v3948_v1 = vadd.f32 %v6852_v57, %v3905_v62  ;;  %v3986_v42 = vmax.f32 %v3950_v29, 0.0 }
 0x1e4   : > { %v3396_v6 = vpop.f32.mrf.mxu1  ;;  %v5333_v5 = vpop.f32.mrf.mxu0  ;;  %v3527_v13 = vadd.f32 %v5290_v4, %v6754_v20 }
 0x1e5   : > { %v3951_v38 = vadd.f32 %v6852_v57, %v3908_v59  ;;  %v3868_v39 = vadd.f32 %v5333_v5, %v3526_v43  ;;  %v3906_v54 = vmul.f32 %v6844_v26, %v3863_v48  ;;  %v3525_v41 = vadd.f32 %v3396_v6, %v6757_v7 }
 0x1e6   : > { %v5293_v2 = vpop.f32.mrf.mxu1  ;;  %v3735_v8 = vpop.f32.mrf.mxu0  ;;  %v3984_v60 = vmax.f32 %v3948_v1, 0.0 }
 0x1e7   : > { %v3987_v27 = vmax.f32 %v3951_v38, 0.0  ;;  %v3866_v21 = vadd.f32 %v3735_v8, %v3524_v40  ;;  %v3949_v15 = vadd.f32 %v6852_v57, %v3906_v54  ;;  %v3911_v34 = vmul.f32 %v6844_v26, %v3868_v39 }
 0x1e8   : > { %v3409_v22 = vpop.f32.mrf.mxu1  ;;  %v5334_v46 = vpop.f32.mrf.mxu0  ;;  %v3530_v35 = vadd.f32 %v5293_v2, %v6760_v45 }
 0x1e9   : > { %v4670_v61 = vpack.c.bf16 %v3987_v27, %v3986_v42  ;;  %v3909_v12 = vmul.f32 %v6844_v26, %v3866_v21  ;;  %v3985_v58 = vmax.f32 %v3949_v15, 0.0  ;;  %v3869_v50 = vadd.f32 %v5334_v46, %v3527_v13 }
 0x1ea   : > { %v5294_v20 = vpop.f32.mrf.mxu1  ;;  %v3738_v31 = vpop.f32.mrf.mxu0  ;;  %v3954_v3 = vadd.f32 %v6852_v57, %v3911_v34  ;;  %v3528_v7 = vadd.f32 %v3409_v22, %v6763_v18 }
 0x1eb   : > { %4752 = vst [vmem:[%s6868_s29 + $0x8] sm:$0xff] %v4670_v61   ;;  %v3867_v62 = vadd.f32 %v3738_v31, %v3525_v41  ;;  %v4665_v4 = vpack.c.bf16 %v3985_v58, %v3984_v60  ;;  %v3912_v43 = vmul.f32 %v6844_v26, %v3869_v50  ;;  %v3952_v6 = vadd.f32 %v6852_v57, %v3909_v12 }
 0x1ec   : > { %v3412_v29 = vpop.f32.mrf.mxu1  ;;  %v5337_v59 = vpop.f32.mrf.mxu0  ;;  %v3990_v54 = vmax.f32 %v3954_v3, 0.0  ;;  %v3531_v2 = vadd.f32 %v5294_v20, %v6766_v28 }
 0x1ed   : > { %v3910_v48 = vmul.f32 %v6844_v26, %v3867_v62  ;;  %v3872_v5 = vadd.f32 %v5337_v59, %v3530_v35  ;;  %4666 = vst [vmem:[%s6868_s29] sm:$0xff] %v4665_v4   ;;  %v3955_v40 = vadd.f32 %v6852_v57, %v3912_v43  ;;  %v3988_v21 = vmax.f32 %v3952_v6, 0.0 }
 0x1ee   : > { %v5297_v38 = vpop.f32.mrf.mxu1  ;;  %v3751_v45 = vpop.f32.mrf.mxu0  ;;  %v3529_v22 = vadd.f32 %v3412_v29, %v6769_v36 }
 0x1ef   : > { %v3953_v39 = vadd.f32 %v6852_v57, %v3910_v48  ;;  %v3870_v1 = vadd.f32 %v3751_v45, %v3528_v7  ;;  %v3991_v8 = vmax.f32 %v3955_v40, 0.0  ;;  %v3915_v18 = vmul.f32 %v6844_v26, %v3872_v5 }
 0x1f0   : > { %v3425_v42 = vpop.f32.mrf.mxu1  ;;  %v5338_v27 = vpop.f32.mrf.mxu0  ;;  %v3534_v60 = vadd.f32 %v5297_v38, %v6772_v9 }
 0x1f1   : > { %v3989_v13 = vmax.f32 %v3953_v39, 0.0  ;;  %v3913_v15 = vmul.f32 %v6844_v26, %v3870_v1  ;;  %v4680_v34 = vpack.c.bf16 %v3991_v8, %v3990_v54  ;;  %v3873_v61 = vadd.f32 %v5338_v27, %v3531_v2 }
 0x1f2   : > { %v5298_v46 = vpop.f32.mrf.mxu1  ;;  %v3754_v41 = vpop.f32.mrf.mxu0  ;;  %v3958_v28 = vadd.f32 %v6852_v57, %v3915_v18  ;;  %v3532_v35 = vadd.f32 %v3425_v42, %v6775_v44 }
 0x1f3   : > { %v4675_v12 = vpack.c.bf16 %v3989_v13, %v3988_v21  ;;  %4754 = vst [vmem:[%s6868_s29 + $0x18] sm:$0xff] %v4680_v34   ;;  %v3916_v58 = vmul.f32 %v6844_v26, %v3873_v61  ;;  %v3871_v50 = vadd.f32 %v3754_v41, %v3529_v22  ;;  %v3956_v62 = vadd.f32 %v6852_v57, %v3913_v15 }
 0x1f4   : > { %v3428_v20 = vpop.f32.mrf.mxu1  ;;  %v5341_v31 = vpop.f32.mrf.mxu0  ;;  %v3535_v29 = vadd.f32 %v5298_v46, %v6778_v14  ;;  %v3994_v6 = vmax.f32 %v3958_v28, 0.0 }
 0x1f5   : > { %4753 = vst [vmem:[%s6868_s29 + $0x10] sm:$0xff] %v4675_v12   ;;  %v3876_v36 = vadd.f32 %v5341_v31, %v3534_v60  ;;  %v3959_v4 = vadd.f32 %v6852_v57, %v3916_v58  ;;  %v3914_v3 = vmul.f32 %v6844_v26, %v3871_v50  ;;  %v3992_v38 = vmax.f32 %v3956_v62, 0.0 }
 0x1f6   : > { %v5301_v43 = vpop.f32.mrf.mxu1  ;;  %v3767_v9 = vpop.f32.mrf.mxu0  ;;  %v3533_v1 = vadd.f32 %v3428_v20, %v6781_v49 }
 0x1f7   : > { %v3919_v59 = vmul.f32 %v6844_v26, %v3876_v36  ;;  %v3874_v7 = vadd.f32 %v3767_v9, %v3532_v35  ;;  %v3995_v48 = vmax.f32 %v3959_v4, 0.0  ;;  %v3957_v5 = vadd.f32 %v6852_v57, %v3914_v3 }
 0x1f8   : > { %v3441_v44 = vpop.f32.mrf.mxu1  ;;  %v5342_v40 = vpop.f32.mrf.mxu0  ;;  %v3538_v18 = vadd.f32 %v5301_v43, %v6784_v11 }
 0x1f9   : > { %v3877_v45 = vadd.f32 %v5342_v40, %v3535_v29  ;;  %v4690_v39 = vpack.c.bf16 %v3995_v48, %v3994_v6  ;;  %v3993_v54 = vmax.f32 %v3957_v5, 0.0  ;;  %v3917_v2 = vmul.f32 %v6844_v26, %v3874_v7 }
 0x1fa   : > { %v5302_v14 = vpop.f32.mrf.mxu1  ;;  %v3770_v8 = vpop.f32.mrf.mxu0  ;;  %v3962_v42 = vadd.f32 %v6852_v57, %v3919_v59  ;;  %v3536_v22 = vadd.f32 %v3441_v44, %v6787_v24 }
 0x1fb   : > { %v3920_v27 = vmul.f32 %v6844_v26, %v3877_v45  ;;  %4756 = vst [vmem:[%s6868_s29 + $0x28] sm:$0xff] %v4690_v39   ;;  %v4685_v21 = vpack.c.bf16 %v3993_v54, %v3992_v38  ;;  %v3875_v15 = vadd.f32 %v3770_v8, %v3533_v1  ;;  %v3960_v61 = vadd.f32 %v6852_v57, %v3917_v2 }
 0x1fc   : > { %v3444_v13 = vpop.f32.mrf.mxu1  ;;  %v5345_v34 = vpop.f32.mrf.mxu0  ;;  %v3998_v60 = vmax.f32 %v3962_v42, 0.0  ;;  %v3539_v20 = vadd.f32 %v5302_v14, %v6790_v51 }
 0x1fd   : > { %v3963_v49 = vadd.f32 %v6852_v57, %v3920_v27  ;;  %v3880_v46 = vadd.f32 %v5345_v34, %v3538_v18  ;;  %4755 = vst [vmem:[%s6868_s29 + $0x20] sm:$0xff] %v4685_v21   ;;  %v3918_v41 = vmul.f32 %v6844_v26, %v3875_v15  ;;  %v3537_v36 = vadd.f32 %v3444_v13, %v6793_v55 }
 0x1fe   : > { %v5305_v11 = vpop.f32.mrf.mxu1  ;;  %v3783_v12 = vpop.f32.mrf.mxu0  ;;  %v3996_v3 = vmax.f32 %v3960_v61, 0.0 }
 0x1ff   : > { %v3999_v28 = vmax.f32 %v3963_v49, 0.0  ;;  %v3878_v58 = vadd.f32 %v3783_v12, %v3536_v22  ;;  %v3961_v50 = vadd.f32 %v6852_v57, %v3918_v41  ;;  %v3923_v24 = vmul.f32 %v6844_v26, %v3880_v46 }
 0x200   : > { %v3457_v31 = vpop.f32.mrf.mxu1  ;;  %v5346_v35 = vpop.f32.mrf.mxu0  ;;  %v3542_v51 = vadd.f32 %v5305_v11, %v6796_v19 }
 0x201   : > { %v4700_v62 = vpack.c.bf16 %v3999_v28, %v3998_v60  ;;  %v3921_v4 = vmul.f32 %v6844_v26, %v3878_v58  ;;  %v3997_v43 = vmax.f32 %v3961_v50, 0.0  ;;  %v3881_v29 = vadd.f32 %v5346_v35, %v3539_v20 }
 0x202   : > { %v5306_v9 = vpop.f32.mrf.mxu1  ;;  %v3786_v59 = vpop.f32.mrf.mxu0  ;;  %v3966_v48 = vadd.f32 %v6852_v57, %v3923_v24  ;;  %v3540_v55 = vadd.f32 %v3457_v31, %v6799_v32 }
 0x203   : > { %4758 = vst [vmem:[%s6868_s29 + $0x38] sm:$0xff] %v4700_v62   ;;  %v3879_v7 = vadd.f32 %v3786_v59, %v3537_v36  ;;  %v4695_v6 = vpack.c.bf16 %v3997_v43, %v3996_v3  ;;  %v3924_v5 = vmul.f32 %v6844_v26, %v3881_v29  ;;  %v3964_v38 = vadd.f32 %v6852_v57, %v3921_v4 }
 0x204   : > { %v3460_v44 = vpop.f32.mrf.mxu1  ;;  %v5349_v40 = vpop.f32.mrf.mxu0  ;;  %v4002_v8 = vmax.f32 %v3966_v48, 0.0  ;;  %v3543_v18 = vadd.f32 %v5306_v9, %v6802_v10 }
 0x205   : > { %v3922_v45 = vmul.f32 %v6844_v26, %v3879_v7  ;;  %v3884_v39 = vadd.f32 %v5349_v40, %v3542_v51  ;;  %4757 = vst [vmem:[%s6868_s29 + $0x30] sm:$0xff] %v4695_v6   ;;  %v3967_v1 = vadd.f32 %v6852_v57, %v3924_v5  ;;  %v4000_v13 = vmax.f32 %v3964_v38, 0.0 }
 0x206   : > { %v5309_v54 = vpop.f32.mrf.mxu1  ;;  %v3799_v19 = vpop.f32.mrf.mxu0  ;;  %v3541_v49 = vadd.f32 %v3460_v44, %v6805_v53 }
 0x207   : > { %v3965_v2 = vadd.f32 %v6852_v57, %v3922_v45  ;;  %v3882_v14 = vadd.f32 %v3799_v19, %v3540_v55  ;;  %v4003_v42 = vmax.f32 %v3967_v1, 0.0  ;;  %v3927_v32 = vmul.f32 %v6844_v26, %v3884_v39 }
 0x208   : > { %v3473_v27 = vpop.f32.mrf.mxu1  ;;  %v5350_v21 = vpop.f32.mrf.mxu0  ;;  %v3546_v12 = vadd.f32 %v5309_v54, %v6808_v16 }
 0x209   : > { %v4001_v15 = vmax.f32 %v3965_v2, 0.0  ;;  %v3925_v34 = vmul.f32 %v6844_v26, %v3882_v14  ;;  %v4710_v22 = vpack.c.bf16 %v4003_v42, %v4002_v8  ;;  %v3885_v61 = vadd.f32 %v5350_v21, %v3543_v18 }
 0x20a   : > { %v5310_v46 = vpop.f32.mrf.mxu1  ;;  %v3802_v41 = vpop.f32.mrf.mxu0  ;;  %v3970_v10 = vadd.f32 %v6852_v57, %v3927_v32  ;;  %v3544_v50 = vadd.f32 %v3473_v27, %v6811_v25 }
 0x20b   : > { %v4705_v11 = vpack.c.bf16 %v4001_v15, %v4000_v13  ;;  %4760 = vst [vmem:[%s6868_s29 + $0x48] sm:$0xff] %v4710_v22   ;;  %v3928_v60 = vmul.f32 %v6844_v26, %v3885_v61  ;;  %v3883_v58 = vadd.f32 %v3802_v41, %v3541_v49  ;;  %v3968_v24 = vadd.f32 %v6852_v57, %v3925_v34 }
 0x20c   : > { %v3476_v28 = vpop.f32.mrf.mxu1  ;;  %v5353_v20 = vpop.f32.mrf.mxu0  ;;  %v3547_v36 = vadd.f32 %v5310_v46, %v6814_v37  ;;  %v4006_v43 = vmax.f32 %v3970_v10, 0.0 }
 0x20d   : > { %4759 = vst [vmem:[%s6868_s29 + $0x40] sm:$0xff] %v4705_v11   ;;  %v3888_v53 = vadd.f32 %v5353_v20, %v3546_v12  ;;  %v3971_v31 = vadd.f32 %v6852_v57, %v3928_v60  ;;  %v3926_v35 = vmul.f32 %v6844_v26, %v3883_v58  ;;  %v4004_v51 = vmax.f32 %v3968_v24, 0.0 }
 0x20e   : > { %v5313_v62 = vpop.f32.mrf.mxu1  ;;  %v3815_v16 = vpop.f32.mrf.mxu0  ;;  %v3545_v48 = vadd.f32 %v3476_v28, %v6817_v56 }
 0x20f   : > { %v3931_v4 = vmul.f32 %v6844_v26, %v3888_v53  ;;  %v3886_v3 = vadd.f32 %v3815_v16, %v3544_v50  ;;  %v4007_v9 = vmax.f32 %v3971_v31, 0.0  ;;  %v3969_v29 = vadd.f32 %v6852_v57, %v3926_v35 }
 0x210   : > { %v3489_v25 = vpop.f32.mrf.mxu1  ;;  %v5354_v59 = vpop.f32.mrf.mxu0  ;;  %v3550_v55 = vadd.f32 %v5313_v62, %v6820_v52 }
 0x211   : > { %v3889_v7 = vadd.f32 %v5354_v59, %v3547_v36  ;;  %v4720_v6 = vpack.c.bf16 %v4007_v9, %v4006_v43  ;;  %v4005_v5 = vmax.f32 %v3969_v29, 0.0  ;;  %v3929_v44 = vmul.f32 %v6844_v26, %v3886_v3 }
 0x212   : > { %v5314_v37 = vpop.f32.mrf.mxu1  ;;  %v3818_v40 = vpop.f32.mrf.mxu0  ;;  %v3974_v38 = vadd.f32 %v6852_v57, %v3931_v4  ;;  %v3548_v2 = vadd.f32 %v3489_v25, %v6823_v23 }
 0x213   : > { %v3932_v45 = vmul.f32 %v6844_v26, %v3889_v7  ;;  %4762 = vst [vmem:[%s6868_s29 + $0x58] sm:$0xff] %v4720_v6   ;;  %v4715_v39 = vpack.c.bf16 %v4005_v5, %v4004_v51  ;;  %v3887_v54 = vadd.f32 %v3818_v40, %v3545_v48  ;;  %v3972_v8 = vadd.f32 %v6852_v57, %v3929_v44 }
 0x214   : > { %v3492_v1 = vpop.f32.mrf.mxu1  ;;  %v5357_v19 = vpop.f32.mrf.mxu0  ;;  %v4010_v32 = vmax.f32 %v3974_v38, 0.0  ;;  %v3551_v13 = vadd.f32 %v5314_v37, %v6826_v30 }
 0x215   : > { %v3975_v56 = vadd.f32 %v6852_v57, %v3932_v45  ;;  %v3892_v14 = vadd.f32 %v5357_v19, %v3550_v55  ;;  %4761 = vst [vmem:[%s6868_s29 + $0x50] sm:$0xff] %v4715_v39   ;;  %v3930_v18 = vmul.f32 %v6844_v26, %v3887_v54  ;;  %v3549_v46 = vadd.f32 %v3492_v1, %v6829_v0 }
 0x216   : > { %v5317_v52 = vpop.f32.mrf.mxu1  ;;  %v3831_v42 = vpop.f32.mrf.mxu0  ;;  %v4008_v41 = vmax.f32 %v3972_v8, 0.0 }
 0x217   : > { %v4011_v27 = vmax.f32 %v3975_v56, 0.0  ;;  %v3890_v21 = vadd.f32 %v3831_v42, %v3548_v2  ;;  %v3973_v15 = vadd.f32 %v6852_v57, %v3930_v18  ;;  %v3935_v23 = vmul.f32 %v6844_v26, %v3892_v14 }
 0x218   : > { %v3505_v34 = vpop.f32.mrf.mxu1  ;;  %v5358_v22 = vpop.f32.mrf.mxu0  ;;  %v3554_v60 = vadd.f32 %v5317_v52, %v6832_v47 }
 0x219   : > { %v4730_v49 = vpack.c.bf16 %v4011_v27, %v4010_v32  ;;  %v3933_v61 = vmul.f32 %v6844_v26, %v3890_v21  ;;  %v4009_v11 = vmax.f32 %v3973_v15, 0.0  ;;  %v3893_v12 = vadd.f32 %v5358_v22, %v3551_v13 }
 0x21a   : > { %v3834_v10 = vpop.f32.mrf.mxu0  ;;  %v5318_v30 = vpop.f32.mrf.mxu1  ;;  %v3978_v20 = vadd.f32 %v6852_v57, %v3935_v23  ;;  %v3552_v0 = vadd.f32 %v3505_v34, %v6834_v17 }
 0x21b   : > { %4764 = vst [vmem:[%s6868_s29 + $0x68] sm:$0xff] %v4730_v49   ;;  %v3891_v28 = vadd.f32 %v3834_v10, %v3549_v46  ;;  %v4725_v58 = vpack.c.bf16 %v4009_v11, %v4008_v41  ;;  %v3936_v50 = vmul.f32 %v6844_v26, %v3893_v12  ;;  %v3976_v53 = vadd.f32 %v6852_v57, %v3933_v61 }
 0x21c   : > { %v5361_v24 = vpop.f32.mrf.mxu0  ;;  %v3555_v47 = vadd.f32 %v5318_v30, %v6836_v63  ;;  %v3508_v36 = vpop.f32.mrf.mxu1  ;;  %v4014_v17 = vmax.f32 %v3978_v20, 0.0 }
 0x21d   : > { %v3934_v31 = vmul.f32 %v6844_v26, %v3891_v28  ;;  %v3896_v35 = vadd.f32 %v5361_v24, %v3554_v60  ;;  %4763 = vst [vmem:[%s6868_s29 + $0x60] sm:$0xff] %v4725_v58   ;;  %v3979_v62 = vadd.f32 %v6852_v57, %v3936_v50  ;;  %v4012_v25 = vmax.f32 %v3976_v53, 0.0 }
 0x21e   : > { %v3847_v16 = vpop.f32.mrf.mxu0  ;;  %v3553_v6 = vadd.f32 %v3508_v36, %v6839_v33 }
 0x21f   : > { %v3977_v4 = vadd.f32 %v6852_v57, %v3934_v31  ;;  %v3939_v3 = vmul.f32 %v6844_v26, %v3896_v35  ;;  %v3894_v43 = vadd.f32 %v3847_v16, %v3552_v0  ;;  %v4015_v9 = vmax.f32 %v3979_v62, 0.0 }
 0x220   : > { %v5362_v29 = vpop.f32.mrf.mxu0 }
 0x221   : > { %v4013_v59 = vmax.f32 %v3977_v4, 0.0  ;;  %v3897_v51 = vadd.f32 %v5362_v29, %v3555_v47  ;;  %v4740_v7 = vpack.c.bf16 %v4015_v9, %v4014_v17  ;;  %v3937_v48 = vmul.f32 %v6844_v26, %v3894_v43 }
 0x222   : > { %v3850_v63 = vpop.f32.mrf.mxu0  ;;  %v3982_v44 = vadd.f32 %v6852_v57, %v3939_v3 }
 0x223   : > { %v4735_v5 = vpack.c.bf16 %v4013_v59, %v4012_v25  ;;  %v3940_v37 = vmul.f32 %v6844_v26, %v3897_v51  ;;  %4766 = vst [vmem:[%s6868_s29 + $0x78] sm:$0xff] %v4740_v7   ;;  %v3895_v40 = vadd.f32 %v3850_v63, %v3553_v6  ;;  %v3980_v38 = vadd.f32 %v6852_v57, %v3937_v48 }
 0x224   : > { %v4018_v33 = vmax.f32 %v3982_v44, 0.0 }
 0x225   : > { %4765 = vst [vmem:[%s6868_s29 + $0x70] sm:$0xff] %v4735_v5   ;;  %v3983_v55 = vadd.f32 %v6852_v57, %v3940_v37  ;;  %v3938_v45 = vmul.f32 %v6844_v26, %v3895_v40  ;;  %v4016_v19 = vmax.f32 %v3980_v38, 0.0 }
 0x227   : > { %v4019_v39 = vmax.f32 %v3983_v55, 0.0  ;;  %v3981_v1 = vadd.f32 %v6852_v57, %v3938_v45 }
 0x229   : > { %v4750_v54 = vpack.c.bf16 %v4019_v39, %v4018_v33  ;;  %v4017_v2 = vmax.f32 %v3981_v1, 0.0 }
 0x22b   : > { %4768 = vst [vmem:[%s6868_s29 + $0x88] sm:$0xff] %v4750_v54   ;;  %v4745_v56 = vpack.c.bf16 %v4017_v2, %v4016_v19 }
 0x22d   : > { %4767 = vst [vmem:[%s6868_s29 + $0x80] sm:$0xff] %v4745_v56  }
 0x22e PF: > { %s14_s15 = sadd.s32 1, %s5485_s15  }
 0x22f   : > { %p11_p4 = scmp.ge.s32.totalorder %s14_s15, 4  }
 0x231   :  { %13 = sbr.rel (!%p11_p4) target bundleno = 1 (0x1), region = 74 }

// kernel: inception_b_forward.4
= control target key start
LH: loop header
LB: loop body
LE: loop exit
PB: predicated region body
PF: predicated region fallthrough
CT: control target
= control target key end

     0   :  { %s3226_s18 = smov 0   ;;  %s4346_s0 = inlined_call_operand.vmem [shape: bf16[2,4,65,4], index: 0, kind: input, shape index: {}]   ;;  %s4347_s1 = inlined_call_operand.vmem [shape: bf16[9,4,384], index: 1, kind: input, shape index: {}]   ;;  %s4348_s2 = inlined_call_operand.vmem [shape: f32[1,384], index: 2, kind: input, shape index: {}]   ;;  %s4349_s3 = inlined_call_operand.vmem [shape: f32[1,384], index: 3, kind: input, shape index: {}]   ;;  %s4350_s4 = inlined_call_operand.vmem [shape: f32[2,56,384], index: 4, kind: output, shape index: {0}]   ;;  %s4351_s5 = inlined_call_operand.vmem [shape: f32[2,56,4], index: 5, kind: output, shape index: {1}]  }
   0x1 LB: > { %s2815_s19 = sadd.s32 4294967295, %s3192_s18   ;;  %p2819_p0 = scmp.ge.s32.totalorder %s3192_s18, 1  ;;  %s3192_s18 = sphi %s3226_s18, %s16_s18  }
   0x2   : > { %p190_p1 = scmp.lt.s32.totalorder %s3192_s18, 3 }
   0x4   : > { %p191_p2 = pnand %p2819_p0, %p190_p1 }
   0x6   : > { %194 = sbr.rel (%p191_p2) target bundleno = 442 (0x1ba), region = 36 }
   0xb   : > { %v280_v0 = vlaneseq  ;;  %v3194_v1 = vmov 1983009808   ;;  %v4352_v3 = vmov 0   ;;  %p223_p3 = scmp.lt.s32.totalorder %s2815_s19, 1  ;;  %v246_v5 = vld [vmem:[%s4347_s1] sm:$0x3f] }
   0xc   : > { %v278_v2 = vunpack.c.l.s4 %v3194_v1  ;;  %347 = vmatprep.mubr.bf16.mxu0 %v4352_v3  ;;  %377 = vmatprep.mubr.bf16.mxu1 %v4352_v3  ;;  %v2830_v7 = vld [vmem:[%s4347_s1 + $0x6] sm:$0x3f]  ;;  %v469_v10 = vcombine.high %v246_v5, %v246_v5  ;;  %vm305_vm0 = vcmask 1041408   ;;  %v2857_v12 = vld [vmem:[%s4347_s1 + $0xc] sm:$0x3f]  ;;  %vm292_vm1 = vcmask 31744  }
   0xd   : > { %v3236_v4 = vshrl.u32 %v280_v0, 7  ;;  %s4446_s19 = smov (!%p223_p3, %s2815_s19), 1  ;;  %v276_v8 = vcombine.high %v2830_v7, %v2830_v7  ;;  %v711_v30 = vcombine.high %v2857_v12, %v2857_v12  ;;  %v2878_v31 = vld [vmem:[%s4347_s1 + $0x12] sm:$0x3f]  ;;  %v3323_v42 = vld [vmem:[%s4347_s1 + $0x1e] sm:$0x3f] }
   0xe   : > { %v279_v6 = vunpack.c.0.s8 %v278_v2  ;;  %s3132_s24 = smul.u32 144, %s4446_s19  ;;  %v1024_v37 = vcombine.high %v2878_v31, %v2878_v31  ;;  %v3332_v45 = vld [vmem:[%s4347_s1 + $0x18] sm:$0x3f]  ;;  %vm904_vm2 = vsmask.f32 3328 }
   0xf   : > { %4370 = vst [vmem:[#allocation2_spill] sm:$0xff] %v3236_v4  ;;  %vm905_vm3 = vsmask.f32 7440  ;;  %vm678_vm5 = vsmask.f32 7424  ;;  %s3134_s11 = smul.u32 56, %s4446_s19 }
  0x10   : > { %v3247_v9 = vsub.s32 %v279_v6, %v3236_v4  ;;  %s3254_s27 = scalar_lea.vmem %s4346_s0, %s3132_s24  ;;  %vm3422_vm4 = vmor %vm904_vm2, %vm905_vm3 }
  0x11   : > { %v3260_v13 = vld [vmem:[%s3254_s27 + $0x24] sm:$0xf]  ;;  %v3263_v14 = vld [vmem:[%s3254_s27 + $0x28] sm:$0xf]  ;;  %v3266_v15 = vld [vmem:[%s3254_s27 + $0x3c] sm:$0xf]  ;;  %s3749_s14 = scalar_lea.vmem %s4351_s5, %s3134_s11 }
  0x12   : > { %v283_v11 = vrot.slane %v2830_v7, %v3247_v9  ;;  %v290_v18 = vrot.slane %v276_v8, %v3247_v9  ;;  %v483_v19 = vrot.slane %v469_v10, %v3247_v9  ;;  %v476_v20 = vrot.slane %v246_v5, %v3247_v9  ;;  %v3293_v28 = vld [vmem:[%s3254_s27 + $0x2c] sm:$0xf]  ;;  %v3296_v29 = vld [vmem:[%s3254_s27 + $0x30] sm:$0xf]  ;;  %v3305_v32 = vld [vmem:[%s3254_s27 + $0x34] sm:$0xf] }
  0x13   : > { %v3273_v21 = vrot.slane %v2857_v12, %v3247_v9  ;;  %v2831_v22 = vcombine.low %v3260_v13, %v3263_v14  ;;  %v3281_v23 = vcombine.low %v3266_v15, %v3266_v15  ;;  %v3308_v33 = vld [vmem:[%s3254_s27 + $0x38] sm:$0xf]  ;;  %v2832_v34 = vcombine.low %v3293_v28, %v3296_v29  ;;  %v650_v35 = vld [vmem:[%s3254_s27 + $0x8] sm:$0xf]  ;;  %v651_v44 = vld [vmem:[%s3254_s27 + $0xc] sm:$0xf] }
  0x14   : > { %v291_v16 = vcombine.high %v283_v11, %v283_v11  ;;  %v307_v17 = vsel %vm305_vm0, %v283_v11, 0  ;;  %v313_v24 = vsel %vm305_vm0, %v290_v18, 0  ;;  %v504_v25 = vsel %vm305_vm0, %v483_v19, 0  ;;  %v3326_v43 = vld [vmem:[%s3254_s27 + $0x8] sm:$0xf] }
  0x15   : > { %v484_v26 = vcombine.high %v476_v20, %v476_v20  ;;  %v726_v27 = vcombine.high %v3273_v21, %v3273_v21  ;;  %v3315_v36 = vrot.slane %v711_v30, %v3247_v9  ;;  %v927_v38 = vshll.u32 %v650_v35, 16  ;;  %v3335_v46 = vld [vmem:[%s3254_s27 + $0xc] sm:$0xf]  ;;  %v3339_v47 = vld [vmem:[%s3254_s27 + $0x10] sm:$0xf] }
  0x16   : > { %2835 = vmatprep.subr.msk.bf16.mxu0 %vm305_vm0, %v291_v16  ;;  %3121 = vmatprep.subr.msk.bf16.mxu1 %vm305_vm0, %v291_v16  ;;  %v931_v39 = vshrl.u32 %v650_v35, 16  ;;  %v498_v40 = vsel %vm305_vm0, %v476_v20, 0  ;;  %v2833_v41 = vcombine.low %v3305_v32, %v3308_v33  ;;  %v937_v48 = vshll.u32 %v651_v44, 16  ;;  %v3345_v51 = vld [vmem:[%s3254_s27] sm:$0xf] }
  0x17   : > { %330 = vmatpush1.bf16.msra.mxu0 %v307_v17  ;;  %3122 = vmatpush1.bf16.msra.mxu1 %v307_v17  ;;  %v941_v49 = vshrl.u32 %v651_v44, 16  ;;  %v947_v50 = vshll.u32 %v3339_v47, 16  ;;  %v3351_v54 = vrot.slane %v927_v38, 5  ;;  %v3355_v56 = vld [vmem:[%s3254_s27 + $0x4] sm:$0xf]  ;;  %v3360_v57 = vrot.slane %v1024_v37, %v3247_v9 }
  0x18   : > { %3123 = vmatprep.subr.msk.bf16.mxu1 %vm305_vm0, %v290_v18  ;;  %3124 = vmatprep.subr.msk.bf16.mxu0 %vm305_vm0, %v483_v19  ;;  %v933_v55 = vrot.slane %v931_v39, 4  ;;  %v654_v58 = vld [vmem:[%s3254_s27 + $0x18] sm:$0xf]  ;;  %v3364_v59 = vrot.slane %v2878_v31, %v3247_v9  ;;  %v3368_v60 = vcombine.low %v3326_v43, %v3335_v46  ;;  %v643_v61 = vmax.bf16 %v3293_v28, %v3326_v43  ;;  %v648_v5 = vld [vmem:[%s3254_s27] sm:$0xf] }
  0x19   : > { %v967_v62 = vshll.u32 %v654_v58, 16  ;;  %v971_v63 = vshrl.u32 %v654_v58, 16  ;;  %v644_v0 = vmax.bf16 %v3296_v29, %v3335_v46  ;;  %v3374_v1 = vrot.slane %v937_v48, 5  ;;  %v649_v6 = vld [vmem:[%s3254_s27 + $0x4] sm:$0xf] }
  0x1a   : > { %2836 = vmatmul.mubr.msk.bf16.vlgmr.msra.gmra.mxu0 %vm292_vm1, %v2831_v22  ;;  %2839 = vmatmul.mubr.msk.bf16.vlgmr.msra.gmra.mxu1 %vm292_vm1, %v3281_v23  ;;  %v943_v2 = vrot.slane %v941_v49, 4  ;;  %v3378_v7 = vcombine.low %v650_v35, %v651_v44  ;;  %v2844_v8 = vcombine.low %v3345_v51, %v3355_v56  ;;  %v3383_v10 = vld [vmem:[%s3254_s27 + $0x10] sm:$0xf]  ;;  %v908_v11 = vshrl.u32 %v648_v5, 16  ;;  %v3391_v20 = vld [vmem:[%s3254_s27 + $0x14] sm:$0xf] }
  0x1b   : > { %3032 = vmatpush3.bf16.msra.mxu1 %v313_v24  ;;  %3042 = vmatpush3.bf16.msra.mxu0 %v504_v25  ;;  %v911_v12 = vshll.u32 %v648_v5, 16  ;;  %v917_v16 = vshll.u32 %v649_v6, 16  ;;  %v934_v17 = vor.u32 %v933_v55, %v3351_v54  ;;  %v3386_v18 = vrot.slane %v947_v50, 5  ;;  %v245_v55 = vld [vmem:[%s3254_s27 + $0x18] sm:$0xf] }
  0x1c   : > { %357 = vmatprep.mubr.bf16.mxu0 %v4352_v3  ;;  %3033 = vmatprep.mubr.msk.bf16.mxu1 %vm292_vm1, %v2831_v22  ;;  %v641_v19 = vmax.bf16 %v3260_v13, %v3345_v51  ;;  %v655_v22 = vld [vmem:[%s3254_s27 + $0x1c] sm:$0x1]  ;;  %v921_v24 = vshrl.u32 %v649_v6, 16  ;;  %v3394_v25 = vcombine.low %v648_v5, %v649_v6  ;;  %v973_v30 = vrot.slane %v971_v63, 4  ;;  %v3508_v43 = vld [vmem:[%s3254_s27 + $0x50] sm:$0xf] }
  0x1d   : > { %2848 = vmatprep.subr.msk.bf16.mxu1 %vm305_vm0, %v484_v26  ;;  %2862 = vmatprep.subr.msk.bf16.mxu0 %vm305_vm0, %v726_v27  ;;  %v653_v26 = vld [vmem:[%s3254_s27 + $0x14] sm:$0xf]  ;;  %v3397_v27 = vrot.slane %v967_v62, 5  ;;  %v977_v31 = vshll.u32 %v655_v22, 16  ;;  %v910_v37 = vrot.slane %v908_v11, 4  ;;  %v913_v38 = vrot.slane %v911_v12, 5 }
  0x1e   : > { %v961_v35 = vshrl.u32 %v653_v26, 16  ;;  %v944_v39 = vor.u32 %v943_v2, %v3374_v1  ;;  %v923_v44 = vrot.slane %v921_v24, 4  ;;  %v951_v48 = vshrl.u32 %v3339_v47, 16  ;;  %v3511_v46 = vld [vmem:[%s3254_s27 + $0x54] sm:$0xf] }
  0x1f   : > { %v746_v49 = vsel %vm305_vm0, %v3315_v36, 0  ;;  %v3414_v50 = vcombine.low %v3383_v10, %v3391_v20  ;;  %v682_v62 = vshll.u32 %v3394_v25, 16  ;;  %v2860_v63 = vcombine.low %v3339_v47, %v653_v26 }
  0x20   : > { %v979_v2 = vrot.slane %v977_v31, 5  ;;  %v974_v5 = vor.u32 %v973_v30, %v3397_v27  ;;  %v963_v11 = vrot.slane %v961_v35, 4  ;;  %v914_v12 = vor.u32 %v913_v38, %v910_v37 }
  0x21   : > { %v680_v30 = vshrl.u32 %v3394_v25, 16  ;;  %v691_v31 = vshrl.u32 %v3378_v7, 16  ;;  %v3433_v53 = vcombine.low %v654_v58, %v655_v22  ;;  %v684_v52 = vrot.slane %v682_v62, 1 }
  0x22   : > { %2837 = vmatmul.mubr.msk.bf16.gmra.mxu0 %vm292_vm1, %v2832_v34  ;;  %3034 = vmatmul.mubr.msk.bf16.vlgmr.msra.gmra.mxu1 %vm292_vm1, %v2832_v34  ;;  %v957_v34 = vshll.u32 %v653_v26, 16  ;;  %v975_v24 = vrot.slane %v974_v5, 4  ;;  %v945_v26 = vrot.slane %v944_v39, 4  ;;  %v642_v37 = vmax.bf16 %v3263_v14, %v3355_v56 }
  0x23   : > { %521 = vmatpush1.bf16.msra.mxu1 %v498_v40  ;;  %367 = vmatprep.mubr.bf16.mxu0 %v4352_v3  ;;  %v3405_v40 = vrot.slane %v917_v16, 5  ;;  %v687_v16 = vshll.u32 %v3378_v7, 16  ;;  %v915_v7 = vrot.slane %v914_v12, 4  ;;  %v645_v25 = vmax.bf16 %v3305_v32, %v3383_v10 }
  0x24   : > { %3037 = vmatprep.mubr.msk.bf16.mxu1 %vm292_vm1, %v2833_v41  ;;  %3125 = vmatprep.subr.msk.bf16.mxu1 %vm305_vm0, %v3315_v36  ;;  %v3427_v36 = vrot.slane %v957_v34, 5  ;;  %v1039_v34 = vcombine.high %v3364_v59, %v3364_v59  ;;  %v980_v35 = vsel %vm3422_vm4, %v975_v24, %v979_v2  ;;  %v699_v56 = vshrl.u32 %v2860_v63, 16 }
  0x25   : > { %v924_v47 = vor.u32 %v923_v44, %v3405_v40  ;;  %v689_v38 = vrot.slane %v687_v16, 1  ;;  %v685_v62 = vor.u32 %v684_v52, %v680_v30  ;;  %v3467_v2 = vcombine.low %v245_v55, %v245_v55  ;;  %v3473_v52 = vld [vmem:[%s3254_s27 + $0x84] sm:$0xf]  ;;  %v2871_v16 = vld [vmem:[%s3254_s27 + $0x48] sm:$0xf] }
  0x26   : > { %v964_v58 = vor.u32 %v963_v11, %v3427_v36  ;;  %v920_v5 = vsel %vm3422_vm4, %v915_v7, %v3405_v40  ;;  %4373 = vst [vmem:[#allocation3_spill] sm:$0xff] %v3473_v52  ;;  %v707_v28 = vshrl.u32 %v3433_v53, 16  ;;  %v4374_v13 = vcombine.high %v3332_v45, %v3332_v45 }
  0x27   : > { %v925_v39 = vrot.slane %v924_v47, 4  ;;  %v3498_v47 = vsel %vm678_vm5, %v685_v62, %v689_v38  ;;  %v988_v29 = vmax.bf16 %v920_v5, %v641_v19  ;;  %v3531_v19 = vld [vmem:[%s3254_s27 + $0x58] sm:$0xf]  ;;  %v3562_v7 = vcombine.low %v3508_v43, %v3511_v46  ;;  %v3595_v5 = vld [vmem:[%s3254_s27 + $0x8] sm:$0xf] }
  0x28   : > { %v3525_v51 = vrot.slane %v4374_v13, %v3247_v9 }
  0x29   : > { %v930_v11 = vsel %vm3422_vm4, %v925_v39, %v3351_v54  ;;  %v2872_v54 = vld [vmem:[%s3254_s27 + $0x4c] sm:$0xf] }
  0x2a   : > { %2838 = vmatmul.mubr.msk.bf16.gmra.mxu0 %vm292_vm1, %v2833_v41  ;;  %3038 = vmatmul.mubr.msk.bf16.gmra.mxu1 %vm292_vm1, %v3281_v23  ;;  %v935_v41 = vrot.slane %v934_v17, 4  ;;  %v740_v23 = vsel %vm305_vm0, %v3273_v21, 0  ;;  %v647_v21 = vmax.bf16 %v3266_v15, %v245_v55  ;;  %v953_v17 = vrot.slane %v951_v48, 4  ;;  %v3449_v48 = vld [vmem:[%s3254_s27 + $0x60] sm:$0xf] }
  0x2b   : > { %538 = vmatprep.mubr.bf16.mxu1 %v4352_v3  ;;  %3043 = vmatprep.mubr.msk.bf16.mxu0 %vm292_vm1, %v2844_v8  ;;  %v695_v15 = vshll.u32 %v2860_v63, 16  ;;  %v646_v63 = vmax.bf16 %v3308_v33, %v3391_v20  ;;  %v3568_v39 = vld [vmem:[%s3254_s27 + $0x6c] sm:$0xf] }
  0x2c   : > { %v994_v22 = vmax.bf16 %v980_v35, %v647_v21  ;;  %v954_v44 = vor.u32 %v953_v17, %v3386_v18  ;;  %v940_v14 = vsel %vm3422_vm4, %v935_v41, %v3374_v1  ;;  %v693_v1 = vor.u32 %v691_v31, %v689_v38 }
  0x2d   : > { %v697_v41 = vrot.slane %v695_v15, 1  ;;  %v3477_v21 = vsel %vm305_vm0, %v3360_v57, 0  ;;  %v3488_v40 = vmax.bf16 %v940_v14, %v643_v61  ;;  %v3519_v61 = vsel %vm305_vm0, %v3364_v59, 0 }
  0x2e   : > { %v955_v33 = vrot.slane %v954_v44, 4  ;;  %v1260_v59 = vrot.slane %v3332_v45, %v3247_v9 }
  0x2f   : > { %v3501_v17 = vsel %vm678_vm5, %v693_v1, %v697_v41  ;;  %v1219_v10 = vmax.bf16 %v3508_v43, %v3488_v40  ;;  %v3605_v40 = vld [vmem:[%s3254_s27 + $0x74] sm:$0xf] }
  0x30   : > { %v960_v24 = vsel %vm3422_vm4, %v955_v33, %v3427_v36  ;;  %v1217_v36 = vmax.bf16 %v2871_v16, %v988_v29 }
  0x31   : > { %v992_v44 = vmax.bf16 %v960_v24, %v645_v25  ;;  %v3645_v24 = vld [vmem:[%s3254_s27 + $0x34] sm:$0xf] }
  0x32   : > { %2849 = vmatmul.mubr.msk.bf16.vlgmr.msra.gmra.mxu1 %vm292_vm1, %v2844_v8  ;;  %3044 = vmatmul.mubr.msk.bf16.vlgmr.msra.gmra.mxu0 %vm292_vm1, %v3368_v60  ;;  %v703_v8 = vshll.u32 %v3433_v53, 16  ;;  %v989_v53 = vmax.bf16 %v930_v11, %v642_v37  ;;  %v3601_v11 = vsel %vm305_vm0, %v1260_v59, 0 }
  0x33   : > { %3052 = vmatpush3.bf16.msra.mxu1 %v746_v49  ;;  %763 = vmatpush1.bf16.msra.mxu0 %v740_v23  ;;  %v1223_v49 = vmax.bf16 %v3449_v48, %v994_v22  ;;  %v950_v23 = vsel %vm3422_vm4, %v945_v26, %v3386_v18  ;;  %v965_v18 = vrot.slane %v964_v58, 4  ;;  %v3544_v26 = vld [vmem:[%s3254_s27 + $0x5c] sm:$0xf]  ;;  %v3565_v22 = vld [vmem:[%s3254_s27 + $0x48] sm:$0xf] }
  0x34   : > { %548 = vmatprep.mubr.bf16.mxu1 %v4352_v3  ;;  %3047 = vmatprep.mubr.msk.bf16.mxu0 %vm292_vm1, %v3414_v50  ;;  %v3493_v55 = vmax.bf16 %v950_v23, %v644_v0  ;;  %v705_v12 = vrot.slane %v703_v8, 1  ;;  %4377 = vst [vmem:[#allocation6_spill] sm:$0xff] %v3565_v22  ;;  %v1218_v38 = vmax.bf16 %v2872_v54, %v989_v53  ;;  %v3579_v8 = vld [vmem:[%s3254_s27 + $0x70] sm:$0xf] }
  0x35   : > { %3126 = vmatprep.subr.msk.bf16.mxu0 %vm305_vm0, %v3360_v57  ;;  %2883 = vmatprep.subr.msk.bf16.mxu1 %vm305_vm0, %v1039_v34  ;;  %v3483_v20 = vmax.bf16 %v3473_v52, %v1223_v49  ;;  %v701_v57 = vor.u32 %v699_v56, %v697_v41  ;;  %v970_v0 = vsel %vm3422_vm4, %v965_v18, %v3397_v27  ;;  %v3547_v27 = vld [vmem:[%s3254_s27 + $0x54] sm:$0xf]  ;;  %v1709_v56 = vshrl.u32 %v3565_v22, 16  ;;  %v3632_v53 = vld [vmem:[%s3254_s27 + $0x10] sm:$0xf] }
  0x36   : > { %4376 = vst [vmem:[#allocation5_spill] sm:$0xff] %v3547_v27  ;;  %v3554_v34 = vcombine.low %v2871_v16, %v2872_v54  ;;  %v1738_v45 = vshll.u32 %v3547_v27, 16  ;;  %v1742_v35 = vshrl.u32 %v3547_v27, 16  ;;  %v3558_v37 = vor.u32 %v707_v28, %v705_v12  ;;  %v3615_v16 = vld [vmem:[%s3254_s27 + $0x60] sm:$0xf] }
  0x37   : > { %v3552_v15 = vsel %vm678_vm5, %v701_v57, %v705_v12  ;;  %v993_v58 = vmax.bf16 %v970_v0, %v646_v63  ;;  %v3575_v14 = vcombine.low %v3531_v19, %v3544_v26  ;;  %v3583_v49 = vsel %vm305_vm0, %v3525_v51, 0  ;;  %v3592_v63 = vld [vmem:[%s3254_s27 + $0x4] sm:$0xf]  ;;  %v3608_v57 = vld [vmem:[%s3254_s27 + $0x78] sm:$0xf]  ;;  %4378 = vst [vmem:[#allocation7_spill] sm:$0xff] %v3615_v16 }
  0x38   : > { %v1268_v23 = vcombine.high %v1260_v59, %v1260_v59  ;;  %v1220_v25 = vmax.bf16 %v3511_v46, %v3493_v55  ;;  %v1740_v1 = vrot.slane %v1738_v45, 5  ;;  %v1744_v41 = vrot.slane %v1742_v35, 4  ;;  %v3611_v55 = vld [vmem:[%s3254_s27 + $0x4c] sm:$0xf]  ;;  %v2951_v59 = vld [vmem:[%s3254_s27 + $0x30] sm:$0xf] }
  0x39   : > { %v3598_v18 = vmax.bf16 %v3568_v39, %v1217_v36  ;;  %v1222_v33 = vmax.bf16 %v3544_v26, %v993_v58  ;;  %v1712_v12 = vshll.u32 %v3565_v22, 16  ;;  %v3622_v54 = vmax.bf16 %v3579_v8, %v1218_v38  ;;  %v3629_v46 = vld [vmem:[%s3254_s27 + $0xc] sm:$0xf]  ;;  %v3659_v36 = vld [vmem:[%s3254_s27 + $0x7c] sm:$0xf] }
  0x3a   : > { %2850 = vmatmul.mubr.msk.bf16.gmra.mxu1 %vm292_vm1, %v3368_v60  ;;  %3048 = vmatmul.mubr.msk.bf16.gmra.mxu0 %vm292_vm1, %v3467_v2  ;;  %v3534_v60 = vld [vmem:[%s3254_s27 + $0x50] sm:$0xf]  ;;  %v1221_v28 = vmax.bf16 %v3531_v19, %v992_v44  ;;  %v3625_v29 = vrot.slane %v1709_v56, 4  ;;  %v1718_v43 = vshll.u32 %v3611_v55, 16  ;;  %v1768_v13 = vshll.u32 %v3615_v16, 16  ;;  %4382 = vst [vmem:[#allocation11_spill] sm:$0xff] %v3659_v36 }
  0x3b   : > { %4375 = vst [vmem:[#allocation4_spill] sm:$0xff] %v3534_v60  ;;  %558 = vmatprep.mubr.bf16.mxu1 %v4352_v3  ;;  %780 = vmatprep.mubr.bf16.mxu0 %v4352_v3  ;;  %v1728_v30 = vshll.u32 %v3534_v60, 16  ;;  %v1732_v31 = vshrl.u32 %v3534_v60, 16  ;;  %v3640_v0 = vcombine.low %v3592_v63, %v3595_v5  ;;  %v1449_v26 = vmax.bf16 %v3608_v57, %v1220_v25  ;;  %v3703_v60 = vld [vmem:[%s3254_s27 + $0x18] sm:$0xf] }
  0x3c   : > { %v1772_v45 = vshrl.u32 %v3615_v16, 16  ;;  %v1745_v35 = vor.u32 %v1744_v41, %v1740_v1  ;;  %v1714_v38 = vrot.slane %v1712_v12, 5  ;;  %v3675_v25 = vcombine.low %v3629_v46, %v3632_v53  ;;  %v3696_v16 = vld [vmem:[%s3254_s27 + $0x14] sm:$0xf] }
  0x3d   : > { %v3585_v62 = vrot.slane %v1728_v30, 5  ;;  %v1734_v32 = vrot.slane %v1732_v31, 4  ;;  %4379 = vst [vmem:[#allocation8_spill] sm:$0xff] %v3640_v0  ;;  %v3652_v30 = vld [vmem:[%s3254_s27 + $0x80] sm:$0xf]  ;;  %v3678_v41 = vcombine.low %v2951_v59, %v3645_v24 }
  0x3e   : > { %4380 = vst [vmem:[#allocation9_spill] sm:$0xff] %v3652_v30  ;;  %v3655_v31 = vld [vmem:[%s3254_s27 + $0x58] sm:$0xf]  ;;  %v3662_v58 = vmax.bf16 %v3652_v30, %v1222_v33  ;;  %4384 = vst [vmem:[#allocation13_spill] sm:$0xff] %v3675_v25  ;;  %v3681_v33 = vld [vmem:[%s3254_s27 + $0xc] sm:$0xf] }
  0x3f   : > { %v1735_v19 = vor.u32 %v1734_v32, %v3585_v62  ;;  %4381 = vst [vmem:[#allocation10_spill] sm:$0xff] %v3655_v31  ;;  %v1748_v56 = vshll.u32 %v3655_v31, 16  ;;  %v3668_v32 = vrot.slane %v1718_v43, 5  ;;  %4385 = vst [vmem:[#allocation14_spill] sm:$0xff] %v3678_v41  ;;  %v2527_v4 = vshll.u32 %v3681_v33, 16 }
  0x40   : > { %v1774_v0 = vrot.slane %v1772_v45, 4  ;;  %v1746_v25 = vrot.slane %v1745_v35, 4  ;;  %v2531_v41 = vshrl.u32 %v3681_v33, 16  ;;  %v4387_v35 = vmov 0  }
  0x41   : > { %v1736_v44 = vrot.slane %v1735_v19, 4  ;;  %v3684_v19 = vld [vmem:[%s3254_s27 + $0x64] sm:$0x1] }
  0x42   : > { %2851 = vmatmul.mubr.msk.bf16.gmra.mxu1 %vm292_vm1, %v3414_v50  ;;  %2863 = vmatmul.mubr.msk.bf16.vlgmr.msra.gmra.mxu0 %vm292_vm1, %v3498_v47  ;;  %v1722_v50 = vshrl.u32 %v3611_v55, 16  ;;  %4386 = vst [vmem:[#allocation15_spill] sm:$0xff] %v3684_v19  ;;  %v2533_v45 = vrot.slane %v2531_v41, 4  ;;  %v3723_v41 = vcombine.low %v3696_v16, %v3703_v60 }
  0x43   : > { %3062 = vmatpush3.bf16.msra.mxu0 %v3477_v21  ;;  %568 = vmatprep.mubr.bf16.mxu1 %v4352_v3  ;;  %v1448_v21 = vmax.bf16 %v3605_v40, %v1219_v10  ;;  %v3671_v10 = vld [vmem:[%s3254_s27 + $0x5c] sm:$0xf]  ;;  %v1741_v43 = vsel %vm3422_vm4, %v1736_v44, %v1740_v1  ;;  %v1778_v1 = vshll.u32 %v3684_v19, 16  ;;  %v1715_v44 = vor.u32 %v1714_v38, %v3625_v29 }
  0x44   : > { %790 = vmatprep.mubr.bf16.mxu0 %v4352_v3  ;;  %2904 = vmatprep.subr.msk.bf16.mxu0 %vm305_vm0, %v1268_v23  ;;  %v3666_v23 = vmax.bf16 %v3659_v36, %v1221_v28  ;;  %4383 = vst [vmem:[#allocation12_spill] sm:$0xff] %v3671_v10  ;;  %v1724_v12 = vrot.slane %v1722_v50, 4  ;;  %v3686_v28 = vrot.slane %v1768_v13, 5  ;;  %v3691_v3 = vld [vmem:[%s3254_s27 + $0x10] sm:$0xf]  ;;  %v1750_v36 = vrot.slane %v1748_v56, 5 }
  0x45   : > { %v1791_v52 = vmax.bf16 %v1741_v43, %v1448_v21  ;;  %v3698_v50 = vrot.slane %v2527_v4, 5  ;;  %v1752_v13 = vshrl.u32 %v3655_v31, 16  ;;  %v1758_v30 = vshll.u32 %v3671_v10, 16  ;;  %4388 = vst [vmem:[#allocation16_spill] sm:$0xff] %v3723_v41 }
  0x46   : > { %v2537_v4 = vshll.u32 %v3691_v3, 16  ;;  %v1762_v43 = vshrl.u32 %v3671_v10, 16  ;;  %v1751_v19 = vsel %vm3422_vm4, %v1746_v25, %v1750_v36  ;;  %v1725_v31 = vor.u32 %v1724_v12, %v3668_v32 }
  0x47   : > { %v2019_v21 = vmax.bf16 %v3629_v46, %v1791_v52  ;;  %v1754_v56 = vrot.slane %v1752_v13, 4  ;;  %v2534_v52 = vor.u32 %v2533_v45, %v3698_v50  ;;  %v2541_v46 = vshrl.u32 %v3691_v3, 16 }
  0x48   : > { %v1764_v29 = vrot.slane %v1762_v43, 4  ;;  %v1780_v38 = vrot.slane %v1778_v1, 5  ;;  %v3727_v13 = vrot.slane %v2537_v4, 5  ;;  %v1775_v25 = vor.u32 %v1774_v0, %v3686_v28  ;;  %v3740_v43 = vld [vmem:[%s3254_s27 + $0x4] sm:$0xf] }
  0x49   : > { %v1755_v27 = vor.u32 %v1754_v56, %v1750_v36  ;;  %v3732_v45 = vrot.slane %v3323_v42, %v3247_v9  ;;  %v1792_v10 = vmax.bf16 %v1751_v19, %v1449_v26  ;;  %v2543_v36 = vrot.slane %v2541_v46, 4  ;;  %v2950_v19 = vld [vmem:[%s3254_s27 + $0x2c] sm:$0xf]  ;;  %v3782_v46 = vld [vmem:[%s3254_s27 + $0x8] sm:$0xf] }
  0x4a   : > { %2852 = vmatmul.mubr.msk.bf16.gmra.mxu1 %vm292_vm1, %v3467_v2  ;;  %2864 = vmatmul.mubr.msk.bf16.gmra.mxu0 %vm292_vm1, %v3501_v17  ;;  %v1760_v2 = vrot.slane %v1758_v30, 5  ;;  %v2535_v30 = vrot.slane %v2534_v52, 4  ;;  %v1776_v12 = vrot.slane %v1775_v25, 4  ;;  %v1716_v1 = vrot.slane %v1715_v44, 4 }
  0x4b   : > { %800 = vmatprep.mubr.bf16.mxu0 %v4387_v35  ;;  %3053 = vmatprep.mubr.msk.bf16.mxu1 %vm292_vm1, %v3498_v47  ;;  %v2247_v47 = vmax.bf16 %v2951_v59, %v2019_v21  ;;  %v1756_v22 = vrot.slane %v1755_v27, 4  ;;  %v1726_v56 = vrot.slane %v1725_v31, 4  ;;  %v2949_v31 = vld [vmem:[%s3254_s27 + $0x28] sm:$0xf] }
  0x4c   : > { %v1765_v41 = vor.u32 %v1764_v29, %v1760_v2  ;;  %v2540_v59 = vsel %vm3422_vm4, %v2535_v30, %v3727_v13  ;;  %v1721_v26 = vsel %vm3422_vm4, %v1716_v1, %v3668_v32  ;;  %v2517_v29 = vshll.u32 %v3782_v46, 16 }
  0x4d   : > { %v2590_v21 = vmax.bf16 %v2540_v59, %v2247_v47  ;;  %v1761_v0 = vsel %vm3422_vm4, %v1756_v22, %v1760_v2  ;;  %v1781_v22 = vsel %vm3422_vm4, %v1776_v12, %v1780_v38  ;;  %v1731_v32 = vsel %vm3422_vm4, %v1726_v56, %v3585_v62 }
  0x4e   : > { %v1766_v4 = vrot.slane %v1765_v41, 4  ;;  %v1793_v27 = vmax.bf16 %v1761_v0, %v3666_v23  ;;  %v3766_v2 = vmax.bf16 %v1781_v22, %v3483_v20  ;;  %v1789_v20 = vmax.bf16 %v1721_v26, %v3598_v18  ;;  %v2257_v22 = vld [vmem:[%s3254_s27 + $0x18] sm:$0xf]  ;;  %v2258_v26 = vld [vmem:[%s3254_s27 + $0x1c] sm:$0xf] }
  0x4f   : > { %v2715_v44 = vunpack.c.l.bf16 %v2590_v21  ;;  %v3789_v47 = vcombine.low %v2949_v31, %v2950_v19  ;;  %v2521_v38 = vshrl.u32 %v3782_v46, 16  ;;  %v3800_v30 = vcombine.low %v3449_v48, %v3449_v48 }
  0x50   : > { %v1771_v23 = vsel %vm3422_vm4, %v1766_v4, %v3686_v28  ;;  %v3778_v28 = vld [vmem:[%s3254_s27 + $0x1c] sm:$0xf]  ;;  %v2017_v18 = vmax.bf16 %v3592_v63, %v1789_v20  ;;  %v1530_v48 = vcombine.high %v3732_v45, %v3732_v45 }
  0x51   : > { %v1794_v52 = vmax.bf16 %v1771_v23, %v3662_v58  ;;  %2722 = vst.msk [vmem:[%s3749_s14 + $0x10] sm:$0xff] %vm292_vm1, %v2715_v44  ;;  %v2023_v62 = vmax.bf16 %v3778_v28, %v3766_v2  ;;  %v2954_v58 = vld [vmem:[%s3254_s27 + $0x3c] sm:$0xf]  ;;  %v2523_v12 = vrot.slane %v2521_v38, 4  ;;  %v2557_v2 = vshll.u32 %v2257_v22, 16 }
  0x52   : > { %2865 = vmatmul.mubr.msk.bf16.gmra.mxu0 %vm292_vm1, %v3552_v15  ;;  %3054 = vmatmul.mubr.msk.bf16.vlgmr.msra.gmra.mxu1 %vm292_vm1, %v3501_v17  ;;  %v2508_v17 = vshrl.u32 %v3740_v43, 16  ;;  %v2245_v0 = vmax.bf16 %v2949_v31, %v2017_v18  ;;  %v3834_v38 = vld [vmem:[%s3254_s27 + $0x40] sm:$0xf] }
  0x53   : > { %1076 = vmatpush1.bf16.msra.mxu1 %v3519_v61  ;;  %810 = vmatprep.mubr.bf16.mxu0 %v4387_v35  ;;  %v2020_v61 = vmax.bf16 %v3632_v53, %v1792_v10  ;;  %v2953_v53 = vld [vmem:[%s3254_s27 + $0x38] sm:$0xf]  ;;  %v2544_v10 = vor.u32 %v2543_v36, %v3727_v13  ;;  %v4389_v13 = vcombine.high %v3323_v42, %v3323_v42  ;;  %v2519_v36 = vrot.slane %v2517_v29, 5 }
  0x54   : > { %3057 = vmatprep.mubr.msk.bf16.mxu1 %vm292_vm1, %v3552_v15  ;;  %3127 = vmatprep.subr.msk.bf16.mxu1 %vm305_vm0, %v3525_v51  ;;  %v2510_v41 = vrot.slane %v2508_v17, 4  ;;  %v1790_v15 = vmax.bf16 %v1731_v32, %v3622_v54  ;;  %v2511_v51 = vshll.u32 %v3740_v43, 16  ;;  %v2021_v54 = vmax.bf16 %v3696_v16, %v1793_v27  ;;  %v2256_v27 = vld [vmem:[%s3254_s27 + $0x14] sm:$0xf] }
  0x55   : > { %v3808_v63 = vrot.slane %v4389_v13, %v3247_v9  ;;  %v3810_v1 = vcombine.low %v2953_v53, %v2954_v58  ;;  %v2248_v16 = vmax.bf16 %v3645_v24, %v2020_v61  ;;  %v2545_v42 = vrot.slane %v2544_v10, 4  ;;  %v2259_v13 = vld [vmem:[%s3254_s27 + $0x20] sm:$0x1]  ;;  %s3133_s27 = smul.u32 168, %s4446_s19 }
  0x56   : > { %v2018_v25 = vmax.bf16 %v3595_v5, %v1790_v15  ;;  %v2513_v59 = vrot.slane %v2511_v51, 5  ;;  %v2022_v5 = vmax.bf16 %v3703_v60, %v1794_v52  ;;  %v2524_v56 = vor.u32 %v2523_v12, %v2519_v36 }
  0x57   : > { %v2249_v60 = vmax.bf16 %v2953_v53, %v2021_v54  ;;  %v2547_v17 = vshll.u32 %v2256_v27, 16  ;;  %v2551_v44 = vshrl.u32 %v2256_v27, 16  ;;  %v2567_v32 = vshll.u32 %v2258_v26, 16  ;;  %s4242_s29 = scalar_lea.vmem %s4350_s4, %s3133_s27 }
  0x58   : > { %v2514_v21 = vor.u32 %v2513_v59, %v2510_v41  ;;  %v2246_v4 = vmax.bf16 %v2950_v19, %v2018_v25  ;;  %v2525_v23 = vrot.slane %v2524_v56, 4  ;;  %v2250_v19 = vmax.bf16 %v2954_v58, %v2022_v5 }
  0x59   : > { %v2549_v61 = vrot.slane %v2547_v17, 5  ;;  %v2553_v52 = vrot.slane %v2551_v44, 4  ;;  %v2559_v15 = vrot.slane %v2557_v2, 5  ;;  %v2569_v29 = vrot.slane %v2567_v32, 5 }
  0x5a   : > { %2866 = vmatmul.mubr.msk.bf16.gmra.mxu0 %vm292_vm1, %v3558_v37  ;;  %3058 = vmatmul.mubr.msk.bf16.gmra.mxu1 %vm292_vm1, %v3558_v37  ;;  %v2515_v24 = vrot.slane %v2514_v21, 4  ;;  %v2561_v37 = vshrl.u32 %v2257_v22, 16  ;;  %v2530_v20 = vsel %vm3422_vm4, %v2525_v23, %v3698_v50  ;;  %v2251_v59 = vmax.bf16 %v3834_v38, %v2023_v62 }
  0x5b   : > { %1093 = vmatprep.mubr.bf16.mxu1 %v4387_v35  ;;  %3063 = vmatprep.mubr.msk.bf16.mxu0 %vm292_vm1, %v3554_v34  ;;  %v2589_v53 = vmax.bf16 %v2530_v20, %v2246_v4  ;;  %v2550_v10 = vsel %vm3422_vm4, %v2545_v42, %v2549_v61  ;;  %v2554_v18 = vor.u32 %v2553_v52, %v2549_v61  ;;  %v2571_v12 = vshrl.u32 %v2258_v26, 16 }
  0x5c   : > { %v2520_v31 = vsel %vm3422_vm4, %v2515_v24, %v2519_v36  ;;  %v2563_v51 = vrot.slane %v2561_v37, 4  ;;  %v2591_v25 = vmax.bf16 %v2550_v10, %v2248_v16  ;;  %v2577_v5 = vshll.u32 %v2259_v13, 16 }
  0x5d   : > { %v2588_v41 = vmax.bf16 %v2520_v31, %v2245_v0  ;;  %v2714_v50 = vunpack.c.l.bf16 %v2589_v53  ;;  %v2555_v36 = vrot.slane %v2554_v18, 4  ;;  %v2971_v16 = vcombine.low %v3740_v43, %v3782_v46 }
  0x5e   : > { %v2564_v54 = vor.u32 %v2563_v51, %v2559_v15  ;;  %v2716_v42 = vunpack.c.l.bf16 %v2591_v25  ;;  %v2972_v62 = vcombine.low %v3681_v33, %v3691_v3  ;;  %v2573_v0 = vrot.slane %v2571_v12, 4 }
  0x5f   : > { %v2713_v58 = vunpack.c.l.bf16 %v2588_v41  ;;  %2721 = vst.msk [vmem:[%s3749_s14 + $0x8] sm:$0xff] %vm292_vm1, %v2714_v50  ;;  %v2579_v4 = vrot.slane %v2577_v5, 5  ;;  %v2973_v56 = vcombine.low %v2256_v27, %v2257_v22  ;;  %v3867_v44 = vcombine.low %v2258_v26, %v2259_v13  ;;  %v4393_v50 = vld [vmem:[#allocation9_spill] sm:$0xff] }
  0x60   : > { %v2565_v21 = vrot.slane %v2564_v54, 4  ;;  %2723 = vst.msk [vmem:[%s3749_s14 + $0x18] sm:$0xff] %vm292_vm1, %v2716_v42  ;;  %v2574_v46 = vor.u32 %v2573_v0, %v2569_v29  ;;  %v2290_v27 = vshll.u32 %v2972_v62, 16  ;;  %v2294_v22 = vshrl.u32 %v2972_v62, 16  ;;  %v4396_v42 = vld [vmem:[#allocation10_spill] sm:$0xff]  ;;  %v4398_v0 = vld [vmem:[#allocation7_spill] sm:$0xff] }
  0x61   : > { %2720 = vst.msk [vmem:[%s3749_s14] sm:$0xff] %vm292_vm1, %v2713_v58  ;;  %v2298_v17 = vshll.u32 %v2973_v56, 16  ;;  %v2302_v32 = vshrl.u32 %v2973_v56, 16  ;;  %v2900_v18 = vcombine.low %v3568_v39, %v3579_v8  ;;  %v2901_v39 = vcombine.low %v3605_v40, %v3608_v57  ;;  %v4390_v8 = vld [vmem:[#allocation6_spill] sm:$0xff]  ;;  %v4399_v56 = vld [vmem:[#allocation3_spill] sm:$0xff] }
  0x62   : > { %2884 = vmatmul.mubr.msk.bf16.vlgmr.msra.gmra.mxu1 %vm292_vm1, %v3554_v34  ;;  %3064 = vmatmul.mubr.msk.bf16.vlgmr.msra.gmra.mxu0 %vm292_vm1, %v3562_v7  ;;  %v2560_v34 = vsel %vm3422_vm4, %v2555_v36, %v2559_v15  ;;  %v2570_v3 = vsel %vm3422_vm4, %v2565_v21, %v2569_v29  ;;  %v2575_v2 = vrot.slane %v2574_v46, 4  ;;  %v2292_v37 = vrot.slane %v2290_v27, 1  ;;  %v4394_v36 = vld [vmem:[#allocation11_spill] sm:$0xff]  ;;  %v4395_v21 = vld [vmem:[#allocation12_spill] sm:$0xff] }
  0x63   : > { %3072 = vmatpush3.bf16.msra.mxu1 %v3583_v49  ;;  %1305 = vmatpush1.bf16.msra.mxu0 %v3601_v11  ;;  %v2592_v33 = vmax.bf16 %v2560_v34, %v2249_v60  ;;  %v2283_v49 = vshrl.u32 %v2971_v16, 16  ;;  %v2285_v11 = vshll.u32 %v2971_v16, 16  ;;  %v2593_v43 = vmax.bf16 %v2570_v3, %v2250_v19  ;;  %v2935_v19 = vld [vmem:[%s4347_s1 + $0x24] sm:$0x3f]  ;;  %v2956_v27 = vld [vmem:[%s4347_s1 + $0x2a] sm:$0x3f] }
  0x64   : > { %1103 = vmatprep.mubr.bf16.mxu1 %v4387_v35  ;;  %3067 = vmatprep.mubr.msk.bf16.mxu0 %vm292_vm1, %v3575_v14  ;;  %v2300_v61 = vrot.slane %v2298_v17, 1  ;;  %v2580_v26 = vsel %vm3422_vm4, %v2575_v2, %v2579_v4  ;;  %v2296_v52 = vor.u32 %v2294_v22, %v2292_v37  ;;  %v1831_v53 = vrot.slane %v2935_v19, %v3247_v9 }
  0x65   : > { %3128 = vmatprep.subr.msk.bf16.mxu0 %vm305_vm0, %v3808_v63  ;;  %2926 = vmatprep.subr.msk.bf16.mxu1 %vm305_vm0, %v1530_v48  ;;  %v2717_v24 = vunpack.c.l.bf16 %v2592_v33  ;;  %v2287_v60 = vrot.slane %v2285_v11, 1  ;;  %v2718_v23 = vunpack.c.l.bf16 %v2593_v43  ;;  %v2306_v48 = vshll.u32 %v3867_v44, 16 }
  0x66   : > { %v2594_v20 = vmax.bf16 %v2580_v26, %v2251_v59  ;;  %v2304_v15 = vor.u32 %v2302_v32, %v2300_v61  ;;  %v3891_v6 = vsel %vm678_vm5, %v2296_v52, %v2300_v61  ;;  %v1550_v29 = vsel %vm305_vm0, %v3808_v63, 0  ;;  %v4392_v63 = vld [vmem:[#allocation4_spill] sm:$0xff] }
  0x67   : > { %2724 = vst.msk [vmem:[%s3749_s14 + $0x20] sm:$0xff] %vm292_vm1, %v2717_v24  ;;  %v2288_v31 = vor.u32 %v2287_v60, %v2283_v49  ;;  %2725 = vst.msk [vmem:[%s3749_s14 + $0x28] sm:$0xff] %vm292_vm1, %v2718_v23  ;;  %v3886_v51 = vrot.slane %v2306_v48, 1  ;;  %v1839_v58 = vcombine.high %v1831_v53, %v1831_v53  ;;  %v2922_v54 = vcombine.low %v4390_v8, %v3611_v55 }
  0x68   : > { %v1824_v13 = vcombine.high %v2935_v19, %v2935_v19  ;;  %v2902_v40 = vcombine.low %v4394_v36, %v4393_v50  ;;  %v1544_v57 = vsel %vm305_vm0, %v3732_v45, 0  ;;  %v2924_v16 = vcombine.low %v4396_v42, %v4395_v21  ;;  %v4397_v45 = vld [vmem:[#allocation15_spill] sm:$0xff] }
  0x69   : > { %v3884_v41 = vsel %vm678_vm5, %v2288_v31, %v2292_v37  ;;  %v3896_v10 = vsel %vm678_vm5, %v2304_v15, %v3886_v51  ;;  %v1486_v59 = vshll.u32 %v2922_v54, 16  ;;  %v1484_v55 = vshrl.u32 %v2922_v54, 16  ;;  %v4402_v54 = vld [vmem:[#allocation16_spill] sm:$0xff] }
  0x6a   : > { %2885 = vmatmul.mubr.msk.bf16.gmra.mxu1 %vm292_vm1, %v3562_v7  ;;  %3068 = vmatmul.mubr.msk.bf16.gmra.mxu0 %vm292_vm1, %v3800_v30  ;;  %v2719_v7 = vunpack.c.l.bf16 %v2594_v20  ;;  %v1838_v5 = vrot.slane %v1824_v13, %v3247_v9  ;;  %v2925_v4 = vcombine.low %v4398_v0, %v4397_v45  ;;  %v2903_v3 = vcombine.low %v4399_v56, %v4399_v56  ;;  %v2970_v20 = vld [vmem:[%s4347_s1 + $0x30] sm:$0x3f] }
  0x6b   : > { %1113 = vmatprep.mubr.bf16.mxu1 %v4387_v35  ;;  %1322 = vmatprep.mubr.bf16.mxu0 %v4387_v35  ;;  %v1488_v12 = vrot.slane %v1486_v59, 1  ;;  %v1499_v49 = vshll.u32 %v2924_v16, 16  ;;  %v1503_v43 = vshrl.u32 %v2924_v16, 16  ;;  %v2052_v23 = vcombine.high %v2956_v27, %v2956_v27 }
  0x6c   : > { %2726 = vst.msk [vmem:[%s3749_s14 + $0x30] sm:$0xff] %vm292_vm1, %v2719_v7  ;;  %v1507_v46 = vshll.u32 %v2925_v4, 16  ;;  %v2059_v2 = vrot.slane %v2956_v27, %v3247_v9  ;;  %v1859_v32 = vsel %vm305_vm0, %v1838_v5, 0  ;;  %v1853_v31 = vsel %vm305_vm0, %v1831_v53, 0 }
  0x6d   : > { %v1489_v62 = vor.u32 %v1488_v12, %v1484_v55  ;;  %v1501_v24 = vrot.slane %v1499_v49, 1  ;;  %v2066_v48 = vrot.slane %v2052_v23, %v3247_v9  ;;  %v1511_v26 = vshrl.u32 %v2925_v4, 16 }
  0x6e   : > { %v1509_v17 = vrot.slane %v1507_v46, 1  ;;  %v2067_v19 = vcombine.high %v2059_v2, %v2059_v2  ;;  %v2321_v15 = vrot.slane %v2970_v20, %v3247_v9  ;;  %v2310_v12 = vshrl.u32 %v3867_v44, 16 }
  0x6f   : > { %v1505_v60 = vor.u32 %v1503_v43, %v1501_v24  ;;  %v2087_v53 = vsel %vm305_vm0, %v2066_v48, 0 }
  0x70   : > { %v1513_v52 = vor.u32 %v1511_v26, %v1509_v17  ;;  %v2329_v7 = vcombine.high %v2321_v15, %v2321_v15  ;;  %v2312_v42 = vor.u32 %v2310_v12, %v3886_v51 }
  0x71   : > { %v1510_v61 = vsel %vm678_vm5, %v1505_v60, %v1509_v17 }
  0x72   : > { %2886 = vmatmul.mubr.msk.bf16.gmra.mxu1 %vm292_vm1, %v3575_v14  ;;  %2905 = vmatmul.mubr.msk.bf16.vlgmr.msra.gmra.mxu0 %vm292_vm1, %v2900_v18  ;;  %v4391_v14 = vld [vmem:[#allocation5_spill] sm:$0xff] }
  0x73   : > { %3082 = vmatpush3.bf16.msra.mxu0 %v1550_v29  ;;  %1123 = vmatprep.mubr.bf16.mxu1 %v4387_v35  ;;  %v2923_v25 = vcombine.low %v4392_v63, %v4391_v14  ;;  %v4401_v29 = vld [vmem:[#allocation13_spill] sm:$0xff]  ;;  %v2939_v14 = vcombine.low %v3778_v28, %v3778_v28  ;;  %v2343_v63 = vsel %vm305_vm0, %v2321_v15, 0  ;;  %v2960_v28 = vcombine.low %v3834_v38, %v3834_v38 }
  0x74   : > { %1332 = vmatprep.mubr.bf16.mxu0 %v4387_v35  ;;  %2940 = vmatprep.subr.msk.bf16.mxu0 %vm305_vm0, %v1839_v58  ;;  %v2314_v58 = vcombine.high %v2970_v20, %v2970_v20 }
  0x75   : > { %v1495_v33 = vshrl.u32 %v2923_v25, 16 }
  0x76   : > { %v2328_v8 = vrot.slane %v2314_v58, %v3247_v9 }
  0x78   : > { %v2349_v9 = vsel %vm305_vm0, %v2328_v8, 0 }
  0x7a   : > { %2887 = vmatmul.mubr.msk.bf16.gmra.mxu1 %vm292_vm1, %v3800_v30  ;;  %2906 = vmatmul.mubr.msk.bf16.gmra.mxu0 %vm292_vm1, %v2901_v39  ;;  %v1491_v30 = vshll.u32 %v2923_v25, 16  ;;  %v4403_v25 = vld [vmem:[#allocation14_spill] sm:$0xff] }
  0x7b   : > { %1342 = vmatprep.mubr.bf16.mxu0 %v4387_v35  ;;  %3073 = vmatprep.mubr.msk.bf16.mxu1 %vm292_vm1, %v2900_v18  ;;  %v4400_v18 = vld [vmem:[#allocation8_spill] sm:$0xff] }
  0x7c   : > { %v1493_v34 = vrot.slane %v1491_v30, 1 }
  0x7e   : > { %v1494_v11 = vsel %vm678_vm5, %v1489_v62, %v1493_v34  ;;  %v1497_v22 = vor.u32 %v1495_v33, %v1493_v34 }
  0x80   : > { %v1502_v37 = vsel %vm678_vm5, %v1497_v22, %v1501_v24 }
  0x82   : > { %2907 = vmatmul.mubr.msk.bf16.gmra.mxu0 %vm292_vm1, %v2902_v40  ;;  %3074 = vmatmul.mubr.msk.bf16.vlgmr.msra.gmra.mxu1 %vm292_vm1, %v2901_v39  ;;  %v2081_v39 = vsel %vm305_vm0, %v2059_v2, 0 }
  0x83   : > { %1567 = vmatpush1.bf16.msra.mxu1 %v1544_v57  ;;  %1352 = vmatprep.mubr.bf16.mxu0 %v4387_v35 }
  0x84   : > { %3077 = vmatprep.mubr.msk.bf16.mxu1 %vm292_vm1, %v2902_v40  ;;  %3129 = vmatprep.subr.msk.bf16.mxu1 %vm305_vm0, %v1838_v5 }
  0x8a   : > { %2908 = vmatmul.mubr.msk.bf16.gmra.mxu0 %vm292_vm1, %v2903_v3  ;;  %3078 = vmatmul.mubr.msk.bf16.gmra.mxu1 %vm292_vm1, %v2903_v3 }
  0x8b   : > { %1584 = vmatprep.mubr.bf16.mxu1 %v4387_v35  ;;  %3083 = vmatprep.mubr.msk.bf16.mxu0 %vm292_vm1, %v1494_v11 }
  0x92   : > { %2927 = vmatmul.mubr.msk.bf16.vlgmr.msra.gmra.mxu1 %vm292_vm1, %v1494_v11  ;;  %3084 = vmatmul.mubr.msk.bf16.vlgmr.msra.gmra.mxu0 %vm292_vm1, %v1502_v37 }
  0x93   : > { %3092 = vmatpush3.bf16.msra.mxu1 %v1859_v32  ;;  %1876 = vmatpush1.bf16.msra.mxu0 %v1853_v31 }
  0x94   : > { %1594 = vmatprep.mubr.bf16.mxu1 %v4387_v35  ;;  %3087 = vmatprep.mubr.msk.bf16.mxu0 %vm292_vm1, %v1510_v61 }
  0x95   : > { %3130 = vmatprep.subr.msk.bf16.mxu0 %vm305_vm0, %v2066_v48  ;;  %2961 = vmatprep.subr.msk.bf16.mxu1 %vm305_vm0, %v2067_v19 }
  0x9a   : > { %2928 = vmatmul.mubr.msk.bf16.gmra.mxu1 %vm292_vm1, %v1502_v37  ;;  %3088 = vmatmul.mubr.msk.bf16.gmra.mxu0 %vm292_vm1, %v1513_v52 }
  0x9b   : > { %1604 = vmatprep.mubr.bf16.mxu1 %v4387_v35  ;;  %1893 = vmatprep.mubr.bf16.mxu0 %v4387_v35 }
  0xa2   : > { %2929 = vmatmul.mubr.msk.bf16.gmra.mxu1 %vm292_vm1, %v1510_v61  ;;  %2941 = vmatmul.mubr.msk.bf16.vlgmr.msra.gmra.mxu0 %vm292_vm1, %v4400_v18 }
  0xa3   : > { %3102 = vmatpush3.bf16.msra.mxu0 %v2087_v53  ;;  %1614 = vmatprep.mubr.bf16.mxu1 %v4387_v35 }
  0xa4   : > { %1903 = vmatprep.mubr.bf16.mxu0 %v4387_v35  ;;  %2975 = vmatprep.subr.msk.bf16.mxu0 %vm305_vm0, %v2329_v7 }
  0xaa   : > { %2930 = vmatmul.mubr.msk.bf16.gmra.mxu1 %vm292_vm1, %v1513_v52  ;;  %2942 = vmatmul.mubr.msk.bf16.gmra.mxu0 %vm292_vm1, %v4401_v29 }
  0xab   : > { %1913 = vmatprep.mubr.bf16.mxu0 %v4387_v35  ;;  %3093 = vmatprep.mubr.msk.bf16.mxu1 %vm292_vm1, %v4400_v18 }
  0xb2   : > { %2943 = vmatmul.mubr.msk.bf16.gmra.mxu0 %vm292_vm1, %v4402_v54  ;;  %3094 = vmatmul.mubr.msk.bf16.vlgmr.msra.gmra.mxu1 %vm292_vm1, %v4401_v29 }
  0xb3   : > { %2104 = vmatpush1.bf16.msra.mxu1 %v2081_v39  ;;  %1923 = vmatprep.mubr.bf16.mxu0 %v4387_v35 }
  0xb4   : > { %3097 = vmatprep.mubr.msk.bf16.mxu1 %vm292_vm1, %v4402_v54  ;;  %3131 = vmatprep.subr.msk.bf16.mxu1 %vm305_vm0, %v2328_v8 }
  0xba   : > { %2944 = vmatmul.mubr.msk.bf16.gmra.mxu0 %vm292_vm1, %v2939_v14  ;;  %3098 = vmatmul.mubr.msk.bf16.gmra.mxu1 %vm292_vm1, %v2939_v14 }
  0xbb   : > { %2121 = vmatprep.mubr.bf16.mxu1 %v4387_v35  ;;  %3103 = vmatprep.mubr.msk.bf16.mxu0 %vm292_vm1, %v3789_v47 }
  0xc2   : > { %2962 = vmatmul.mubr.msk.bf16.vlgmr.msra.gmra.mxu1 %vm292_vm1, %v3789_v47  ;;  %3104 = vmatmul.mubr.msk.bf16.vlgmr.msra.gmra.mxu0 %vm292_vm1, %v4403_v25 }
  0xc3   : > { %3112 = vmatpush3.bf16.msra.mxu1 %v2349_v9  ;;  %2366 = vmatpush1.bf16.msra.mxu0 %v2343_v63 }
  0xc4   : > { %2131 = vmatprep.mubr.bf16.mxu1 %v4387_v35  ;;  %3107 = vmatprep.mubr.msk.bf16.mxu0 %vm292_vm1, %v3810_v1 }
  0xca   : > { %2963 = vmatmul.mubr.msk.bf16.gmra.mxu1 %vm292_vm1, %v4403_v25  ;;  %3108 = vmatmul.mubr.msk.bf16.gmra.mxu0 %vm292_vm1, %v2960_v28 }
  0xcb   : > { %2141 = vmatprep.mubr.bf16.mxu1 %v4387_v35  ;;  %2383 = vmatprep.mubr.bf16.mxu0 %v4387_v35 }
  0xd2   : > { %2964 = vmatmul.mubr.msk.bf16.gmra.mxu1 %vm292_vm1, %v3810_v1  ;;  %2976 = vmatmul.mubr.msk.bf16.vlgmr.msra.gmra.mxu0 %vm292_vm1, %v3884_v41 }
  0xd3   : > { %2151 = vmatprep.mubr.bf16.mxu1 %v4387_v35  ;;  %2393 = vmatprep.mubr.bf16.mxu0 %v4387_v35 }
  0xda   : > { %v349_v47 = vpop.f32.mrf.mxu0  ;;  %v4017_v38 = vpop.f32.mrf.mxu1  ;;  %2965 = vmatmul.mubr.msk.bf16.gmra.mxu1 %vm292_vm1, %v2960_v28  ;;  %2977 = vmatmul.mubr.msk.bf16.gmra.mxu0 %vm292_vm1, %v3891_v6 }
  0xdb   : > { %2403 = vmatprep.mubr.bf16.mxu0 %v4387_v35  ;;  %3113 = vmatprep.mubr.msk.bf16.mxu1 %vm292_vm1, %v3884_v41 }
  0xdc   : > { %v351_v1 = vpop.f32.mrf.mxu0  ;;  %v4025_v59 = vpop.f32.mrf.mxu1 }
  0xde   : > { %v353_v13 = vpop.f32.mrf.mxu0  ;;  %v383_v50 = vpop.f32.mrf.mxu1 }
  0xe0   : > { %v355_v36 = vpop.f32.mrf.mxu0  ;;  %v384_v40 = vpop.f32.mrf.mxu1 }
  0xe2   : > { %v359_v57 = vpop.f32.mrf.mxu0  ;;  %v3035_v55 = vpop.f32.mrf.mxu1  ;;  %2978 = vmatmul.mubr.msk.bf16.gmra.mxu0 %vm292_vm1, %v3896_v10  ;;  %3114 = vmatmul.mubr.msk.bf16.vlgmr.msra.gmra.mxu1 %vm292_vm1, %v3891_v6 }
  0xe3   : > { %2413 = vmatprep.mubr.bf16.mxu0 %v4387_v35  ;;  %3117 = vmatprep.mubr.msk.bf16.mxu1 %vm292_vm1, %v3896_v10 }
  0xe4   : > { %v361_v41 = vpop.f32.mrf.mxu0  ;;  %v420_v30 = vpop.f32.mrf.mxu1 }
  0xe6   : > { %v363_v5 = vpop.f32.mrf.mxu0  ;;  %v3036_v21 = vpop.f32.mrf.mxu1 }
  0xe8   : > { %v365_v16 = vpop.f32.mrf.mxu0  ;;  %v423_v62 = vpop.f32.mrf.mxu1 }
  0xea   : > { %v369_v34 = vpop.f32.mrf.mxu0  ;;  %v3039_v45 = vpop.f32.mrf.mxu1  ;;  %2979 = vmatmul.mubr.msk.bf16.gmra.mxu0 %vm292_vm1, %v2312_v42  ;;  %3118 = vmatmul.mubr.msk.bf16.gmra.mxu1 %vm292_vm1, %v2312_v42 }
  0xec   : > { %v371_v44 = vpop.f32.mrf.mxu0  ;;  %v436_v6 = vpop.f32.mrf.mxu1 }
  0xee   : > { %v373_v35 = vpop.f32.mrf.mxu0  ;;  %v3040_v0 = vpop.f32.mrf.mxu1 }
  0xf0   : > { %v375_v4 = vpop.f32.mrf.mxu0  ;;  %v439_v10 = vpop.f32.mrf.mxu1 }
  0xf2   : > { %v540_v56 = vpop.f32.mrf.mxu1  ;;  %v3045_v3 = vpop.f32.mrf.mxu0 }
  0xf3   : > { %v541_v33 = vadd.f32 %v540_v56, %v349_v47  ;;  %v620_v49 = vadd.f32 %v3045_v3, %v3035_v55 }
  0xf4   : > { %v542_v11 = vpop.f32.mrf.mxu1  ;;  %v611_v51 = vpop.f32.mrf.mxu0 }
  0xf5   : > { %v543_v43 = vadd.f32 %v542_v11, %v351_v1  ;;  %v612_v46 = vadd.f32 %v611_v51, %v420_v30 }
  0xf6   : > { %v544_v27 = vpop.f32.mrf.mxu1  ;;  %v3046_v22 = vpop.f32.mrf.mxu0 }
  0xf7   : > { %v545_v24 = vadd.f32 %v544_v27, %v353_v13  ;;  %v623_v60 = vadd.f32 %v3046_v22, %v3036_v21 }
  0xf8   : > { %v546_v17 = vpop.f32.mrf.mxu1  ;;  %v614_v23 = vpop.f32.mrf.mxu0 }
  0xf9   : > { %v547_v2 = vadd.f32 %v546_v17, %v355_v36  ;;  %v615_v37 = vadd.f32 %v614_v23, %v423_v62 }
  0xfa   : > { %v550_v32 = vpop.f32.mrf.mxu1  ;;  %v3049_v31 = vpop.f32.mrf.mxu0 }
  0xfb   : > { %v551_v61 = vadd.f32 %v550_v32, %v359_v57  ;;  %v636_v48 = vadd.f32 %v3049_v31, %v3039_v45 }
  0xfc   : > { %v552_v19 = vpop.f32.mrf.mxu1  ;;  %v627_v26 = vpop.f32.mrf.mxu0 }
  0xfd   : > { %v553_v52 = vadd.f32 %v552_v19, %v361_v41  ;;  %v628_v20 = vadd.f32 %v627_v26, %v436_v6 }
  0xfe   : > { %v554_v15 = vpop.f32.mrf.mxu1  ;;  %v3050_v53 = vpop.f32.mrf.mxu0 }
  0xff   : > { %v555_v7 = vadd.f32 %v554_v15, %v363_v5 }
 0x100   : > { %v556_v18 = vpop.f32.mrf.mxu1  ;;  %v630_v29 = vpop.f32.mrf.mxu0 }
 0x101   : > { %v557_v58 = vadd.f32 %v556_v18, %v365_v16  ;;  %v631_v39 = vadd.f32 %v630_v29, %v439_v10 }
 0x102   : > { %v560_v8 = vpop.f32.mrf.mxu1  ;;  %v782_v54 = vpop.f32.mrf.mxu0 }
 0x103   : > { %v561_v14 = vadd.f32 %v560_v8, %v369_v34  ;;  %v883_v9 = vadd.f32 %v782_v54, %v541_v33 }
 0x104   : > { %v562_v63 = vpop.f32.mrf.mxu1  ;;  %v784_v25 = vpop.f32.mrf.mxu0 }
 0x105   : > { %v563_v28 = vadd.f32 %v562_v63, %v371_v44  ;;  %v884_v47 = vadd.f32 %v784_v25, %v543_v43 }
 0x106   : > { %v564_v1 = vpop.f32.mrf.mxu1  ;;  %v786_v13 = vpop.f32.mrf.mxu0 }
 0x107   : > { %v565_v50 = vadd.f32 %v564_v1, %v373_v35  ;;  %v886_v36 = vadd.f32 %v786_v13, %v545_v24 }
 0x108   : > { %v566_v40 = vpop.f32.mrf.mxu1  ;;  %v788_v57 = vpop.f32.mrf.mxu0 }
 0x109   : > { %v567_v55 = vadd.f32 %v566_v40, %v375_v4  ;;  %v887_v12 = vadd.f32 %v788_v57, %v547_v2 }
 0x10a   : > { %v570_v41 = vpop.f32.mrf.mxu1  ;;  %v792_v30 = vpop.f32.mrf.mxu0 }
 0x10b   : > { %v571_v5 = vadd.f32 %v570_v41, %v4017_v38  ;;  %v889_v21 = vadd.f32 %v792_v30, %v551_v61 }
 0x10c   : > { %v572_v42 = vpop.f32.mrf.mxu1  ;;  %v794_v16 = vpop.f32.mrf.mxu0 }
 0x10d   : > { %v573_v62 = vadd.f32 %v572_v42, %v4025_v59  ;;  %v890_v34 = vadd.f32 %v794_v16, %v553_v52 }
 0x10e   : > { %v574_v45 = vpop.f32.mrf.mxu1  ;;  %v796_v44 = vpop.f32.mrf.mxu0 }
 0x10f   : > { %v892_v6 = vadd.f32 %v796_v44, %v555_v7 }
 0x110   : > { %v575_v0 = vpop.f32.mrf.mxu1  ;;  %v798_v35 = vpop.f32.mrf.mxu0 }
 0x111   : > { %v893_v10 = vadd.f32 %v798_v35, %v557_v58 }
 0x112   : > { %v802_v56 = vpop.f32.mrf.mxu0  ;;  %v3055_v3 = vpop.f32.mrf.mxu1 }
 0x113   : > { %v895_v4 = vadd.f32 %v802_v56, %v561_v14  ;;  %v891_v33 = vadd.f32 %v3055_v3, %v620_v49 }
 0x114   : > { %v804_v11 = vpop.f32.mrf.mxu0  ;;  %v853_v51 = vpop.f32.mrf.mxu1 }
 0x115   : > { %v896_v43 = vadd.f32 %v804_v11, %v563_v28  ;;  %v885_v38 = vadd.f32 %v853_v51, %v612_v46 }
 0x116   : > { %v806_v27 = vpop.f32.mrf.mxu0  ;;  %v3056_v22 = vpop.f32.mrf.mxu1 }
 0x117   : > { %v898_v24 = vadd.f32 %v806_v27, %v565_v50  ;;  %v894_v17 = vadd.f32 %v3056_v22, %v623_v60 }
 0x118   : > { %v808_v59 = vpop.f32.mrf.mxu0  ;;  %v856_v23 = vpop.f32.mrf.mxu1 }
 0x119   : > { %v899_v2 = vadd.f32 %v808_v59, %v567_v55  ;;  %v888_v32 = vadd.f32 %v856_v23, %v615_v37 }
 0x11a   : > { %v812_v31 = vpop.f32.mrf.mxu0  ;;  %v3059_v61 = vpop.f32.mrf.mxu1 }
 0x11b   : > { %v901_v19 = vadd.f32 %v812_v31, %v571_v5  ;;  %v903_v26 = vadd.f32 %v3059_v61, %v636_v48 }
 0x11c   : > { %v814_v52 = vpop.f32.mrf.mxu0  ;;  %v869_v15 = vpop.f32.mrf.mxu1 }
 0x11d   : > { %v902_v53 = vadd.f32 %v814_v52, %v573_v62  ;;  %v897_v49 = vadd.f32 %v869_v15, %v628_v20 }
 0x11e   : > { %v816_v7 = vpop.f32.mrf.mxu0  ;;  %v3060_v18 = vpop.f32.mrf.mxu1 }
 0x120   : > { %v817_v29 = vpop.f32.mrf.mxu0  ;;  %v872_v46 = vpop.f32.mrf.mxu1 }
 0x121   : > { %v900_v58 = vadd.f32 %v872_v46, %v631_v39 }
 0x122   : > { %v1095_v8 = vpop.f32.mrf.mxu1  ;;  %v3065_v54 = vpop.f32.mrf.mxu0 }
 0x123   : > { %v1196_v60 = vadd.f32 %v1095_v8, %v883_v9  ;;  %v1204_v14 = vadd.f32 %v3065_v54, %v891_v33 }
 0x124   : > { %v1097_v63 = vpop.f32.mrf.mxu1  ;;  %v1166_v25 = vpop.f32.mrf.mxu0 }
 0x125   : > { %v1197_v37 = vadd.f32 %v1097_v63, %v884_v47  ;;  %v1198_v28 = vadd.f32 %v1166_v25, %v885_v38 }
 0x126   : > { %v1099_v1 = vpop.f32.mrf.mxu1  ;;  %v3066_v13 = vpop.f32.mrf.mxu0 }
 0x127   : > { %v1199_v48 = vadd.f32 %v1099_v1, %v886_v36  ;;  %v1207_v50 = vadd.f32 %v3066_v13, %v894_v17 }
 0x128   : > { %v1101_v40 = vpop.f32.mrf.mxu1  ;;  %v1169_v57 = vpop.f32.mrf.mxu0 }
 0x129   : > { %v1200_v20 = vadd.f32 %v1101_v40, %v887_v12  ;;  %v1201_v55 = vadd.f32 %v1169_v57, %v888_v32 }
 0x12a   : > { %v1105_v41 = vpop.f32.mrf.mxu1  ;;  %v3069_v30 = vpop.f32.mrf.mxu0 }
 0x12b   : > { %v1202_v5 = vadd.f32 %v1105_v41, %v889_v21  ;;  %v1216_v39 = vadd.f32 %v3069_v30, %v903_v26 }
 0x12c   : > { %v1107_v42 = vpop.f32.mrf.mxu1  ;;  %v1182_v16 = vpop.f32.mrf.mxu0 }
 0x12d   : > { %v1203_v9 = vadd.f32 %v1107_v42, %v890_v34  ;;  %v1210_v62 = vadd.f32 %v1182_v16, %v897_v49 }
 0x12e   : > { %v1109_v45 = vpop.f32.mrf.mxu1  ;;  %v3070_v44 = vpop.f32.mrf.mxu0 }
 0x12f   : > { %v1205_v47 = vadd.f32 %v1109_v45, %v892_v6 }
 0x130   : > { %v1111_v0 = vpop.f32.mrf.mxu1  ;;  %v1185_v35 = vpop.f32.mrf.mxu0 }
 0x131   : > { %v1206_v56 = vadd.f32 %v1111_v0, %v893_v10  ;;  %v1213_v36 = vadd.f32 %v1185_v35, %v900_v58 }
 0x132   : > { %v1115_v3 = vpop.f32.mrf.mxu1  ;;  %v1324_v33 = vpop.f32.mrf.mxu0 }
 0x133   : > { %v1208_v11 = vadd.f32 %v1115_v3, %v895_v4  ;;  %v4040_v12 = vadd.f32 %v1324_v33, %v1196_v60 }
 0x134   : > { %v1117_v51 = vpop.f32.mrf.mxu1  ;;  %v1326_v38 = vpop.f32.mrf.mxu0 }
 0x135   : > { %v1209_v21 = vadd.f32 %v1117_v51, %v896_v43  ;;  %v4042_v27 = vadd.f32 %v1326_v38, %v1197_v37 }
 0x136   : > { %v1119_v22 = vpop.f32.mrf.mxu1  ;;  %v1328_v34 = vpop.f32.mrf.mxu0 }
 0x137   : > { %v1211_v17 = vadd.f32 %v1119_v22, %v898_v24  ;;  %v4044_v59 = vadd.f32 %v1328_v34, %v1199_v48 }
 0x138   : > { %v1121_v6 = vpop.f32.mrf.mxu1  ;;  %v1330_v23 = vpop.f32.mrf.mxu0 }
 0x139   : > { %v1212_v32 = vadd.f32 %v1121_v6, %v899_v2  ;;  %v4046_v10 = vadd.f32 %v1330_v23, %v1200_v20 }
 0x13a   : > { %v1125_v31 = vpop.f32.mrf.mxu1  ;;  %v1334_v61 = vpop.f32.mrf.mxu0 }
 0x13b   : > { %v1214_v4 = vadd.f32 %v1125_v31, %v901_v19  ;;  %v4048_v26 = vadd.f32 %v1334_v61, %v1202_v5 }
 0x13c   : > { %v1127_v52 = vpop.f32.mrf.mxu1  ;;  %v1336_v15 = vpop.f32.mrf.mxu0 }
 0x13d   : > { %v1215_v43 = vadd.f32 %v1127_v52, %v902_v53  ;;  %v4050_v49 = vadd.f32 %v1336_v15, %v1203_v9 }
 0x13e   : > { %v1129_v7 = vpop.f32.mrf.mxu1  ;;  %v1338_v18 = vpop.f32.mrf.mxu0 }
 0x13f   : > { %v4052_v24 = vadd.f32 %v1338_v18, %v1205_v47 }
 0x140   : > { %v1130_v29 = vpop.f32.mrf.mxu1  ;;  %v1340_v46 = vpop.f32.mrf.mxu0 }
 0x141   : > { %v4054_v58 = vadd.f32 %v1340_v46, %v1206_v56 }
 0x142   : > { %v1344_v2 = vpop.f32.mrf.mxu0  ;;  %v3075_v8 = vpop.f32.mrf.mxu1 }
 0x143   : > { %v4056_v54 = vadd.f32 %v1344_v2, %v1208_v11  ;;  %v1433_v19 = vadd.f32 %v3075_v8, %v1204_v14 }
 0x144   : > { %v1346_v60 = vpop.f32.mrf.mxu0  ;;  %v1395_v63 = vpop.f32.mrf.mxu1 }
 0x145   : > { %v4058_v25 = vadd.f32 %v1346_v60, %v1209_v21  ;;  %v1427_v53 = vadd.f32 %v1395_v63, %v1198_v28 }
 0x146   : > { %v1348_v37 = vpop.f32.mrf.mxu0  ;;  %v3076_v1 = vpop.f32.mrf.mxu1 }
 0x147   : > { %v4060_v13 = vadd.f32 %v1348_v37, %v1211_v17  ;;  %v1436_v48 = vadd.f32 %v3076_v1, %v1207_v50 }
 0x148   : > { %v1350_v40 = vpop.f32.mrf.mxu0  ;;  %v1398_v57 = vpop.f32.mrf.mxu1 }
 0x149   : > { %v4062_v20 = vadd.f32 %v1350_v40, %v1212_v32  ;;  %v1430_v41 = vadd.f32 %v1398_v57, %v1201_v55 }
 0x14a   : > { %v1354_v30 = vpop.f32.mrf.mxu0  ;;  %v3079_v5 = vpop.f32.mrf.mxu1 }
 0x14b   : > { %v4064_v42 = vadd.f32 %v1354_v30, %v1214_v4  ;;  %v1445_v14 = vadd.f32 %v3079_v5, %v1216_v39 }
 0x14c   : > { %v1356_v16 = vpop.f32.mrf.mxu0  ;;  %v1411_v9 = vpop.f32.mrf.mxu1 }
 0x14d   : > { %v4066_v45 = vadd.f32 %v1356_v16, %v1215_v43  ;;  %v1439_v28 = vadd.f32 %v1411_v9, %v1210_v62 }
 0x14e   : > { %v1358_v44 = vpop.f32.mrf.mxu0  ;;  %v3080_v47 = vpop.f32.mrf.mxu1 }
 0x150   : > { %v1359_v0 = vpop.f32.mrf.mxu0  ;;  %v1414_v35 = vpop.f32.mrf.mxu1 }
 0x151   : > { %v1442_v50 = vadd.f32 %v1414_v35, %v1213_v36 }
 0x152   : > { %v4068_v56 = vpop.f32.mrf.mxu1  ;;  %v3085_v3 = vpop.f32.mrf.mxu0 }
 0x153   : > { %v4070_v33 = vadd.f32 %v3085_v3, %v1433_v19 }
 0x154   : > { %v4072_v55 = vpop.f32.mrf.mxu1  ;;  %v1657_v11 = vpop.f32.mrf.mxu0 }
 0x155   : > { %v4074_v51 = vadd.f32 %v1657_v11, %v1427_v53 }
 0x156   : > { %v4076_v39 = vpop.f32.mrf.mxu1  ;;  %v3086_v38 = vpop.f32.mrf.mxu0 }
 0x157   : > { %v4078_v21 = vadd.f32 %v3086_v38, %v1436_v48 }
 0x158   : > { %v4080_v62 = vpop.f32.mrf.mxu1  ;;  %v1660_v22 = vpop.f32.mrf.mxu0 }
 0x159   : > { %4404 = vst [vmem:[#allocation6_spill] sm:$0xff] %v4078_v21  ;;  %v4082_v34 = vadd.f32 %v1660_v22, %v1430_v41 }
 0x15a   : > { %v4084_v36 = vpop.f32.mrf.mxu1  ;;  %v3089_v17 = vpop.f32.mrf.mxu0 }
 0x15b   : > { %4405 = vst [vmem:[#allocation5_spill] sm:$0xff] %v4082_v34  ;;  %v4086_v6 = vadd.f32 %v3089_v17, %v1445_v14 }
 0x15c   : > { %v4088_v23 = vpop.f32.mrf.mxu1  ;;  %v1673_v32 = vpop.f32.mrf.mxu0 }
 0x15d   : > { %4406 = vst [vmem:[#allocation4_spill] sm:$0xff] %v4086_v6  ;;  %v4090_v31 = vadd.f32 %v1673_v32, %v1439_v28 }
 0x15e   : > { %v4092_v61 = vpop.f32.mrf.mxu1  ;;  %v3090_v4 = vpop.f32.mrf.mxu0 }
 0x15f   : > { %4407 = vst [vmem:[#allocation9_spill] sm:$0xff] %v4090_v31 }
 0x160   : > { %v4094_v52 = vpop.f32.mrf.mxu1  ;;  %v1676_v15 = vpop.f32.mrf.mxu0 }
 0x161   : > { %v4096_v43 = vadd.f32 %v1676_v15, %v1442_v50 }
 0x162   : > { %v4098_v7 = vpop.f32.mrf.mxu1  ;;  %v1895_v18 = vpop.f32.mrf.mxu0 }
 0x163   : > { %4408 = vst [vmem:[#allocation11_spill] sm:$0xff] %v4096_v43 }
 0x164   : > { %v4100_v29 = vpop.f32.mrf.mxu1  ;;  %v1897_v46 = vpop.f32.mrf.mxu0 }
 0x166   : > { %v4102_v2 = vpop.f32.mrf.mxu1  ;;  %v4104_v8 = vpop.f32.mrf.mxu0 }
 0x168   : > { %v4106_v19 = vpop.f32.mrf.mxu1  ;;  %v4108_v60 = vpop.f32.mrf.mxu0 }
 0x16a   : > { %v4110_v63 = vpop.f32.mrf.mxu1  ;;  %v4112_v53 = vpop.f32.mrf.mxu0 }
 0x16c   : > { %v4114_v37 = vpop.f32.mrf.mxu1  ;;  %v4116_v1 = vpop.f32.mrf.mxu0 }
 0x16e   : > { %v1620_v48 = vpop.f32.mrf.mxu1  ;;  %v4118_v40 = vpop.f32.mrf.mxu0 }
 0x170   : > { %v1621_v57 = vpop.f32.mrf.mxu1  ;;  %v4120_v41 = vpop.f32.mrf.mxu0 }
 0x172   : > { %v4122_v30 = vpop.f32.mrf.mxu0  ;;  %v4124_v5 = vpop.f32.mrf.mxu1 }
 0x174   : > { %v4126_v14 = vpop.f32.mrf.mxu0  ;;  %v4128_v16 = vpop.f32.mrf.mxu1 }
 0x176   : > { %v4130_v9 = vpop.f32.mrf.mxu0  ;;  %v4132_v28 = vpop.f32.mrf.mxu1 }
 0x177   : > { %4409 = vst [vmem:[#allocation12_spill] sm:$0xff] %v4132_v28 }
 0x178   : > { %v4134_v44 = vpop.f32.mrf.mxu0  ;;  %v4136_v47 = vpop.f32.mrf.mxu1 }
 0x179   : > { %4410 = vst [vmem:[#allocation10_spill] sm:$0xff] %v4134_v44  ;;  %4411 = vst [vmem:[#allocation15_spill] sm:$0xff] %v4136_v47 }
 0x17a   : > { %v4138_v0 = vpop.f32.mrf.mxu0  ;;  %v4140_v35 = vpop.f32.mrf.mxu1 }
 0x17b   : > { %4412 = vst [vmem:[#allocation7_spill] sm:$0xff] %v4138_v0  ;;  %4413 = vst [vmem:[#allocation3_spill] sm:$0xff] %v4140_v35 }
 0x17c   : > { %v4142_v50 = vpop.f32.mrf.mxu0  ;;  %v4144_v3 = vpop.f32.mrf.mxu1 }
 0x17d   : > { %4414 = vst [vmem:[#allocation8_spill] sm:$0xff] %v4142_v50  ;;  %4415 = vst [vmem:[#allocation13_spill] sm:$0xff] %v4144_v3 }
 0x17e   : > { %v1929_v11 = vpop.f32.mrf.mxu0  ;;  %v3100_v38 = vpop.f32.mrf.mxu1 }
 0x17f   : > { %v4422_v11 = vld [vmem:[#allocation2_spill] sm:$0xff] }
 0x180   : > { %v1930_v22 = vpop.f32.mrf.mxu0  ;;  %v4146_v17 = vpop.f32.mrf.mxu1  ;;  %v2599_v38 = vsub.s32 0, %v4422_v11 }
 0x181   : > { %4416 = vst [vmem:[#allocation16_spill] sm:$0xff] %v4146_v17 }
 0x182   : > { %v2123_v32 = vpop.f32.mrf.mxu1  ;;  %v4148_v4 = vpop.f32.mrf.mxu0 }
 0x183   : > { %4417 = vst [vmem:[#allocation14_spill] sm:$0xff] %v4148_v4  ;;  %v2607_v4 = vsub.s32 2, %v4422_v11 }
 0x184   : > { %v2125_v15 = vpop.f32.mrf.mxu1  ;;  %v4150_v48 = vpop.f32.mrf.mxu0 }
 0x185   : > { %4418 = vst [vmem:[#allocation17_spill] sm:$0xff] %v4150_v48  ;;  %v2595_v48 = vld [vmem:[%s4348_s2] sm:$0x7] }
 0x186   : > { %v2127_v57 = vpop.f32.mrf.mxu1  ;;  %v4152_v43 = vpop.f32.mrf.mxu0  ;;  %v4179_v34 = vrot.slane %v2595_v48, %v2599_v38 }
 0x187   : > { %4419 = vst [vmem:[#allocation18_spill] sm:$0xff] %v4152_v43  ;;  %v2633_v43 = vld [vmem:[%s4349_s3] sm:$0x7] }
 0x188   : > { %v2129_v31 = vpop.f32.mrf.mxu1  ;;  %v4154_v35 = vpop.f32.mrf.mxu0  ;;  %v4181_v44 = vrot.slane %v2633_v43, %v2599_v38 }
 0x189   : > { %4420 = vst [vmem:[#allocation19_spill] sm:$0xff] %v4154_v35  ;;  %v2603_v35 = vsub.s32 1, %v4422_v11 }
 0x18a   : > { %v4156_v50 = vpop.f32.mrf.mxu1  ;;  %v4158_v3 = vpop.f32.mrf.mxu0 }
 0x18b   : > { %4421 = vst [vmem:[#allocation20_spill] sm:$0xff] %v4158_v3  ;;  %v1687_v3 = vadd.f32 %v4068_v56, %v4040_v12  ;;  %v4187_v21 = vrot.slane %v2595_v48, %v2603_v35  ;;  %v4189_v11 = vrot.slane %v2633_v43, %v2603_v35  ;;  %v4191_v12 = vrot.slane %v2595_v48, %v2607_v4 }
 0x18c   : > { %v4161_v22 = vpop.f32.mrf.mxu1  ;;  %v4163_v17 = vpop.f32.mrf.mxu0  ;;  %v4193_v56 = vrot.slane %v2633_v43, %v2607_v4  ;;  %v1694_v35 = vadd.f32 %v4088_v23, %v4050_v49  ;;  %v1696_v48 = vadd.f32 %v4092_v61, %v4052_v24  ;;  %v1697_v43 = vadd.f32 %v4094_v52, %v4054_v58 }
 0x18d   : > { %4423 = vst [vmem:[#allocation2_spill] sm:$0xff] %v4161_v22  ;;  %4424 = vst [vmem:[#allocation21_spill] sm:$0xff] %v4163_v17  ;;  %v1688_v17 = vadd.f32 %v4072_v55, %v4042_v27  ;;  %v1996_v47 = vadd.f32 %v1895_v18, %v1687_v3  ;;  %v1690_v27 = vadd.f32 %v4076_v39, %v4044_v59 }
 0x18e   : > { %v4175_v6 = vpop.f32.mrf.mxu1  ;;  %v3110_v0 = vpop.f32.mrf.mxu0  ;;  %v1691_v55 = vadd.f32 %v4080_v62, %v4046_v10  ;;  %v1693_v3 = vadd.f32 %v4084_v36, %v4048_v26  ;;  %v1699_v10 = vadd.f32 %v4098_v7, %v4056_v54  ;;  %v1700_v26 = vadd.f32 %v4100_v29, %v4058_v25 }
 0x18f   : > { %v1997_v18 = vadd.f32 %v1897_v46, %v1688_v17  ;;  %v2224_v0 = vadd.f32 %v2123_v32, %v1996_v47  ;;  %v1999_v39 = vadd.f32 %v4104_v8, %v1690_v27  ;;  %v1702_v49 = vadd.f32 %v4102_v2, %v4060_v13 }
 0x190   : > { %v4183_v22 = vpop.f32.mrf.mxu1  ;;  %v4185_v28 = vpop.f32.mrf.mxu0  ;;  %v1703_v24 = vadd.f32 %v4106_v19, %v4062_v20  ;;  %v2000_v58 = vadd.f32 %v4108_v60, %v1691_v55  ;;  %v1705_v54 = vadd.f32 %v4110_v63, %v4064_v42  ;;  %v2002_v25 = vadd.f32 %v4112_v53, %v1693_v3 }
 0x191   : > { %v2225_v62 = vadd.f32 %v2125_v15, %v1997_v18  ;;  %v2227_v61 = vadd.f32 %v2127_v57, %v1999_v39  ;;  %v1706_v13 = vadd.f32 %v4114_v37, %v4066_v45  ;;  %v2003_v20 = vadd.f32 %v4116_v1, %v1694_v35  ;;  %v4428_v35 = vld [vmem:[#allocation10_spill] sm:$0xff] }
 0x192   : > { %v4207_v4 = vpop.f32.mrf.mxu1  ;;  %v2385_v59 = vpop.f32.mrf.mxu0  ;;  %v2005_v29 = vadd.f32 %v4118_v40, %v1696_v48  ;;  %v2006_v19 = vadd.f32 %v4120_v41, %v1697_v43  ;;  %v2008_v47 = vadd.f32 %v4122_v30, %v1699_v10  ;;  %v2004_v53 = vadd.f32 %v4124_v5, %v4070_v33  ;;  %v4425_v5 = vld [vmem:[#allocation6_spill] sm:$0xff]  ;;  %v4431_v43 = vld [vmem:[#allocation7_spill] sm:$0xff] }
 0x193   : > { %v2486_v46 = vadd.f32 %v2385_v59, %v2224_v0  ;;  %v2009_v45 = vadd.f32 %v4126_v14, %v1700_v26  ;;  %v2228_v37 = vadd.f32 %v2129_v31, %v2000_v58  ;;  %v2230_v41 = vadd.f32 %v4156_v50, %v2002_v25  ;;  %v4426_v14 = vld [vmem:[#allocation12_spill] sm:$0xff]  ;;  %v4435_v25 = vld [vmem:[#allocation9_spill] sm:$0xff] }
 0x194   : > { %v4220_v36 = vpop.f32.mrf.mxu1  ;;  %v2387_v23 = vpop.f32.mrf.mxu0  ;;  %v1998_v33 = vadd.f32 %v4128_v16, %v4074_v51  ;;  %v2011_v31 = vadd.f32 %v4130_v9, %v1702_v49  ;;  %v2007_v15 = vadd.f32 %v4426_v14, %v4425_v5  ;;  %v4427_v55 = vld [vmem:[#allocation2_spill] sm:$0xff]  ;;  %v2012_v48 = vadd.f32 %v4428_v35, %v1703_v24  ;;  %v4429_v51 = vld [vmem:[#allocation5_spill] sm:$0xff]  ;;  %v4430_v16 = vld [vmem:[#allocation15_spill] sm:$0xff] }
 0x195   : > { %v2612_v52 = vmul.f32 %v4179_v34, %v2486_v46  ;;  %v2487_v7 = vadd.f32 %v2387_v23, %v2225_v62  ;;  %v2231_v50 = vadd.f32 %v4427_v55, %v2003_v20  ;;  %v2001_v9 = vadd.f32 %v4430_v16, %v4429_v51  ;;  %v4432_v23 = vld [vmem:[#allocation4_spill] sm:$0xff]  ;;  %v4436_v20 = vld [vmem:[#allocation13_spill] sm:$0xff]  ;;  %v4442_v35 = vld [vmem:[#allocation19_spill] sm:$0xff] }
 0x196   : > { %v4230_v2 = vpop.f32.mrf.mxu1  ;;  %v2389_v8 = vpop.f32.mrf.mxu0  ;;  %v2014_v59 = vadd.f32 %v4431_v43, %v1705_v54  ;;  %v2233_v46 = vadd.f32 %v4175_v6, %v2005_v29  ;;  %v2010_v54 = vadd.f32 %v4436_v20, %v4435_v25 }
 0x197   : > { %v2650_v42 = vadd.f32 %v4181_v44, %v2612_v52  ;;  %v2613_v60 = vmul.f32 %v4187_v21, %v2487_v7  ;;  %v2489_v63 = vadd.f32 %v2389_v8, %v2227_v61  ;;  %v4433_v61 = vld [vmem:[#allocation3_spill] sm:$0xff]  ;;  %v4434_v52 = vld [vmem:[#allocation8_spill] sm:$0xff]  ;;  %v2229_v51 = vadd.f32 %v4442_v35, %v2001_v9 }
 0x198   : > { %v4244_v1 = vpop.f32.mrf.mxu1  ;;  %v2391_v40 = vpop.f32.mrf.mxu0  ;;  %v2016_v24 = vadd.f32 %v4433_v61, %v4432_v23  ;;  %v2015_v7 = vadd.f32 %v4434_v52, %v1706_v13  ;;  %v4439_v13 = vld [vmem:[#allocation14_spill] sm:$0xff] }
 0x199   : > { %v2671_v17 = vmax.f32 %v2650_v42, 0.0  ;;  %v2651_v30 = vadd.f32 %v4189_v11, %v2613_v60  ;;  %v2615_v32 = vmul.f32 %v4179_v34, %v2489_v63  ;;  %v2490_v57 = vadd.f32 %v2391_v40, %v2228_v37  ;;  %v4437_v40 = vld [vmem:[#allocation11_spill] sm:$0xff] }
 0x19a   : > { %v4254_v38 = vpop.f32.mrf.mxu1  ;;  %v2395_v27 = vpop.f32.mrf.mxu0  ;;  %v2234_v63 = vadd.f32 %v4183_v22, %v2006_v19  ;;  %v2240_v25 = vadd.f32 %v4244_v1, %v2012_v48 }
 0x19b   : > { %2692 = vst [vmem:[%s4242_s29] sm:$0xff] %v2671_v17  ;;  %v2672_v18 = vmax.f32 %v2651_v30, 0.0  ;;  %v2653_v0 = vadd.f32 %v4181_v44, %v2615_v32  ;;  %v2492_v3 = vadd.f32 %v2395_v27, %v2230_v41  ;;  %v2616_v10 = vmul.f32 %v4187_v21, %v2490_v57  ;;  %v4438_v41 = vld [vmem:[#allocation16_spill] sm:$0xff] }
 0x19c   : > { %v2155_v39 = vpop.f32.mrf.mxu1  ;;  %v2397_v62 = vpop.f32.mrf.mxu0  ;;  %v4279_v17 = vadd.f32 %v4438_v41, %v4437_v40  ;;  %v2232_v30 = vadd.f32 %v4439_v13, %v2004_v53  ;;  %v2236_v32 = vadd.f32 %v4207_v4, %v2008_v47  ;;  %v2237_v53 = vadd.f32 %v4220_v36, %v2009_v45 }
 0x19d   : > { %2693 = vst [vmem:[%s4242_s29 + $0x8] sm:$0xff] %v2672_v18  ;;  %v2674_v26 = vmax.f32 %v2653_v0, 0.0  ;;  %v2618_v49 = vmul.f32 %v4179_v34, %v2492_v3  ;;  %v2493_v58 = vadd.f32 %v2397_v62, %v2231_v50  ;;  %v2654_v8 = vadd.f32 %v4189_v11, %v2616_v10  ;;  %v4440_v50 = vld [vmem:[#allocation17_spill] sm:$0xff]  ;;  %v4441_v0 = vld [vmem:[#allocation18_spill] sm:$0xff] }
 0x19e   : > { %v2157_v42 = vpop.f32.mrf.mxu1  ;;  %v2399_v60 = vpop.f32.mrf.mxu0  ;;  %v2226_v18 = vadd.f32 %v4440_v50, %v1998_v33  ;;  %v2235_v3 = vadd.f32 %v4441_v0, %v2007_v15  ;;  %v4444_v33 = vld [vmem:[#allocation21_spill] sm:$0xff]  ;;  %v2239_v15 = vadd.f32 %v4230_v2, %v2011_v31  ;;  %v2242_v20 = vadd.f32 %v4254_v38, %v2014_v59 }
 0x19f   : > { %2695 = vst [vmem:[%s4242_s29 + $0x18] sm:$0xff] %v2674_v26  ;;  %v2656_v6 = vadd.f32 %v4181_v44, %v2618_v49  ;;  %v2619_v29 = vmul.f32 %v4187_v21, %v2493_v58  ;;  %v2495_v37 = vadd.f32 %v2399_v60, %v2233_v46  ;;  %v2675_v5 = vmax.f32 %v2654_v8, 0.0  ;;  %v4443_v46 = vld [vmem:[#allocation20_spill] sm:$0xff] }
 0x1a0   : > { %v2158_v14 = vpop.f32.mrf.mxu1  ;;  %v2401_v57 = vpop.f32.mrf.mxu0  ;;  %v2244_v26 = vadd.f32 %v4443_v46, %v2016_v24  ;;  %v2238_v49 = vadd.f32 %v4444_v33, %v2010_v54  ;;  %v2241_v33 = vadd.f32 %v4185_v28, %v4279_v17 }
 0x1a1   : > { %v2677_v22 = vmax.f32 %v2656_v6, 0.0  ;;  %v2657_v19 = vadd.f32 %v4189_v11, %v2619_v29  ;;  %v2621_v27 = vmul.f32 %v4179_v34, %v2495_v37  ;;  %v2496_v55 = vadd.f32 %v2401_v57, %v2234_v63  ;;  %2696 = vst [vmem:[%s4242_s29 + $0x20] sm:$0xff] %v2675_v5 }
 0x1a2   : > { %v2405_v4 = vpop.f32.mrf.mxu0  ;;  %v3115_v47 = vpop.f32.mrf.mxu1  ;;  %v2243_v6 = vadd.f32 %v2155_v39, %v2015_v7 }
 0x1a3   : > { %2698 = vst [vmem:[%s4242_s29 + $0x30] sm:$0xff] %v2677_v22  ;;  %v2678_v16 = vmax.f32 %v2657_v19, 0.0  ;;  %v2659_v43 = vadd.f32 %v4181_v44, %v2621_v27  ;;  %v2622_v10 = vmul.f32 %v4187_v21, %v2496_v55  ;;  %v2498_v62 = vadd.f32 %v2405_v4, %v2236_v32 }
 0x1a4   : > { %v2494_v9 = vadd.f32 %v3115_v47, %v2232_v30  ;;  %v2407_v58 = vpop.f32.mrf.mxu0  ;;  %v2456_v36 = vpop.f32.mrf.mxu1 }
 0x1a5   : > { %2699 = vst [vmem:[%s4242_s29 + $0x38] sm:$0xff] %v2678_v16  ;;  %v2680_v45 = vmax.f32 %v2659_v43, 0.0  ;;  %v2660_v23 = vadd.f32 %v4189_v11, %v2622_v10  ;;  %v2624_v61 = vmul.f32 %v4179_v34, %v2498_v62  ;;  %v2499_v52 = vadd.f32 %v2407_v58, %v2237_v53 }
 0x1a6   : > { %v2620_v24 = vmul.f32 %v4191_v12, %v2494_v9  ;;  %v2488_v54 = vadd.f32 %v2456_v36, %v2226_v18  ;;  %v2409_v8 = vpop.f32.mrf.mxu0  ;;  %v3116_v2 = vpop.f32.mrf.mxu1 }
 0x1a7   : > { %2701 = vst [vmem:[%s4242_s29 + $0x48] sm:$0xff] %v2680_v45  ;;  %v2681_v31 = vmax.f32 %v2660_v23, 0.0  ;;  %v2662_v42 = vadd.f32 %v4181_v44, %v2624_v61  ;;  %v2625_v60 = vmul.f32 %v4187_v21, %v2499_v52  ;;  %v2501_v63 = vadd.f32 %v2409_v8, %v2239_v15 }
 0x1a8   : > { %v2658_v29 = vadd.f32 %v4193_v56, %v2620_v24  ;;  %v2614_v1 = vmul.f32 %v4191_v12, %v2488_v54  ;;  %v2497_v38 = vadd.f32 %v3116_v2, %v2235_v3  ;;  %v2411_v48 = vpop.f32.mrf.mxu0  ;;  %v2459_v59 = vpop.f32.mrf.mxu1 }
 0x1a9   : > { %2702 = vst [vmem:[%s4242_s29 + $0x50] sm:$0xff] %v2681_v31  ;;  %v2683_v37 = vmax.f32 %v2662_v42, 0.0  ;;  %v2663_v40 = vadd.f32 %v4189_v11, %v2625_v60  ;;  %v2627_v41 = vmul.f32 %v4179_v34, %v2501_v63  ;;  %v2502_v13 = vadd.f32 %v2411_v48, %v2240_v25 }
 0x1aa   : > { %v2679_v30 = vmax.f32 %v2658_v29, 0.0  ;;  %v2652_v32 = vadd.f32 %v4193_v56, %v2614_v1  ;;  %v2623_v39 = vmul.f32 %v4191_v12, %v2497_v38  ;;  %v2491_v7 = vadd.f32 %v2459_v59, %v2229_v51  ;;  %v2415_v5 = vpop.f32.mrf.mxu0  ;;  %v3119_v14 = vpop.f32.mrf.mxu1 }
 0x1ab   : > { %2704 = vst [vmem:[%s4242_s29 + $0x60] sm:$0xff] %v2683_v37  ;;  %v2684_v57 = vmax.f32 %v2663_v40, 0.0  ;;  %v2665_v22 = vadd.f32 %v4181_v44, %v2627_v41  ;;  %v2628_v19 = vmul.f32 %v4187_v21, %v2502_v13  ;;  %v2504_v27 = vadd.f32 %v2415_v5, %v2242_v20 }
 0x1ac   : > { %2700 = vst [vmem:[%s4242_s29 + $0x40] sm:$0xff] %v2679_v30  ;;  %v2673_v55 = vmax.f32 %v2652_v32, 0.0  ;;  %v2661_v50 = vadd.f32 %v4193_v56, %v2623_v39  ;;  %v2617_v18 = vmul.f32 %v4191_v12, %v2491_v7  ;;  %v2506_v0 = vadd.f32 %v3119_v14, %v2244_v26  ;;  %v2417_v3 = vpop.f32.mrf.mxu0  ;;  %v2472_v35 = vpop.f32.mrf.mxu1 }
 0x1ad   : > { %2705 = vst [vmem:[%s4242_s29 + $0x68] sm:$0xff] %v2684_v57  ;;  %v2686_v51 = vmax.f32 %v2665_v22, 0.0  ;;  %v2666_v53 = vadd.f32 %v4189_v11, %v2628_v19  ;;  %v2630_v4 = vmul.f32 %v4179_v34, %v2504_v27  ;;  %v2505_v47 = vadd.f32 %v2417_v3, %v2243_v6 }
 0x1ae   : > { %2694 = vst [vmem:[%s4242_s29 + $0x10] sm:$0xff] %v2673_v55  ;;  %v2682_v16 = vmax.f32 %v2661_v50, 0.0  ;;  %v2655_v43 = vadd.f32 %v4193_v56, %v2617_v18  ;;  %v2632_v10 = vmul.f32 %v4191_v12, %v2506_v0  ;;  %v2500_v62 = vadd.f32 %v2472_v35, %v2238_v49  ;;  %v2419_v46 = vpop.f32.mrf.mxu0  ;;  %v3120_v26 = vpop.f32.mrf.mxu1 }
 0x1af   : > { %2707 = vst [vmem:[%s4242_s29 + $0x78] sm:$0xff] %v2686_v51  ;;  %v2687_v15 = vmax.f32 %v2666_v53, 0.0  ;;  %v2668_v34 = vadd.f32 %v4181_v44, %v2630_v4  ;;  %v2631_v9 = vmul.f32 %v4187_v21, %v2505_v47 }
 0x1b0   : > { %2703 = vst [vmem:[%s4242_s29 + $0x58] sm:$0xff] %v2682_v16  ;;  %v2676_v58 = vmax.f32 %v2655_v43, 0.0  ;;  %v2670_v36 = vadd.f32 %v4193_v56, %v2632_v10  ;;  %v2626_v49 = vmul.f32 %v4191_v12, %v2500_v62  ;;  %v2420_v45 = vpop.f32.mrf.mxu0  ;;  %v2475_v23 = vpop.f32.mrf.mxu1 }
 0x1b1   : > { %2708 = vst [vmem:[%s4242_s29 + $0x80] sm:$0xff] %v2687_v15  ;;  %v2689_v28 = vmax.f32 %v2668_v34, 0.0  ;;  %v2669_v17 = vadd.f32 %v4189_v11, %v2631_v9  ;;  %v2503_v61 = vadd.f32 %v2475_v23, %v2241_v33 }
 0x1b2   : > { %2697 = vst [vmem:[%s4242_s29 + $0x28] sm:$0xff] %v2676_v58  ;;  %v2691_v44 = vmax.f32 %v2670_v36, 0.0  ;;  %v2664_v21 = vadd.f32 %v4193_v56, %v2626_v49 }
 0x1b3   : > { %2710 = vst [vmem:[%s4242_s29 + $0x90] sm:$0xff] %v2689_v28  ;;  %v2690_v52 = vmax.f32 %v2669_v17, 0.0  ;;  %v2629_v25 = vmul.f32 %v4191_v12, %v2503_v61 }
 0x1b4   : > { %2712 = vst [vmem:[%s4242_s29 + $0xa0] sm:$0xff] %v2691_v44  ;;  %v2685_v20 = vmax.f32 %v2664_v21, 0.0 }
 0x1b5   : > { %2711 = vst [vmem:[%s4242_s29 + $0x98] sm:$0xff] %v2690_v52  ;;  %v2667_v24 = vadd.f32 %v4193_v56, %v2629_v25 }
 0x1b6   : > { %2706 = vst [vmem:[%s4242_s29 + $0x70] sm:$0xff] %v2685_v20 }
 0x1b7   : > { %v2688_v54 = vmax.f32 %v2667_v24, 0.0 }
 0x1b9   : > { %2709 = vst [vmem:[%s4242_s29 + $0x88] sm:$0xff] %v2688_v54 }
 0x1ba PF: > { %s16_s18 = sadd.s32 1, %s3192_s18  }
 0x1bb   : > { %p13_p4 = scmp.ge.s32.totalorder %s16_s18, 4  }
 0x1bd   :  { %15 = sbr.rel (!%p13_p4) target bundleno = 1 (0x1), region = 89 }

</bundles_post_ra>
